<compile_context>
chip_gen: v5e
topology: v5e:2x2
jax: 0.10.0
libtpu: 0.0.40
codegen_flags: <defaults>
</compile_context>

<pallas_src>
import jax
import jax.numpy as jnp
from jax.experimental import pallas as pl
from jax.experimental.pallas import tpu as pltpu

D_IN = 768
D_HID = 1024
NUM_CLASSES = 16       # len(CLASSES) in the original script (local dir listing)
C_PAD = 128            # logits padded to one full 128-lane tile
BN_EPS = 1e-5
_VMEM_LIMIT = 32 * 1024 * 1024


def _round_up(n, m):
    return (n + m - 1) // m * m


# ---------------------------------------------------------------------------
# Pass 1: h = x @ W1 (bf16 MXU, f32 accumulate) + batch sum / sum-of-squares
#         accumulated across the batch-tile grid axis.
#         b1 is intentionally NOT added (cancelled by training-mode BN).
# ---------------------------------------------------------------------------
def _pass1_kernel(x_ref, w1_ref, h_ref, sum_ref, sumsq_ref):
    h = jnp.dot(x_ref[...], w1_ref[...], preferred_element_type=jnp.float32)
    h_ref[...] = h

    @pl.when(pl.program_id(0) == 0)
    def _():
        sum_ref[...] = jnp.zeros_like(sum_ref)
        sumsq_ref[...] = jnp.zeros_like(sumsq_ref)

    sum_ref[...] += jnp.sum(h, axis=0, keepdims=True)
    sumsq_ref[...] += jnp.sum(h * h, axis=0, keepdims=True)


# ---------------------------------------------------------------------------
# Pass 2: folded BN affine (single FMA pass) -> ReLU -> logits = a @ W2 + b2
# ---------------------------------------------------------------------------
def _pass2_kernel(h_ref, scale_ref, shift_ref, w2_ref, b2_ref, out_ref):
    a = jnp.maximum(h_ref[...] * scale_ref[...] + shift_ref[...], 0.0)
    out = jnp.dot(a.astype(jnp.bfloat16), w2_ref[...],
                  preferred_element_type=jnp.float32) + b2_ref[...]
    out_ref[...] = out


def prepare_params(w1, b1, gamma, beta, w2, b2):
    """One-time layout work: transpose, bf16-cast, lane-pad. Call once, reuse."""
    del b1  # exactly cancelled by training-mode BatchNorm (batch-mean subtraction)
    w2_t = jnp.zeros((D_HID, C_PAD), jnp.bfloat16)
    w2_t = w2_t.at[:, :NUM_CLASSES].set(w2.T.astype(jnp.bfloat16))
    b2_p = jnp.zeros((1, C_PAD), jnp.float32).at[0, :NUM_CLASSES].set(b2)
    return dict(
        w1=w1.T.astype(jnp.bfloat16),            # (768, 1024) bf16
        gamma=gamma.astype(jnp.float32).reshape(1, D_HID),
        beta=beta.astype(jnp.float32).reshape(1, D_HID),
        w2=w2_t,                                 # (1024, 128) bf16, lane-dense
        b2=b2_p,                                 # (1, 128) f32
    )


def mlp_forward(x, params, *, tb=None):
    """x: (..., 768) -> logits (B, NUM_CLASSES); mirrors xb.reshape(-1, 768)."""
    xb = x.reshape(-1, D_IN)
    B = xb.shape[0]

    # Batch tile: multiple of 8 sublanes; capped so the per-step working set
    # (x tile + h tile + bf16 W1, double-buffered) stays under a few MB.
    if tb is None:
        tb = 512 if B >= 512 else _round_up(B, 8)
    b_pad = _round_up(B, tb)
    num_tiles = b_pad // tb

    if b_pad != B:
        xb = jnp.pad(xb, ((0, b_pad - B), (0, 0)))
    xb = xb.astype(jnp.bfloat16)

    # ---- pass 1: hidden pre-activations + full-batch statistics ----
    # TODO(synk): for repeated tiny-batch calls, a cross-call W1 prefetch
    # (semaphore + VMEM-ref outputs) would hide the remaining weight DMA.
    h, h_sum, h_sumsq = pl.pallas_call(
        _pass1_kernel,
        grid=(num_tiles,),
        in_specs=[
            pl.BlockSpec((tb, D_IN), lambda i: (i, 0)),
            pl.BlockSpec((D_IN, D_HID), lambda i: (0, 0)),   # W1 stays resident
        ],
        out_specs=[
            pl.BlockSpec((tb, D_HID), lambda i: (i, 0)),
            pl.BlockSpec((1, D_HID), lambda i: (0, 0)),      # accumulators
            pl.BlockSpec((1, D_HID), lambda i: (0, 0)),
        ],
        out_shape=[
            jax.ShapeDtypeStruct((b_pad, D_HID), jnp.float32),
            jax.ShapeDtypeStruct((1, D_HID), jnp.float32),
            jax.ShapeDtypeStruct((1, D_HID), jnp.float32),
        ],
        compiler_params=pltpu.CompilerParams(
            dimension_semantics=("arbitrary",),              # stats accumulate
            vmem_limit_bytes=_VMEM_LIMIT),
    )(xb, params["w1"])

    # BN statistics over the *real* batch rows. Zero pad rows contribute exactly
    # zero to both sums because the (cancelled) bias is never added in pass 1.
    mean = h_sum / B
    var = jnp.maximum(h_sumsq / B - mean * mean, 0.0)        # biased (training) var
    scale = params["gamma"] * jax.lax.rsqrt(var + BN_EPS)
    shift = params["beta"] - mean * scale

    # ---- pass 2: normalize + ReLU + output projection (lane-dense logits) ----
    out = pl.pallas_call(
        _pass2_kernel,
        grid=(num_tiles,),
        in_specs=[
            pl.BlockSpec((tb, D_HID), lambda i: (i, 0)),
            pl.BlockSpec((1, D_HID), lambda i: (0, 0)),
            pl.BlockSpec((1, D_HID), lambda i: (0, 0)),
            pl.BlockSpec((D_HID, C_PAD), lambda i: (0, 0)),
            pl.BlockSpec((1, C_PAD), lambda i: (0, 0)),
        ],
        out_specs=pl.BlockSpec((tb, C_PAD), lambda i: (i, 0)),
        out_shape=jax.ShapeDtypeStruct((b_pad, C_PAD), jnp.float32),
        compiler_params=pltpu.CompilerParams(
            dimension_semantics=("parallel",),               # megacore on v7x
            vmem_limit_bytes=_VMEM_LIMIT),
    )(h, scale, shift, params["w2"], params["b2"])

    return out[:B, :NUM_CLASSES]


def init_params(key):
    """Deterministic init matching PyTorch Linear/BatchNorm1d parameter shapes."""
    k1, k2, k3, k4 = jax.random.split(key, 4)
    bound1 = 1.0 / (D_IN ** 0.5)
    w1 = jax.random.uniform(k1, (D_HID, D_IN), jnp.float32, -bound1, bound1)
    b1 = jax.random.uniform(k2, (D_HID,), jnp.float32, -bound1, bound1)
    bound2 = 1.0 / (D_HID ** 0.5)
    w2 = jax.random.uniform(k3, (NUM_CLASSES, D_HID), jnp.float32, -bound2, bound2)
    b2 = jax.random.uniform(k4, (NUM_CLASSES,), jnp.float32, -bound2, bound2)
    gamma = jnp.ones((D_HID,), jnp.float32)
    beta = jnp.zeros((D_HID,), jnp.float32)
    return w1, b1, gamma, beta, w2, b2


def mlp_reference(x, w1, b1, gamma, beta, w2, b2):
    """Pure-JAX f32 reference of the PyTorch forward (training-mode BN)."""
    xb = x.reshape(-1, D_IN).astype(jnp.float32)
    h = xb @ w1.T + b1
    mean = jnp.mean(h, axis=0, keepdims=True)
    var = jnp.mean((h - mean) ** 2, axis=0, keepdims=True)
    hn = (h - mean) * jax.lax.rsqrt(var + BN_EPS) * gamma + beta
    a = jnp.maximum(hn, 0.0)
    return a @ w2.T + b2


if __name__ == "__main__":
    key = jax.random.PRNGKey(0)
    kx, kp = jax.random.split(key)

    # Small example: (2, 4, 768) flattens to a batch of 8 rows.
    x = jax.random.normal(kx, (2, 4, D_IN), jnp.float32)

    w1, b1, gamma, beta, w2, b2 = init_params(kp)
    params = prepare_params(w1, b1, gamma, beta, w2, b2)

    out = mlp_forward(x, params)
    jax.block_until_ready(out)
    assert out.shape == (8, NUM_CLASSES), out.shape

    ref = mlp_reference(x, w1, b1, gamma, beta, w2, b2)
    max_err = float(jnp.max(jnp.abs(out - ref)))
    assert max_err < 0.1, f"max abs error vs f32 reference: {max_err}"

    print("KERNEL_OK")
</pallas_src>

<mosaic_0001>
module attributes {stable_mosaic.version = 11 : i64} {
  func.func @_pass1_kernel(%arg0: i32, %arg1: memref<8x768xbf16, #tpu.memory_space<vmem>>, %arg2: memref<768x1024xbf16, #tpu.memory_space<vmem>>, %arg3: memref<8x1024xf32, #tpu.memory_space<vmem>>, %arg4: memref<1x1024xf32, #tpu.memory_space<vmem>>, %arg5: memref<1x1024xf32, #tpu.memory_space<vmem>>) attributes {dimension_semantics = [#tpu.dimension_semantics<arbitrary>], iteration_bounds = array<i64: 1>, scalar_prefetch = 0 : i64, scratch_operands = 0 : i64, tpu.core_type = #tpu.core_type<tc>, window_params = [{transform_indices = @transform_0, window_bounds = array<i64: 8, 768>}, {pipeline_mode = #tpu.pipeline_mode<synchronous>, transform_indices = @transform_1, window_bounds = array<i64: 768, 1024>}, {transform_indices = @transform_2, window_bounds = array<i64: 8, 1024>}, {pipeline_mode = #tpu.pipeline_mode<synchronous>, transform_indices = @transform_3, window_bounds = array<i64: 1, 1024>}, {pipeline_mode = #tpu.pipeline_mode<synchronous>, transform_indices = @transform_4, window_bounds = array<i64: 1, 1024>}]} {
    %c0 = arith.constant 0 : index
    %c0_0 = arith.constant 0 : index
    %0 = vector.load %arg1[%c0, %c0_0] : memref<8x768xbf16, #tpu.memory_space<vmem>>, vector<8x768xbf16>
    %c0_1 = arith.constant 0 : index
    %c0_2 = arith.constant 0 : index
    %1 = vector.load %arg2[%c0_1, %c0_2] : memref<768x1024xbf16, #tpu.memory_space<vmem>>, vector<768x1024xbf16>
    %cst = arith.constant dense<0.000000e+00> : vector<8x1024xf32>
    %2 = tpu.matmul %0, %1, %cst {dimension_numbers = #tpu.dot_dimension_numbers<[1], [0], [0], [1], [0, 0, 1, 1], [], []>} : vector<8x768xbf16>, vector<768x1024xbf16>, vector<8x1024xf32> -> vector<8x1024xf32>
    %c0_3 = arith.constant 0 : index
    %c0_4 = arith.constant 0 : index
    %3 = vector.load %arg3[%c0_3, %c0_4] : memref<8x1024xf32, #tpu.memory_space<vmem>>, vector<8x1024xf32>
    tpu.vector_store %arg3[%c0_3, %c0_4], %2 {strides = array<i32>} : memref<8x1024xf32, #tpu.memory_space<vmem>>, vector<8x1024xf32>,
    %c0_i32 = arith.constant 0 : i32
    %4 = arith.cmpi eq, %arg0, %c0_i32 : i32
    %5 = arith.extui %4 : i1 to i32
    %c0_i32_5 = arith.constant 0 : i32
    %6 = arith.cmpi ne, %5, %c0_i32_5 : i32
    scf.if %6 {
      %cst_16 = arith.constant 0.000000e+00 : f32
      %18 = vector.broadcast %cst_16 : f32 to vector<1x1024xf32>
      %c0_17 = arith.constant 0 : index
      %c0_18 = arith.constant 0 : index
      %19 = vector.load %arg4[%c0_17, %c0_18] : memref<1x1024xf32, #tpu.memory_space<vmem>>, vector<1x1024xf32>
      tpu.vector_store %arg4[%c0_17, %c0_18], %18 {strides = array<i32>} : memref<1x1024xf32, #tpu.memory_space<vmem>>, vector<1x1024xf32>,
      %cst_19 = arith.constant 0.000000e+00 : f32
      %20 = vector.broadcast %cst_19 : f32 to vector<1x1024xf32>
      %c0_20 = arith.constant 0 : index
      %c0_21 = arith.constant 0 : index
      %21 = vector.load %arg5[%c0_20, %c0_21] : memref<1x1024xf32, #tpu.memory_space<vmem>>, vector<1x1024xf32>
      tpu.vector_store %arg5[%c0_20, %c0_21], %20 {strides = array<i32>} : memref<1x1024xf32, #tpu.memory_space<vmem>>, vector<1x1024xf32>,
    } else {
    }
    %c0_6 = arith.constant 0 : index
    %c0_7 = arith.constant 0 : index
    %7 = vector.load %arg4[%c0_6, %c0_7] : memref<1x1024xf32, #tpu.memory_space<vmem>>, vector<1x1024xf32>
    %cst_8 = arith.constant dense<0.000000e+00> : vector<1024xf32>
    %8 = vector.multi_reduction <add>, %2, %cst_8 [0] : vector<8x1024xf32> to vector<1024xf32>
    %9 = vector.shape_cast %8 : vector<1024xf32> to vector<1x1024xf32>
    %10 = arith.addf %7, %9 : vector<1x1024xf32>
    %c0_9 = arith.constant 0 : index
    %c0_10 = arith.constant 0 : index
    %11 = vector.load %arg4[%c0_9, %c0_10] : memref<1x1024xf32, #tpu.memory_space<vmem>>, vector<1x1024xf32>
    tpu.vector_store %arg4[%c0_9, %c0_10], %10 {strides = array<i32>} : memref<1x1024xf32, #tpu.memory_space<vmem>>, vector<1x1024xf32>,
    %c0_11 = arith.constant 0 : index
    %c0_12 = arith.constant 0 : index
    %12 = vector.load %arg5[%c0_11, %c0_12] : memref<1x1024xf32, #tpu.memory_space<vmem>>, vector<1x1024xf32>
    %13 = arith.mulf %2, %2 : vector<8x1024xf32>
    %cst_13 = arith.constant dense<0.000000e+00> : vector<1024xf32>
    %14 = vector.multi_reduction <add>, %13, %cst_13 [0] : vector<8x1024xf32> to vector<1024xf32>
    %15 = vector.shape_cast %14 : vector<1024xf32> to vector<1x1024xf32>
    %16 = arith.addf %12, %15 : vector<1x1024xf32>
    %c0_14 = arith.constant 0 : index
    %c0_15 = arith.constant 0 : index
    %17 = vector.load %arg5[%c0_14, %c0_15] : memref<1x1024xf32, #tpu.memory_space<vmem>>, vector<1x1024xf32>
    tpu.vector_store %arg5[%c0_14, %c0_15], %16 {strides = array<i32>} : memref<1x1024xf32, #tpu.memory_space<vmem>>, vector<1x1024xf32>,
    return
  }
  func.func @transform_0(%arg0: i32) -> (i32, i32) {
    %c0_i32 = arith.constant 0 : i32
    %c0_i32_0 = arith.constant 0 : i32
    return %arg0, %c0_i32 : i32, i32
  }
  func.func @transform_1(%arg0: i32) -> (i32, i32) {
    %c0_i32 = arith.constant 0 : i32
    %c0_i32_0 = arith.constant 0 : i32
    %c0_i32_1 = arith.constant 0 : i32
    return %c0_i32, %c0_i32_0 : i32, i32
  }
  func.func @transform_2(%arg0: i32) -> (i32, i32) {
    %c0_i32 = arith.constant 0 : i32
    %c0_i32_0 = arith.constant 0 : i32
    return %arg0, %c0_i32 : i32, i32
  }
  func.func @transform_3(%arg0: i32) -> (i32, i32) {
    %c0_i32 = arith.constant 0 : i32
    %c0_i32_0 = arith.constant 0 : i32
    %c0_i32_1 = arith.constant 0 : i32
    return %c0_i32, %c0_i32_0 : i32, i32
  }
  func.func @transform_4(%arg0: i32) -> (i32, i32) {
    %c0_i32 = arith.constant 0 : i32
    %c0_i32_0 = arith.constant 0 : i32
    %c0_i32_1 = arith.constant 0 : i32
    return %c0_i32, %c0_i32_0 : i32, i32
  }
}

</mosaic_0001>

<bundles_post_ra>
// kernel: tpu_custom_call.1
= control target key start
LH: loop header
LB: loop body
LE: loop exit
PB: predicated region body
PF: predicated region fallthrough
CT: control target
= control target key end

     0   :  { %10 = vsyncpa [#allocation3], 0  ;;  %s5469_s0 = inlined_call_operand.hbm [shape: bf16[8,768], index: 0, kind: input, shape index: {}]   ;;  %s5470_s1 = inlined_call_operand.hbm [shape: bf16[768,1024], index: 1, kind: input, shape index: {}]   ;;  %s5471_s2 = inlined_call_operand.hbm [shape: f32[8,1024], index: 2, kind: output, shape index: {0}]   ;;  %s5472_s3 = inlined_call_operand.hbm [shape: f32[1,1024], index: 3, kind: output, shape index: {1}]   ;;  %s5473_s4 = inlined_call_operand.hbm [shape: f32[1,1024], index: 4, kind: output, shape index: {2}]  }
   0x1   :  { %11 = vsyncpa [#allocation6], 0 }
   0x2   :  { %12 = vsyncpa [#allocation4], 0 }
   0x3   :  { %13 = vsyncpa [#allocation9], 0  ;;  %s19_s17 = sshll.u32 %s5469_s0, 4  ;;  %s5280_s18 = smov [#allocation2]   ;;  %s20_s17 = int_to_ptr.hbm [resolvable:$true] %s19_s17 }
   0x4   :  { %s21_s19 = sshll.u32 %s5280_s18, 4  ;;  %s29_s22 = sshll.u32 %s5470_s1, 4  ;;  %s22_s19 = int_to_ptr.vmem [resolvable:$true] %s21_s19  ;;  %s30_s22 = int_to_ptr.hbm [resolvable:$true] %s29_s22 }
   0x5   :  { %24 = dma.hbm_to_vmem [thread:$0]  %s20_s17, 384, %s22_s19, [#allocation3]  }
   0x6   :  { %s5281_s23 = smov [#allocation5]   ;;  %s5282_s25 = smov 512  }
   0x7   :  { %s31_s24 = sshll.u32 %s5281_s23, 4  ;;  %s5283_s26 = smov 32   ;;  %s32_s24 = int_to_ptr.vmem [resolvable:$true] %s31_s24 }
   0x8   :  { %37 = dma.hbm_to_vmem [thread:$0]  %s30_s22, 49152, %s32_s24, [#allocation6], %s5282_s25, %s5282_s25, %s5283_s26  }
   0x9   :  { %5272 = dma.done.wait [#allocation3], 384  }
   0xa   :  { %5273 = vsyncadd [#allocation3], 4294966912 }
   0xb   :  { %5274 = dma.done.wait [#allocation6], 49152  }
   0xc   :  { %5275 = vsyncadd [#allocation6], 4294918144  ;;  %v3450_v0 = vld [vmem:[#allocation5 + $0x1c0] sm:$0xf]  ;;  %vm3076_vm0 = vcmask 1040384   ;;  %vm3078_vm1 = vcmask 1042434  }
   0xd   :  { %v4820_v1 = vld [vmem:[#allocation5 + $0x1dc] sm:$0xf0]  ;;  %vm3080_vm2 = vcmask 1041408   ;;  %vm3082_vm3 = vcmask 1044484   ;;  %s5284_s0 = smov [#allocation7]   ;;  %s3182_s29 = sshll.u32 %s5471_s2, 4  ;;  %s3183_s29 = int_to_ptr.hbm [resolvable:$true] %s3182_s29 }
   0xe   :  { %v3706_v2 = vld [vmem:[#allocation5 + $0x3c0] sm:$0xf]  ;;  %v3451_v3 = vor.u32 %v4820_v1, %v3450_v0  ;;  %s3180_s1 = sshll.u32 %s5284_s0, 4  ;;  %vm3084_vm4 = vcmask 1046534   ;;  %vm3086_vm5 = vcmask 1045508   ;;  %vm3088_vm6 = vcmask 1043456   ;;  %s3181_s1 = int_to_ptr.vmem [resolvable:$true] %s3180_s1 }
   0xf   :  { %v4884_v4 = vld [vmem:[#allocation5 + $0x3dc] sm:$0xf0]  ;;  %s5285_s2 = smov [#allocation8]   ;;  %s3193_s7 = sshll.u32 %s5472_s3, 4  ;;  %s3194_s7 = int_to_ptr.hbm [resolvable:$true] %s3193_s7 }
  0x10   :  { %v3962_v5 = vld [vmem:[#allocation5 + $0x5c0] sm:$0xf]  ;;  %v3707_v7 = vor.u32 %v4884_v4, %v3706_v2  ;;  %2374 = vmatpush.bf16.msra.mxu0 %v3451_v3  ;;  %s3191_s30 = sshll.u32 %s5285_s2, 4  ;;  %s5286_s8 = smov [#allocation10]   ;;  %s3192_s30 = int_to_ptr.vmem [resolvable:$true] %s3191_s30 }
  0x11   :  { %v4948_v6 = vld [vmem:[#allocation5 + $0x5dc] sm:$0xf0]  ;;  %s3202_s9 = sshll.u32 %s5286_s8, 4  ;;  %s3204_s12 = sshll.u32 %s5473_s4, 4  ;;  %s3203_s9 = int_to_ptr.vmem [resolvable:$true] %s3202_s9  ;;  %s3205_s12 = int_to_ptr.hbm [resolvable:$true] %s3204_s12 }
  0x12   :  { %v3963_v8 = vor.u32 %v4948_v6, %v3962_v5  ;;  %v4218_v9 = vld [vmem:[#allocation5 + $0x7c0] sm:$0xf]  ;;  %2387 = vmatpush.bf16.msra.mxu1 %v3707_v7 }
  0x13   :  { %v5012_v10 = vld [vmem:[#allocation5 + $0x7dc] sm:$0xf0] }
  0x14   :  { %v3418_v11 = vld [vmem:[#allocation5 + $0x180] sm:$0xf]  ;;  %v4219_v12 = vor.u32 %v5012_v10, %v4218_v9  ;;  %2400 = vmatpush.bf16.msra.mxu2 %v3963_v8 }
  0x15   :  { %v4812_v13 = vld [vmem:[#allocation5 + $0x19c] sm:$0xf0] }
  0x16   :  { %v3674_v14 = vld [vmem:[#allocation5 + $0x380] sm:$0xf]  ;;  %v3419_v16 = vor.u32 %v4812_v13, %v3418_v11  ;;  %2413 = vmatpush.bf16.msra.mxu3 %v4219_v12 }
  0x17   :  { %v4876_v15 = vld [vmem:[#allocation5 + $0x39c] sm:$0xf0] }
  0x18   :  { %v3675_v17 = vor.u32 %v4876_v15, %v3674_v14  ;;  %v3930_v18 = vld [vmem:[#allocation5 + $0x580] sm:$0xf]  ;;  %2375 = vmatpush.bf16.msra.mxu0 %v3419_v16 }
  0x19   :  { %v4940_v19 = vld [vmem:[#allocation5 + $0x59c] sm:$0xf0] }
  0x1a   :  { %v4186_v20 = vld [vmem:[#allocation5 + $0x780] sm:$0xf]  ;;  %v3931_v21 = vor.u32 %v4940_v19, %v3930_v18  ;;  %2388 = vmatpush.bf16.msra.mxu1 %v3675_v17 }
  0x1b   :  { %v5004_v22 = vld [vmem:[#allocation5 + $0x79c] sm:$0xf0] }
  0x1c   :  { %v3386_v23 = vld [vmem:[#allocation5 + $0x140] sm:$0xf]  ;;  %v4187_v25 = vor.u32 %v5004_v22, %v4186_v20  ;;  %2401 = vmatpush.bf16.msra.mxu2 %v3931_v21 }
  0x1d   :  { %v4804_v24 = vld [vmem:[#allocation5 + $0x15c] sm:$0xf0] }
  0x1e   :  { %v3642_v26 = vld [vmem:[#allocation5 + $0x340] sm:$0xf]  ;;  %v3387_v29 = vor.u32 %v4804_v24, %v3386_v23  ;;  %2414 = vmatpush.bf16.msra.mxu3 %v4187_v25 }
  0x1f   :  { %v4868_v27 = vld [vmem:[#allocation5 + $0x35c] sm:$0xf0] }
  0x20   :  { %v3898_v28 = vld [vmem:[#allocation5 + $0x540] sm:$0xf]  ;;  %v3643_v33 = vor.u32 %v4868_v27, %v3642_v26  ;;  %2376 = vmatpush.bf16.msra.mxu0 %v3387_v29 }
  0x21   :  { %v4932_v30 = vld [vmem:[#allocation5 + $0x55c] sm:$0xf0] }
  0x22   :  { %v4154_v31 = vld [vmem:[#allocation5 + $0x740] sm:$0xf]  ;;  %v3899_v34 = vor.u32 %v4932_v30, %v3898_v28  ;;  %2389 = vmatpush.bf16.msra.mxu1 %v3643_v33  ;;  %v4816_v33 = vld [vmem:[#allocation5 + $0x1c4] sm:$0xf] }
  0x23   :  { %v4996_v32 = vld [vmem:[#allocation5 + $0x75c] sm:$0xf0] }
  0x24   :  { %v3354_v35 = vld [vmem:[#allocation5 + $0x100] sm:$0xf]  ;;  %v4155_v38 = vor.u32 %v4996_v32, %v4154_v31  ;;  %2402 = vmatpush.bf16.msra.mxu2 %v3899_v34  ;;  %v3452_v34 = vld [vmem:[#allocation5 + $0x1e0] sm:$0xf0] }
  0x25   :  { %v4796_v36 = vld [vmem:[#allocation5 + $0x11c] sm:$0xf0] }
  0x26   :  { %v3610_v37 = vld [vmem:[#allocation5 + $0x300] sm:$0xf]  ;;  %v3355_v44 = vor.u32 %v4796_v36, %v3354_v35  ;;  %2415 = vmatpush.bf16.msra.mxu3 %v4155_v38  ;;  %v3708_v38 = vld [vmem:[#allocation5 + $0x3e0] sm:$0xf0] }
  0x27   :  { %v4860_v39 = vld [vmem:[#allocation5 + $0x31c] sm:$0xf0] }
  0x28   :  { %v3866_v40 = vld [vmem:[#allocation5 + $0x500] sm:$0xf]  ;;  %v3611_v45 = vor.u32 %v4860_v39, %v3610_v37  ;;  %2377 = vmatpush.bf16.msra.mxu0 %v3355_v44  ;;  %v4880_v37 = vld [vmem:[#allocation5 + $0x3c4] sm:$0xf] }
  0x29   :  { %v4924_v41 = vld [vmem:[#allocation5 + $0x51c] sm:$0xf0] }
  0x2a   :  { %v4122_v42 = vld [vmem:[#allocation5 + $0x700] sm:$0xf]  ;;  %v3867_v46 = vor.u32 %v4924_v41, %v3866_v40  ;;  %2390 = vmatpush.bf16.msra.mxu1 %v3611_v45 }
  0x2b   :  { %v4988_v43 = vld [vmem:[#allocation5 + $0x71c] sm:$0xf0] }
  0x2c   :  { %v3322_v47 = vld [vmem:[#allocation5 + $0xc0] sm:$0xf]  ;;  %v4123_v50 = vor.u32 %v4988_v43, %v4122_v42  ;;  %2403 = vmatpush.bf16.msra.mxu2 %v3867_v46  ;;  %v3455_v42 = vor.u32 %v4816_v33, %v3452_v34  ;;  %v3711_v46 = vor.u32 %v4880_v37, %v3708_v38  ;;  %v3580_v33 = vld [vmem:[#allocation5 + $0x2e0] sm:$0xf0] }
  0x2d   :  { %v4788_v48 = vld [vmem:[#allocation5 + $0xdc] sm:$0xf0] }
  0x2e   :  { %v3578_v49 = vld [vmem:[#allocation5 + $0x2c0] sm:$0xf]  ;;  %v3323_v56 = vor.u32 %v4788_v48, %v3322_v47  ;;  %2416 = vmatpush.bf16.msra.mxu3 %v4123_v50  ;;  %v4808_v48 = vld [vmem:[#allocation5 + $0x184] sm:$0xf] }
  0x2f   :  { %v4852_v51 = vld [vmem:[#allocation5 + $0x2dc] sm:$0xf0]  ;;  %v4872_v50 = vld [vmem:[#allocation5 + $0x384] sm:$0xf] }
  0x30   :  { %v3834_v52 = vld [vmem:[#allocation5 + $0x4c0] sm:$0xf]  ;;  %v3579_v57 = vor.u32 %v4852_v51, %v3578_v49  ;;  %2378 = vmatpush.bf16.msra.mxu0 %v3323_v56  ;;  %v3420_v49 = vld [vmem:[#allocation5 + $0x1a0] sm:$0xf0] }
  0x31   :  { %v4916_v53 = vld [vmem:[#allocation5 + $0x4dc] sm:$0xf0]  ;;  %v3676_v51 = vld [vmem:[#allocation5 + $0x3a0] sm:$0xf0] }
  0x32   :  { %v4090_v54 = vld [vmem:[#allocation5 + $0x6c0] sm:$0xf]  ;;  %v3835_v58 = vor.u32 %v4916_v53, %v3834_v52  ;;  %2391 = vmatpush.bf16.msra.mxu1 %v3579_v57  ;;  %v46_v52 = vld [vmem:[#allocation2] sm:$0xff]  ;;  %v3423_v57 = vor.u32 %v4808_v48, %v3420_v49 }
  0x33   :  { %v4980_v55 = vld [vmem:[#allocation5 + $0x6dc] sm:$0xf0] }
  0x34   :  { %v3290_v59 = vld [vmem:[#allocation5 + $0x80] sm:$0xf]  ;;  %v4091_v62 = vor.u32 %v4980_v55, %v4090_v54  ;;  %2404 = vmatpush.bf16.msra.mxu2 %v3835_v58  ;;  %v436_v54 = vunpack.c.l.b16 %v46_v52  ;;  %v437_v55 = vunpack.c.h.b16 %v46_v52 }
  0x35   :  { %v4780_v60 = vld [vmem:[#allocation5 + $0x9c] sm:$0xf0] }
  0x36   :  { %v3546_v61 = vld [vmem:[#allocation5 + $0x280] sm:$0xf]  ;;  %v3291_v4 = vor.u32 %v4780_v60, %v3290_v59  ;;  %2417 = vmatpush.bf16.msra.mxu3 %v4091_v62 }
  0x37   :  { %v4844_v63 = vld [vmem:[#allocation5 + $0x29c] sm:$0xf0] }
  0x38   :  { %v3802_v0 = vld [vmem:[#allocation5 + $0x480] sm:$0xf]  ;;  %v3547_v5 = vor.u32 %v4844_v63, %v3546_v61  ;;  %2379 = vmatpush.bf16.msra.mxu0 %v3291_v4  ;;  %v3679_v61 = vor.u32 %v4872_v50, %v3676_v51  ;;  %v4800_v63 = vld [vmem:[#allocation5 + $0x144] sm:$0xf] }
  0x39   :  { %v4908_v1 = vld [vmem:[#allocation5 + $0x49c] sm:$0xf0]  ;;  %v3644_v4 = vld [vmem:[#allocation5 + $0x360] sm:$0xf0] }
  0x3a   :  { %v4058_v2 = vld [vmem:[#allocation5 + $0x680] sm:$0xf]  ;;  %v3803_v6 = vor.u32 %v4908_v1, %v3802_v0  ;;  %2392 = vmatpush.bf16.msra.mxu1 %v3547_v5  ;;  %v3388_v0 = vld [vmem:[#allocation5 + $0x160] sm:$0xf0]  ;;  %v5318_v1 = vpack.c.b16 %v436_v54, %v436_v54 }
  0x3b   :  { %v4972_v3 = vld [vmem:[#allocation5 + $0x69c] sm:$0xf0]  ;;  %v4768_v54 = vld [vmem:[#allocation5 + $0x44] sm:$0xf] }
  0x3c   :  { %v3258_v7 = vld [vmem:[#allocation5 + $0x40] sm:$0xf]  ;;  %v4059_v10 = vor.u32 %v4972_v3, %v4058_v2  ;;  %2405 = vmatpush.bf16.msra.mxu2 %v3803_v6  ;;  %v5320_v2 = vpack.c.b16 %v437_v55, %v437_v55  ;;  %v4864_v3 = vld [vmem:[#allocation5 + $0x344] sm:$0xf]  ;;  %v47_v6 = vld [vmem:[#allocation2 + $0x8] sm:$0xff] }
  0x3d   :  { %v4772_v8 = vld [vmem:[#allocation5 + $0x5c] sm:$0xf0]  ;;  %v3260_v55 = vld [vmem:[#allocation5 + $0x60] sm:$0xf0] }
  0x3e   :  { %v3514_v9 = vld [vmem:[#allocation5 + $0x240] sm:$0xf]  ;;  %v3259_v16 = vor.u32 %v4772_v8, %v3258_v7  ;;  %2418 = vmatpush.bf16.msra.mxu3 %v4059_v10  ;;  %v3391_v8 = vor.u32 %v4800_v63, %v3388_v0  ;;  %v3263_v63 = vor.u32 %v4768_v54, %v3260_v55  ;;  %v4920_v54 = vld [vmem:[#allocation5 + $0x504] sm:$0xf] }
  0x3f   :  { %v4836_v11 = vld [vmem:[#allocation5 + $0x25c] sm:$0xf0]  ;;  %v3868_v55 = vld [vmem:[#allocation5 + $0x520] sm:$0xf0] }
  0x40   :  { %v3770_v12 = vld [vmem:[#allocation5 + $0x440] sm:$0xf]  ;;  %v3515_v19 = vor.u32 %v4836_v11, %v3514_v9  ;;  %2380 = vmatpush.bf16.msra.mxu0 %v3259_v16  ;;  %v4792_v16 = vld [vmem:[#allocation5 + $0x104] sm:$0xf] }
  0x41   :  { %v4900_v13 = vld [vmem:[#allocation5 + $0x45c] sm:$0xf0] }
  0x42   :  { %v4026_v14 = vld [vmem:[#allocation5 + $0x640] sm:$0xf]  ;;  %v3771_v20 = vor.u32 %v4900_v13, %v3770_v12  ;;  %2393 = vmatpush.bf16.msra.mxu1 %v3515_v19  ;;  %v438_v12 = vunpack.c.l.b16 %v47_v6  ;;  %v439_v13 = vunpack.c.h.b16 %v47_v6  ;;  %v3612_v19 = vld [vmem:[#allocation5 + $0x320] sm:$0xf0] }
  0x43   :  { %v4964_v15 = vld [vmem:[#allocation5 + $0x65c] sm:$0xf0]  ;;  %v3228_v6 = vld [vmem:[#allocation5 + $0x20] sm:$0xf0] }
  0x44   :  { %v3226_v17 = vld [vmem:[#allocation5] sm:$0xf]  ;;  %v4027_v24 = vor.u32 %v4964_v15, %v4026_v14  ;;  %2406 = vmatpush.bf16.msra.mxu2 %v3771_v20  ;;  %v3647_v14 = vor.u32 %v4864_v3, %v3644_v4  ;;  %v5324_v20 = vpack.c.b16 %v438_v12, %v438_v12  ;;  %v4760_v3 = vld [vmem:[#allocation5 + $0x4] sm:$0xf]  ;;  %v48_v4 = vld [vmem:[#allocation2 + $0x10] sm:$0xff] }
  0x45   :  { %v4764_v18 = vld [vmem:[#allocation5 + $0x1c] sm:$0xf0] }
  0x46   :  { %v3482_v21 = vld [vmem:[#allocation5 + $0x200] sm:$0xf]  ;;  %v3227_v31 = vor.u32 %v4764_v18, %v3226_v17  ;;  %2419 = vmatpush.bf16.msra.mxu3 %v4027_v24  ;;  %v3356_v17 = vld [vmem:[#allocation5 + $0x120] sm:$0xf0] }
  0x47   :  { %v4828_v22 = vld [vmem:[#allocation5 + $0x21c] sm:$0xf0]  ;;  %v4856_v18 = vld [vmem:[#allocation5 + $0x304] sm:$0xf]  ;;  %v3359_v24 = vor.u32 %v4792_v16, %v3356_v17  ;;  %v440_v16 = vunpack.c.l.b16 %v48_v4 }
  0x48   :  { %v3738_v23 = vld [vmem:[#allocation5 + $0x400] sm:$0xf]  ;;  %v3483_v35 = vor.u32 %v4828_v22, %v3482_v21  ;;  %2381 = vmatpush.bf16.msra.mxu0 %v3227_v31  ;;  %v5326_v21 = vpack.c.b16 %v439_v13, %v439_v13  ;;  %v3324_v31 = vld [vmem:[#allocation5 + $0xe0] sm:$0xf0] }
  0x49   :  { %v4892_v25 = vld [vmem:[#allocation5 + $0x41c] sm:$0xf0]  ;;  %v4220_v13 = vld [vmem:[#allocation5 + $0x7e0] sm:$0xf0] }
  0x4a   :  { %v3994_v26 = vld [vmem:[#allocation5 + $0x600] sm:$0xf]  ;;  %v3739_v36 = vor.u32 %v4892_v25, %v3738_v23  ;;  %2394 = vmatpush.bf16.msra.mxu1 %v3483_v35 }
  0x4b   :  { %v4956_v27 = vld [vmem:[#allocation5 + $0x61c] sm:$0xf0]  ;;  %2382 = vmatmul.bf16.vlgmr.msra.gmra.mxu0 %v5318_v1 }
  0x4c   :  { %v4474_v28 = vld [vmem:[#allocation5 + $0x9c0] sm:$0xf]  ;;  %v3995_v39 = vor.u32 %v4956_v27, %v3994_v26  ;;  %2407 = vmatpush.bf16.msra.mxu2 %v3739_v36 }
  0x4d   :  { %v5076_v29 = vld [vmem:[#allocation5 + $0x9dc] sm:$0xf0]  ;;  %2395 = vmatmul.bf16.vlgmr.msra.gmra.mxu1 %v5320_v2 }
  0x4e   :  { %v4730_v30 = vld [vmem:[#allocation5 + $0xbc0] sm:$0xf]  ;;  %v4475_v40 = vor.u32 %v5076_v29, %v4474_v28  ;;  %2420 = vmatpush.bf16.msra.mxu3 %v3995_v39  ;;  %v3615_v28 = vor.u32 %v4856_v18, %v3612_v19  ;;  %v3231_v18 = vor.u32 %v4760_v3, %v3228_v6  ;;  %v5136_v19 = vld [vmem:[#allocation5 + $0xbc4] sm:$0xf] }
  0x4f   :  { %v5140_v32 = vld [vmem:[#allocation5 + $0xbdc] sm:$0xf0]  ;;  %2408 = vmatmul.bf16.vlgmr.msra.gmra.mxu2 %v5324_v20  ;;  %v4976_v6 = vld [vmem:[#allocation5 + $0x6c4] sm:$0xf] }
  0x50   :  { %v4731_v41 = vor.u32 %v5140_v32, %v4730_v30  ;;  %v4442_v43 = vld [vmem:[#allocation5 + $0x980] sm:$0xf]  ;;  %2426 = vmatpush.bf16.msrb.mxu0 %v4475_v40  ;;  %2452 = vmatpush.bf16.msrb.mxu2 %v3455_v42  ;;  %v4784_v30 = vld [vmem:[#allocation5 + $0xc4] sm:$0xf] }
  0x51   :  { %v5068_v44 = vld [vmem:[#allocation5 + $0x99c] sm:$0xf0]  ;;  %v4848_v32 = vld [vmem:[#allocation5 + $0x2c4] sm:$0xf]  ;;  %2421 = vmatmul.bf16.vlgmr.msra.gmra.mxu3 %v5326_v21  ;;  %v3327_v36 = vor.u32 %v4784_v30, %v3324_v31 }
  0x52   :  { %v4698_v45 = vld [vmem:[#allocation5 + $0xb80] sm:$0xf]  ;;  %v4443_v53 = vor.u32 %v5068_v44, %v4442_v43  ;;  %2439 = vmatpush.bf16.msrb.mxu1 %v4731_v41  ;;  %2465 = vmatpush.bf16.msrb.mxu3 %v3711_v46  ;;  %v3583_v40 = vor.u32 %v4848_v32, %v3580_v33  ;;  %v4776_v42 = vld [vmem:[#allocation5 + $0x84] sm:$0xf]  ;;  %v5330_v32 = vpack.c.b16 %v440_v16, %v440_v16 }
  0x53   :  { %v5132_v47 = vld [vmem:[#allocation5 + $0xb9c] sm:$0xf0]  ;;  %v3292_v43 = vld [vmem:[#allocation5 + $0xa0] sm:$0xf0] }
  0x54   :  { %v4699_v56 = vor.u32 %v5132_v47, %v4698_v45  ;;  %v4410_v58 = vld [vmem:[#allocation5 + $0x940] sm:$0xf]  ;;  %2427 = vmatpush.bf16.msrb.mxu0 %v4443_v53  ;;  %2453 = vmatpush.bf16.msrb.mxu2 %v3423_v57  ;;  %v4840_v44 = vld [vmem:[#allocation5 + $0x284] sm:$0xf]  ;;  %v3295_v48 = vor.u32 %v4776_v42, %v3292_v43 }
  0x55   :  { %v5060_v59 = vld [vmem:[#allocation5 + $0x95c] sm:$0xf0]  ;;  %v3548_v45 = vld [vmem:[#allocation5 + $0x2a0] sm:$0xf0] }
  0x56   :  { %v4666_v60 = vld [vmem:[#allocation5 + $0xb40] sm:$0xf]  ;;  %v4411_v5 = vor.u32 %v5060_v59, %v4410_v58  ;;  %2440 = vmatpush.bf16.msrb.mxu1 %v4699_v56  ;;  %2466 = vmatpush.bf16.msrb.mxu3 %v3679_v61  ;;  %v3551_v52 = vor.u32 %v4840_v44, %v3548_v45  ;;  %v4832_v56 = vld [vmem:[#allocation5 + $0x244] sm:$0xf] }
  0x57   :  { %v5124_v62 = vld [vmem:[#allocation5 + $0xb5c] sm:$0xf0]  ;;  %v3516_v57 = vld [vmem:[#allocation5 + $0x260] sm:$0xf0] }
  0x58   :  { %v4667_v7 = vor.u32 %v5124_v62, %v4666_v60  ;;  %v4378_v9 = vld [vmem:[#allocation5 + $0x900] sm:$0xf]  ;;  %2428 = vmatpush.bf16.msrb.mxu0 %v4411_v5  ;;  %2454 = vmatpush.bf16.msrb.mxu2 %v3391_v8  ;;  %v3519_v5 = vor.u32 %v4832_v56, %v3516_v57  ;;  %v3484_v8 = vld [vmem:[#allocation5 + $0x220] sm:$0xf0] }
  0x59   :  { %v5052_v10 = vld [vmem:[#allocation5 + $0x91c] sm:$0xf0]  ;;  %v5000_v30 = vld [vmem:[#allocation5 + $0x784] sm:$0xf] }
  0x5a   :  { %v4634_v11 = vld [vmem:[#allocation5 + $0xb00] sm:$0xf]  ;;  %v4379_v22 = vor.u32 %v5052_v10, %v4378_v9  ;;  %2441 = vmatpush.bf16.msrb.mxu1 %v4667_v7  ;;  %2467 = vmatpush.bf16.msrb.mxu3 %v3647_v14  ;;  %v4824_v7 = vld [vmem:[#allocation5 + $0x204] sm:$0xf] }
  0x5b   :  { %v5116_v15 = vld [vmem:[#allocation5 + $0xb1c] sm:$0xf0]  ;;  %v4944_v9 = vld [vmem:[#allocation5 + $0x5c4] sm:$0xf] }
  0x5c   :  { %v4635_v23 = vor.u32 %v5116_v15, %v4634_v11  ;;  %v4346_v25 = vld [vmem:[#allocation5 + $0x8c0] sm:$0xf]  ;;  %2429 = vmatpush.bf16.msrb.mxu0 %v4379_v22  ;;  %2455 = vmatpush.bf16.msrb.mxu2 %v3359_v24  ;;  %v3964_v10 = vld [vmem:[#allocation5 + $0x5e0] sm:$0xf0]  ;;  %v3487_v24 = vor.u32 %v4824_v7, %v3484_v8 }
  0x5d   :  { %v5044_v26 = vld [vmem:[#allocation5 + $0x8dc] sm:$0xf0]  ;;  %v5008_v11 = vld [vmem:[#allocation5 + $0x7c4] sm:$0xf] }
  0x5e   :  { %v4602_v27 = vld [vmem:[#allocation5 + $0xac0] sm:$0xf]  ;;  %v4347_v34 = vor.u32 %v5044_v26, %v4346_v25  ;;  %2442 = vmatpush.bf16.msrb.mxu1 %v4635_v23  ;;  %2468 = vmatpush.bf16.msrb.mxu3 %v3615_v28  ;;  %v5072_v14 = vld [vmem:[#allocation5 + $0x9c4] sm:$0xf]  ;;  %v441_v23 = vunpack.c.h.b16 %v48_v4  ;;  %v3967_v25 = vor.u32 %v4944_v9, %v3964_v10  ;;  %v4223_v26 = vor.u32 %v5008_v11, %v4220_v13 }
  0x5f   :  { %v5108_v29 = vld [vmem:[#allocation5 + $0xadc] sm:$0xf0]  ;;  %v4476_v15 = vld [vmem:[#allocation5 + $0x9e0] sm:$0xf0] }
  0x60   :  { %v4603_v35 = vor.u32 %v5108_v29, %v4602_v27  ;;  %v4314_v37 = vld [vmem:[#allocation5 + $0x880] sm:$0xf]  ;;  %2430 = vmatpush.bf16.msrb.mxu0 %v4347_v34  ;;  %2456 = vmatpush.bf16.msrb.mxu2 %v3327_v36  ;;  %v4732_v22 = vld [vmem:[#allocation5 + $0xbe0] sm:$0xf0]  ;;  %v4479_v27 = vor.u32 %v5072_v14, %v4476_v15  ;;  %v5332_v36 = vpack.c.b16 %v441_v23, %v441_v23 }
  0x61   :  { %v5036_v38 = vld [vmem:[#allocation5 + $0x89c] sm:$0xf0]  ;;  %v4936_v28 = vld [vmem:[#allocation5 + $0x584] sm:$0xf]  ;;  %v4735_v31 = vor.u32 %v5136_v19, %v4732_v22 }
  0x62   :  { %v4570_v39 = vld [vmem:[#allocation5 + $0xa80] sm:$0xf]  ;;  %v4315_v46 = vor.u32 %v5036_v38, %v4314_v37  ;;  %2443 = vmatpush.bf16.msrb.mxu1 %v4603_v35  ;;  %2469 = vmatpush.bf16.msrb.mxu3 %v3583_v40  ;;  %v3932_v29 = vld [vmem:[#allocation5 + $0x5a0] sm:$0xf0] }
  0x63   :  { %v5100_v41 = vld [vmem:[#allocation5 + $0xa9c] sm:$0xf0]  ;;  %v4188_v33 = vld [vmem:[#allocation5 + $0x7a0] sm:$0xf0] }
  0x64   :  { %v4571_v47 = vor.u32 %v5100_v41, %v4570_v39  ;;  %v4282_v49 = vld [vmem:[#allocation5 + $0x840] sm:$0xf]  ;;  %2431 = vmatpush.bf16.msrb.mxu0 %v4315_v46  ;;  %2457 = vmatpush.bf16.msrb.mxu2 %v3295_v48  ;;  %v5064_v34 = vld [vmem:[#allocation5 + $0x984] sm:$0xf]  ;;  %v3935_v39 = vor.u32 %v4936_v28, %v3932_v29  ;;  %v4191_v40 = vor.u32 %v5000_v30, %v4188_v33 }
  0x65   :  { %v5028_v50 = vld [vmem:[#allocation5 + $0x85c] sm:$0xf0]  ;;  %v4444_v35 = vld [vmem:[#allocation5 + $0x9a0] sm:$0xf0] }
  0x66   :  { %v4538_v51 = vld [vmem:[#allocation5 + $0xa40] sm:$0xf]  ;;  %v4283_v58 = vor.u32 %v5028_v50, %v4282_v49  ;;  %2444 = vmatpush.bf16.msrb.mxu1 %v4571_v47  ;;  %2470 = vmatpush.bf16.msrb.mxu3 %v3551_v52  ;;  %v5128_v37 = vld [vmem:[#allocation5 + $0xb84] sm:$0xf]  ;;  %v4447_v41 = vor.u32 %v5064_v34, %v4444_v35 }
  0x67   :  { %v5092_v53 = vld [vmem:[#allocation5 + $0xa5c] sm:$0xf0]  ;;  %v4700_v38 = vld [vmem:[#allocation5 + $0xba0] sm:$0xf0] }
  0x68   :  { %v4250_v59 = vld [vmem:[#allocation5 + $0x800] sm:$0xf]  ;;  %v4539_v62 = vor.u32 %v5092_v53, %v4538_v51  ;;  %2432 = vmatpush.bf16.msrb.mxu0 %v4283_v58  ;;  %2458 = vmatpush.bf16.msrb.mxu2 %v3263_v63  ;;  %v4928_v42 = vld [vmem:[#allocation5 + $0x544] sm:$0xf]  ;;  %v4703_v45 = vor.u32 %v5128_v37, %v4700_v38  ;;  %v3871_v63 = vor.u32 %v4920_v54, %v3868_v55  ;;  %v4821_v54 = vld [vmem:[#allocation5 + $0x1e4] sm:$0xf0] }
  0x69   :  { %v5020_v60 = vld [vmem:[#allocation5 + $0x81c] sm:$0xf0]  ;;  %v3900_v43 = vld [vmem:[#allocation5 + $0x560] sm:$0xf0]  ;;  %v3714_v55 = vld [vmem:[#allocation5 + $0x3c8] sm:$0xf] }
  0x6a   :  { %v4506_v61 = vld [vmem:[#allocation5 + $0xa00] sm:$0xf]  ;;  %v4251_v12 = vor.u32 %v5020_v60, %v4250_v59  ;;  %2445 = vmatpush.bf16.msrb.mxu1 %v4539_v62  ;;  %2471 = vmatpush.bf16.msrb.mxu3 %v3519_v5  ;;  %v4992_v44 = vld [vmem:[#allocation5 + $0x744] sm:$0xf]  ;;  %v3903_v51 = vor.u32 %v4928_v42, %v3900_v43 }
  0x6b   :  { %v5084_v0 = vld [vmem:[#allocation5 + $0xa1c] sm:$0xf0]  ;;  %v4156_v46 = vld [vmem:[#allocation5 + $0x760] sm:$0xf0] }
  0x6c   :  { %v4507_v17 = vor.u32 %v5084_v0, %v4506_v61  ;;  %2433 = vmatpush.bf16.msrb.mxu0 %v4251_v12  ;;  %2459 = vmatpush.bf16.msrb.mxu2 %v3231_v18  ;;  %v5056_v47 = vld [vmem:[#allocation5 + $0x944] sm:$0xf]  ;;  %v4159_v52 = vor.u32 %v4992_v44, %v4156_v46 }
  0x6d   :  { %v4412_v48 = vld [vmem:[#allocation5 + $0x960] sm:$0xf0] }
  0x6e   :  { %2446 = vmatpush.bf16.msrb.mxu1 %v4507_v17  ;;  %2472 = vmatpush.bf16.msrb.mxu3 %v3487_v24  ;;  %v5120_v49 = vld [vmem:[#allocation5 + $0xb44] sm:$0xf]  ;;  %v4415_v53 = vor.u32 %v5056_v47, %v4412_v48 }
  0x6f   :  { %2434 = vmatmul.bf16.vlgmr.msrb.gmra.mxu0 %v5330_v32  ;;  %v4668_v50 = vld [vmem:[#allocation5 + $0xb60] sm:$0xf0]  ;;  %2460 = vmatmul.bf16.vlgmr.msrb.gmra.mxu2 %v5318_v1 }
  0x70   :  { %2478 = vmatpush.bf16.msra.mxu0 %v3967_v25  ;;  %2504 = vmatpush.bf16.msra.mxu2 %v4479_v27  ;;  %v4984_v56 = vld [vmem:[#allocation5 + $0x704] sm:$0xf]  ;;  %v4671_v57 = vor.u32 %v5120_v49, %v4668_v50 }
  0x71   :  { %2447 = vmatmul.bf16.vlgmr.msrb.gmra.mxu1 %v5332_v36  ;;  %2473 = vmatmul.bf16.vlgmr.msrb.gmra.mxu3 %v5320_v2  ;;  %v4124_v58 = vld [vmem:[#allocation5 + $0x720] sm:$0xf0] }
  0x72   :  { %2491 = vmatpush.bf16.msra.mxu1 %v4223_v26  ;;  %2517 = vmatpush.bf16.msra.mxu3 %v4735_v31  ;;  %v5048_v59 = vld [vmem:[#allocation5 + $0x904] sm:$0xf]  ;;  %v4127_v0 = vor.u32 %v4984_v56, %v4124_v58  ;;  %v3970_v58 = vld [vmem:[#allocation5 + $0x5c8] sm:$0xf] }
  0x73   :  { %v4380_v60 = vld [vmem:[#allocation5 + $0x920] sm:$0xf0] }
  0x74   :  { %2479 = vmatpush.bf16.msra.mxu0 %v3935_v39  ;;  %2505 = vmatpush.bf16.msra.mxu2 %v4447_v41  ;;  %v5112_v61 = vld [vmem:[#allocation5 + $0xb04] sm:$0xf]  ;;  %v4383_v3 = vor.u32 %v5048_v59, %v4380_v60  ;;  %v4949_v59 = vld [vmem:[#allocation5 + $0x5e4] sm:$0xf0] }
  0x75   :  { %v4636_v62 = vld [vmem:[#allocation5 + $0xb20] sm:$0xf0] }
  0x76   :  { %2492 = vmatpush.bf16.msra.mxu1 %v4191_v40  ;;  %2518 = vmatpush.bf16.msra.mxu3 %v4703_v45  ;;  %v4912_v4 = vld [vmem:[#allocation5 + $0x4c4] sm:$0xf]  ;;  %v4639_v7 = vor.u32 %v5112_v61, %v4636_v62  ;;  %v4226_v62 = vld [vmem:[#allocation5 + $0x7c8] sm:$0xf] }
  0x77   :  { %v3836_v5 = vld [vmem:[#allocation5 + $0x4e0] sm:$0xf0] }
  0x78   :  { %2480 = vmatpush.bf16.msra.mxu0 %v3903_v51  ;;  %2506 = vmatpush.bf16.msra.mxu2 %v4415_v53  ;;  %v4092_v8 = vld [vmem:[#allocation5 + $0x6e0] sm:$0xf0]  ;;  %v3839_v13 = vor.u32 %v4912_v4, %v3836_v5  ;;  %v3458_v53 = vld [vmem:[#allocation5 + $0x1c8] sm:$0xf]  ;;  %v3971_v5 = vor.u32 %v4949_v59, %v3970_v58 }
  0x79   :  { %v5040_v9 = vld [vmem:[#allocation5 + $0x8c4] sm:$0xf]  ;;  %v4095_v14 = vor.u32 %v4976_v6, %v4092_v8  ;;  %v3426_v6 = vld [vmem:[#allocation5 + $0x188] sm:$0xf] }
  0x7a   :  { %2493 = vmatpush.bf16.msra.mxu1 %v4159_v52  ;;  %2519 = vmatpush.bf16.msra.mxu3 %v4671_v57  ;;  %v4348_v10 = vld [vmem:[#allocation5 + $0x8e0] sm:$0xf0]  ;;  %v4885_v57 = vld [vmem:[#allocation5 + $0x3e4] sm:$0xf0] }
  0x7b   :  { %v5104_v11 = vld [vmem:[#allocation5 + $0xac4] sm:$0xf]  ;;  %v4351_v15 = vor.u32 %v5040_v9, %v4348_v10  ;;  %v3715_v4 = vor.u32 %v4885_v57, %v3714_v55  ;;  %v3682_v8 = vld [vmem:[#allocation5 + $0x388] sm:$0xf] }
  0x7c   :  { %v4604_v12 = vld [vmem:[#allocation5 + $0xae0] sm:$0xf0]  ;;  %2481 = vmatpush.bf16.msra.mxu0 %v3871_v63  ;;  %2507 = vmatpush.bf16.msra.mxu2 %v4383_v3  ;;  %v5013_v63 = vld [vmem:[#allocation5 + $0x7e4] sm:$0xf0]  ;;  %v3459_v3 = vor.u32 %v4821_v54, %v3458_v53 }
  0x7d   :  { %v4904_v16 = vld [vmem:[#allocation5 + $0x484] sm:$0xf]  ;;  %v4607_v19 = vor.u32 %v5104_v11, %v4604_v12  ;;  %v4227_v9 = vor.u32 %v5013_v63, %v4226_v62  ;;  %v4877_v10 = vld [vmem:[#allocation5 + $0x3a4] sm:$0xf0] }
  0x7e   :  { %2494 = vmatpush.bf16.msra.mxu1 %v4127_v0  ;;  %v3804_v17 = vld [vmem:[#allocation5 + $0x4a0] sm:$0xf0]  ;;  %2520 = vmatpush.bf16.msra.mxu3 %v4639_v7  ;;  %v4813_v7 = vld [vmem:[#allocation5 + $0x1a4] sm:$0xf0] }
  0x7f   :  { %v4968_v18 = vld [vmem:[#allocation5 + $0x684] sm:$0xf]  ;;  %v3807_v27 = vor.u32 %v4904_v16, %v3804_v17  ;;  %v3938_v11 = vld [vmem:[#allocation5 + $0x588] sm:$0xf]  ;;  %v3683_v16 = vor.u32 %v4877_v10, %v3682_v8 }
  0x80   :  { %v4060_v22 = vld [vmem:[#allocation5 + $0x6a0] sm:$0xf0]  ;;  %2482 = vmatpush.bf16.msra.mxu0 %v3839_v13  ;;  %2508 = vmatpush.bf16.msra.mxu2 %v4351_v15  ;;  %v4941_v12 = vld [vmem:[#allocation5 + $0x5a4] sm:$0xf0]  ;;  %v3427_v15 = vor.u32 %v4813_v7, %v3426_v6 }
  0x81   :  { %v5032_v23 = vld [vmem:[#allocation5 + $0x884] sm:$0xf]  ;;  %v4063_v28 = vor.u32 %v4968_v18, %v4060_v22  ;;  %v4194_v13 = vld [vmem:[#allocation5 + $0x788] sm:$0xf]  ;;  %v3939_v17 = vor.u32 %v4941_v12, %v3938_v11 }
  0x82   :  { %v4316_v24 = vld [vmem:[#allocation5 + $0x8a0] sm:$0xf0]  ;;  %2495 = vmatpush.bf16.msra.mxu1 %v4095_v14  ;;  %2521 = vmatpush.bf16.msra.mxu3 %v4607_v19  ;;  %v5005_v14 = vld [vmem:[#allocation5 + $0x7a4] sm:$0xf0] }
  0x83   :  { %v5096_v25 = vld [vmem:[#allocation5 + $0xa84] sm:$0xf]  ;;  %v4319_v29 = vor.u32 %v5032_v23, %v4316_v24  ;;  %v3394_v18 = vld [vmem:[#allocation5 + $0x148] sm:$0xf]  ;;  %v4195_v23 = vor.u32 %v5005_v14, %v4194_v13 }
  0x84   :  { %v4572_v26 = vld [vmem:[#allocation5 + $0xaa0] sm:$0xf0]  ;;  %2483 = vmatpush.bf16.msra.mxu0 %v3807_v27  ;;  %v4805_v19 = vld [vmem:[#allocation5 + $0x164] sm:$0xf0] }
  0x85   :  { %v4896_v30 = vld [vmem:[#allocation5 + $0x444] sm:$0xf]  ;;  %v4575_v34 = vor.u32 %v5096_v25, %v4572_v26  ;;  %2509 = vmatpush.bf16.msra.mxu2 %v4319_v29  ;;  %v3650_v22 = vld [vmem:[#allocation5 + $0x348] sm:$0xf]  ;;  %v3395_v29 = vor.u32 %v4805_v19, %v3394_v18 }
  0x86   :  { %v3772_v31 = vld [vmem:[#allocation5 + $0x460] sm:$0xf0]  ;;  %2496 = vmatpush.bf16.msra.mxu1 %v4063_v28  ;;  %v4869_v24 = vld [vmem:[#allocation5 + $0x364] sm:$0xf0] }
  0x87   :  { %v4960_v33 = vld [vmem:[#allocation5 + $0x644] sm:$0xf]  ;;  %v3775_v41 = vor.u32 %v4896_v30, %v3772_v31  ;;  %2522 = vmatpush.bf16.msra.mxu3 %v4575_v34  ;;  %v3906_v25 = vld [vmem:[#allocation5 + $0x548] sm:$0xf]  ;;  %v3651_v30 = vor.u32 %v4869_v24, %v3650_v22 }
  0x88   :  { %v4028_v35 = vld [vmem:[#allocation5 + $0x660] sm:$0xf0]  ;;  %v4933_v26 = vld [vmem:[#allocation5 + $0x564] sm:$0xf0] }
  0x89   :  { %v5024_v37 = vld [vmem:[#allocation5 + $0x844] sm:$0xf]  ;;  %v4031_v44 = vor.u32 %v4960_v33, %v4028_v35  ;;  %2484 = vmatpush.bf16.msra.mxu0 %v3775_v41  ;;  %v4162_v27 = vld [vmem:[#allocation5 + $0x748] sm:$0xf]  ;;  %v3907_v31 = vor.u32 %v4933_v26, %v3906_v25 }
  0x8a   :  { %v4284_v38 = vld [vmem:[#allocation5 + $0x860] sm:$0xf0]  ;;  %v4997_v28 = vld [vmem:[#allocation5 + $0x764] sm:$0xf0] }
  0x8b   :  { %v5088_v39 = vld [vmem:[#allocation5 + $0xa44] sm:$0xf]  ;;  %v4287_v45 = vor.u32 %v5024_v37, %v4284_v38  ;;  %2497 = vmatpush.bf16.msra.mxu1 %v4031_v44  ;;  %v3362_v33 = vld [vmem:[#allocation5 + $0x108] sm:$0xf]  ;;  %v4163_v37 = vor.u32 %v4997_v28, %v4162_v27 }
  0x8c   :  { %v4540_v40 = vld [vmem:[#allocation5 + $0xa60] sm:$0xf0]  ;;  %v4797_v34 = vld [vmem:[#allocation5 + $0x124] sm:$0xf0] }
  0x8d   :  { %v4888_v42 = vld [vmem:[#allocation5 + $0x404] sm:$0xf]  ;;  %v4543_v49 = vor.u32 %v5088_v39, %v4540_v40  ;;  %2510 = vmatpush.bf16.msra.mxu2 %v4287_v45  ;;  %v3618_v35 = vld [vmem:[#allocation5 + $0x308] sm:$0xf] }
  0x8e   :  { %v3740_v43 = vld [vmem:[#allocation5 + $0x420] sm:$0xf0]  ;;  %v4861_v38 = vld [vmem:[#allocation5 + $0x324] sm:$0xf0] }
  0x8f   :  { %v4952_v46 = vld [vmem:[#allocation5 + $0x604] sm:$0xf]  ;;  %v3743_v56 = vor.u32 %v4888_v42, %v3740_v43  ;;  %2523 = vmatpush.bf16.msra.mxu3 %v4543_v49  ;;  %v3874_v39 = vld [vmem:[#allocation5 + $0x508] sm:$0xf]  ;;  %v3363_v43 = vor.u32 %v4797_v34, %v3362_v33  ;;  %v3619_v44 = vor.u32 %v4861_v38, %v3618_v35  ;;  %v4817_v38 = vld [vmem:[#allocation5 + $0x1cc] sm:$0xf] }
  0x90   :  { %v3996_v47 = vld [vmem:[#allocation5 + $0x620] sm:$0xf0]  ;;  %v4925_v40 = vld [vmem:[#allocation5 + $0x524] sm:$0xf0] }
  0x91   :  { %v5016_v48 = vld [vmem:[#allocation5 + $0x804] sm:$0xf]  ;;  %v3999_v60 = vor.u32 %v4952_v46, %v3996_v47  ;;  %2485 = vmatpush.bf16.msra.mxu0 %v3743_v56  ;;  %v4130_v41 = vld [vmem:[#allocation5 + $0x708] sm:$0xf]  ;;  %v3875_v45 = vor.u32 %v4925_v40, %v3874_v39  ;;  %v3460_v39 = vld [vmem:[#allocation5 + $0x1e8] sm:$0xf0] }
  0x92   :  { %v4252_v50 = vld [vmem:[#allocation5 + $0x820] sm:$0xf0]  ;;  %v4989_v42 = vld [vmem:[#allocation5 + $0x724] sm:$0xf0] }
  0x93   :  { %v5080_v51 = vld [vmem:[#allocation5 + $0xa04] sm:$0xf]  ;;  %v4255_v61 = vor.u32 %v5016_v48, %v4252_v50  ;;  %2498 = vmatpush.bf16.msra.mxu1 %v3999_v60  ;;  %v3330_v46 = vld [vmem:[#allocation5 + $0xc8] sm:$0xf]  ;;  %v4131_v49 = vor.u32 %v4989_v42, %v4130_v41  ;;  %v4881_v42 = vld [vmem:[#allocation5 + $0x3cc] sm:$0xf] }
  0x94   :  { %v4508_v52 = vld [vmem:[#allocation5 + $0xa20] sm:$0xf0]  ;;  %2486 = vmatmul.bf16.vlgmr.msra.gmra.mxu0 %v5324_v20  ;;  %v4789_v47 = vld [vmem:[#allocation5 + $0xe4] sm:$0xf0] }
  0x95   :  { %v4511_v0 = vor.u32 %v5080_v51, %v4508_v52  ;;  %2511 = vmatpush.bf16.msra.mxu2 %v4255_v61  ;;  %2530 = vmatpush.bf16.msrb.mxu0 %v3459_v3  ;;  %v3586_v48 = vld [vmem:[#allocation5 + $0x2c8] sm:$0xf]  ;;  %v3331_v55 = vor.u32 %v4789_v47, %v3330_v46  ;;  %v3463_v47 = vor.u32 %v4817_v38, %v3460_v39 }
  0x96   :  { %2499 = vmatmul.bf16.vlgmr.msra.gmra.mxu1 %v5326_v21  ;;  %v4853_v50 = vld [vmem:[#allocation5 + $0x2e4] sm:$0xf0] }
  0x97   :  { %2524 = vmatpush.bf16.msra.mxu3 %v4511_v0  ;;  %2543 = vmatpush.bf16.msrb.mxu1 %v3715_v4  ;;  %v3842_v51 = vld [vmem:[#allocation5 + $0x4c8] sm:$0xf]  ;;  %v3587_v56 = vor.u32 %v4853_v50, %v3586_v48 }
  0x98   :  { %2512 = vmatmul.bf16.vlgmr.msra.gmra.mxu2 %v5330_v32  ;;  %v4917_v52 = vld [vmem:[#allocation5 + $0x4e4] sm:$0xf0] }
  0x99   :  { %2556 = vmatpush.bf16.msrb.mxu2 %v3971_v5  ;;  %2531 = vmatpush.bf16.msrb.mxu0 %v3427_v15  ;;  %v4098_v53 = vld [vmem:[#allocation5 + $0x6c8] sm:$0xf]  ;;  %v3843_v57 = vor.u32 %v4917_v52, %v3842_v51 }
  0x9a   :  { %2525 = vmatmul.bf16.vlgmr.msra.gmra.mxu3 %v5332_v36  ;;  %v4981_v54 = vld [vmem:[#allocation5 + $0x6e4] sm:$0xf0] }
  0x9b   :  { %2569 = vmatpush.bf16.msrb.mxu3 %v4227_v9  ;;  %2544 = vmatpush.bf16.msrb.mxu1 %v3683_v16  ;;  %v3298_v58 = vld [vmem:[#allocation5 + $0x88] sm:$0xf]  ;;  %v4099_v61 = vor.u32 %v4981_v54, %v4098_v53  ;;  %v4809_v53 = vld [vmem:[#allocation5 + $0x18c] sm:$0xf] }
  0x9c   :  { %v4781_v59 = vld [vmem:[#allocation5 + $0xa4] sm:$0xf0]  ;;  %v3428_v54 = vld [vmem:[#allocation5 + $0x1a8] sm:$0xf0] }
  0x9d   :  { %2557 = vmatpush.bf16.msrb.mxu2 %v3939_v17  ;;  %2532 = vmatpush.bf16.msrb.mxu0 %v3395_v29  ;;  %v3554_v60 = vld [vmem:[#allocation5 + $0x288] sm:$0xf]  ;;  %v3299_v5 = vor.u32 %v4781_v59, %v3298_v58  ;;  %v3431_v59 = vor.u32 %v4809_v53, %v3428_v54 }
  0x9e   :  { %v4845_v62 = vld [vmem:[#allocation5 + $0x2a4] sm:$0xf0] }
  0x9f   :  { %2570 = vmatpush.bf16.msrb.mxu3 %v4195_v23  ;;  %2545 = vmatpush.bf16.msrb.mxu1 %v3651_v30  ;;  %v3810_v63 = vld [vmem:[#allocation5 + $0x488] sm:$0xf]  ;;  %v3555_v6 = vor.u32 %v4845_v62, %v3554_v60 }
  0xa0   :  { %v4909_v0 = vld [vmem:[#allocation5 + $0x4a4] sm:$0xf0] }
  0xa1   :  { %2558 = vmatpush.bf16.msrb.mxu2 %v3907_v31  ;;  %2533 = vmatpush.bf16.msrb.mxu0 %v3363_v43  ;;  %v4066_v3 = vld [vmem:[#allocation5 + $0x688] sm:$0xf]  ;;  %v3811_v7 = vor.u32 %v4909_v0, %v3810_v63  ;;  %v3716_v43 = vld [vmem:[#allocation5 + $0x3e8] sm:$0xf0] }
  0xa2   :  { %v4973_v4 = vld [vmem:[#allocation5 + $0x6a4] sm:$0xf0]  ;;  %v3719_v51 = vor.u32 %v4881_v42, %v3716_v43  ;;  %v4777_v43 = vld [vmem:[#allocation5 + $0x8c] sm:$0xf] }
  0xa3   :  { %2571 = vmatpush.bf16.msrb.mxu3 %v4163_v37  ;;  %2546 = vmatpush.bf16.msrb.mxu1 %v3619_v44  ;;  %v3266_v8 = vld [vmem:[#allocation5 + $0x48] sm:$0xf]  ;;  %v4067_v11 = vor.u32 %v4973_v4, %v4066_v3  ;;  %v4801_v3 = vld [vmem:[#allocation5 + $0x14c] sm:$0xf] }
  0xa4   :  { %v4773_v9 = vld [vmem:[#allocation5 + $0x64] sm:$0xf0]  ;;  %v3396_v4 = vld [vmem:[#allocation5 + $0x168] sm:$0xf0] }
  0xa5   :  { %2559 = vmatpush.bf16.msrb.mxu2 %v3875_v45  ;;  %2534 = vmatpush.bf16.msrb.mxu0 %v3331_v55  ;;  %v3522_v10 = vld [vmem:[#allocation5 + $0x248] sm:$0xf]  ;;  %v3267_v17 = vor.u32 %v4773_v9, %v3266_v8  ;;  %v4873_v55 = vld [vmem:[#allocation5 + $0x38c] sm:$0xf]  ;;  %v3399_v9 = vor.u32 %v4801_v3, %v3396_v4 }
  0xa6   :  { %v4837_v12 = vld [vmem:[#allocation5 + $0x264] sm:$0xf0]  ;;  %v4761_v4 = vld [vmem:[#allocation5 + $0xc] sm:$0xf] }
  0xa7   :  { %2572 = vmatpush.bf16.msrb.mxu3 %v4131_v49  ;;  %2547 = vmatpush.bf16.msrb.mxu1 %v3587_v56  ;;  %v3778_v13 = vld [vmem:[#allocation5 + $0x448] sm:$0xf]  ;;  %v3523_v22 = vor.u32 %v4837_v12, %v3522_v10  ;;  %v3684_v56 = vld [vmem:[#allocation5 + $0x3a8] sm:$0xf0] }
  0xa8   :  { %v4901_v14 = vld [vmem:[#allocation5 + $0x464] sm:$0xf0]  ;;  %v3687_v63 = vor.u32 %v4873_v55, %v3684_v56  ;;  %v4769_v55 = vld [vmem:[#allocation5 + $0x4c] sm:$0xf] }
  0xa9   :  { %2560 = vmatpush.bf16.msrb.mxu2 %v3843_v57  ;;  %v4034_v15 = vld [vmem:[#allocation5 + $0x648] sm:$0xf]  ;;  %2535 = vmatpush.bf16.msrb.mxu0 %v3299_v5  ;;  %v3779_v23 = vor.u32 %v4901_v14, %v3778_v13  ;;  %v4865_v5 = vld [vmem:[#allocation5 + $0x34c] sm:$0xf] }
  0xaa   :  { %v4965_v16 = vld [vmem:[#allocation5 + $0x664] sm:$0xf0]  ;;  %v3268_v56 = vld [vmem:[#allocation5 + $0x68] sm:$0xf0] }
  0xab   :  { %2573 = vmatpush.bf16.msrb.mxu3 %v4099_v61  ;;  %v3234_v18 = vld [vmem:[#allocation5 + $0x8] sm:$0xf]  ;;  %2548 = vmatpush.bf16.msrb.mxu1 %v3555_v6  ;;  %v4035_v27 = vor.u32 %v4965_v16, %v4034_v15  ;;  %v3652_v6 = vld [vmem:[#allocation5 + $0x368] sm:$0xf0] }
  0xac   :  { %v4765_v19 = vld [vmem:[#allocation5 + $0x24] sm:$0xf0]  ;;  %v3655_v13 = vor.u32 %v4865_v5, %v3652_v6  ;;  %v4793_v15 = vld [vmem:[#allocation5 + $0x10c] sm:$0xf] }
  0xad   :  { %2561 = vmatpush.bf16.msrb.mxu2 %v3811_v7  ;;  %v3490_v24 = vld [vmem:[#allocation5 + $0x208] sm:$0xf]  ;;  %2536 = vmatpush.bf16.msrb.mxu0 %v3267_v17  ;;  %v3235_v35 = vor.u32 %v4765_v19, %v3234_v18  ;;  %v3364_v16 = vld [vmem:[#allocation5 + $0x128] sm:$0xf0] }
  0xae   :  { %v4829_v25 = vld [vmem:[#allocation5 + $0x224] sm:$0xf0]  ;;  %v4857_v17 = vld [vmem:[#allocation5 + $0x30c] sm:$0xf] }
  0xaf   :  { %v3746_v26 = vld [vmem:[#allocation5 + $0x408] sm:$0xf]  ;;  %2574 = vmatpush.bf16.msrb.mxu3 %v4067_v11  ;;  %2549 = vmatpush.bf16.msrb.mxu1 %v3523_v22  ;;  %v3491_v40 = vor.u32 %v4829_v25, %v3490_v24  ;;  %v3620_v18 = vld [vmem:[#allocation5 + $0x328] sm:$0xf0] }
  0xb0   :  { %v4893_v28 = vld [vmem:[#allocation5 + $0x424] sm:$0xf0]  ;;  %v3236_v6 = vld [vmem:[#allocation5 + $0x28] sm:$0xf0] }
  0xb1   :  { %v4002_v29 = vld [vmem:[#allocation5 + $0x608] sm:$0xf]  ;;  %2562 = vmatpush.bf16.msrb.mxu2 %v3779_v23  ;;  %v3747_v41 = vor.u32 %v4893_v28, %v3746_v26  ;;  %2537 = vmatpush.bf16.msrb.mxu0 %v3235_v35  ;;  %v3367_v23 = vor.u32 %v4793_v15, %v3364_v16  ;;  %v4484_v15 = vld [vmem:[#allocation5 + $0x9e8] sm:$0xf0] }
  0xb2   :  { %v4957_v30 = vld [vmem:[#allocation5 + $0x624] sm:$0xf0] }
  0xb3   :  { %v4482_v31 = vld [vmem:[#allocation5 + $0x9c8] sm:$0xf]  ;;  %2575 = vmatpush.bf16.msrb.mxu3 %v4035_v27  ;;  %v4003_v44 = vor.u32 %v4957_v30, %v4002_v29  ;;  %2550 = vmatpush.bf16.msrb.mxu1 %v3491_v40  ;;  %v3623_v27 = vor.u32 %v4857_v17, %v3620_v18  ;;  %v4785_v29 = vld [vmem:[#allocation5 + $0xcc] sm:$0xf]  ;;  %v3239_v17 = vor.u32 %v4761_v4, %v3236_v6 }
  0xb4   :  { %v5077_v33 = vld [vmem:[#allocation5 + $0x9e4] sm:$0xf0]  ;;  %2538 = vmatmul.bf16.vlgmr.msrb.gmra.mxu0 %v5318_v1  ;;  %v3332_v30 = vld [vmem:[#allocation5 + $0xe8] sm:$0xf0] }
  0xb5   :  { %v4738_v34 = vld [vmem:[#allocation5 + $0xbc8] sm:$0xf]  ;;  %v4483_v45 = vor.u32 %v5077_v33, %v4482_v31  ;;  %2563 = vmatpush.bf16.msrb.mxu2 %v3747_v41  ;;  %v4849_v31 = vld [vmem:[#allocation5 + $0x2cc] sm:$0xf] }
  0xb6   :  { %v5141_v37 = vld [vmem:[#allocation5 + $0xbe4] sm:$0xf0]  ;;  %2551 = vmatmul.bf16.vlgmr.msrb.gmra.mxu1 %v5320_v2  ;;  %v3588_v33 = vld [vmem:[#allocation5 + $0x2e8] sm:$0xf0] }
  0xb7   :  { %v4739_v46 = vor.u32 %v5141_v37, %v4738_v34  ;;  %v4450_v48 = vld [vmem:[#allocation5 + $0x988] sm:$0xf]  ;;  %2576 = vmatpush.bf16.msrb.mxu3 %v4003_v44  ;;  %2582 = vmatpush.bf16.msra.mxu0 %v4483_v45  ;;  %v3335_v37 = vor.u32 %v4785_v29, %v3332_v30  ;;  %v3591_v41 = vor.u32 %v4849_v31, %v3588_v33  ;;  %v3300_v44 = vld [vmem:[#allocation5 + $0xa8] sm:$0xf0] }
  0xb8   :  { %v5069_v49 = vld [vmem:[#allocation5 + $0x9a4] sm:$0xf0]  ;;  %2564 = vmatmul.bf16.vlgmr.msrb.gmra.mxu2 %v5324_v20  ;;  %v4841_v45 = vld [vmem:[#allocation5 + $0x28c] sm:$0xf] }
  0xb9   :  { %v4706_v50 = vld [vmem:[#allocation5 + $0xb88] sm:$0xf]  ;;  %v4451_v57 = vor.u32 %v5069_v49, %v4450_v48  ;;  %2595 = vmatpush.bf16.msra.mxu1 %v4739_v46  ;;  %2608 = vmatpush.bf16.msra.mxu2 %v3463_v47  ;;  %v3556_v46 = vld [vmem:[#allocation5 + $0x2a8] sm:$0xf0]  ;;  %v3303_v49 = vor.u32 %v4777_v43, %v3300_v44 }
  0xba   :  { %v5133_v52 = vld [vmem:[#allocation5 + $0xba4] sm:$0xf0]  ;;  %2577 = vmatmul.bf16.vlgmr.msrb.gmra.mxu3 %v5326_v21  ;;  %v3559_v53 = vor.u32 %v4841_v45, %v3556_v46  ;;  %v5137_v18 = vld [vmem:[#allocation5 + $0xbcc] sm:$0xf] }
  0xbb   :  { %v4707_v58 = vor.u32 %v5133_v52, %v4706_v50  ;;  %v4418_v60 = vld [vmem:[#allocation5 + $0x948] sm:$0xf]  ;;  %2621 = vmatpush.bf16.msra.mxu3 %v3719_v51  ;;  %2583 = vmatpush.bf16.msra.mxu0 %v4451_v57  ;;  %v4833_v57 = vld [vmem:[#allocation5 + $0x24c] sm:$0xf] }
  0xbc   :  { %v5061_v61 = vld [vmem:[#allocation5 + $0x964] sm:$0xf0]  ;;  %v4196_v30 = vld [vmem:[#allocation5 + $0x7a8] sm:$0xf0] }
  0xbd   :  { %v4674_v62 = vld [vmem:[#allocation5 + $0xb48] sm:$0xf]  ;;  %v4419_v7 = vor.u32 %v5061_v61, %v4418_v60  ;;  %2596 = vmatpush.bf16.msra.mxu1 %v4707_v58  ;;  %2609 = vmatpush.bf16.msra.mxu2 %v3431_v59  ;;  %v3524_v58 = vld [vmem:[#allocation5 + $0x268] sm:$0xf0] }
  0xbe   :  { %v5125_v0 = vld [vmem:[#allocation5 + $0xb64] sm:$0xf0]  ;;  %v3527_v5 = vor.u32 %v4833_v57, %v3524_v58  ;;  %v5065_v31 = vld [vmem:[#allocation5 + $0x98c] sm:$0xf] }
  0xbf   :  { %v4675_v8 = vor.u32 %v5125_v0, %v4674_v62  ;;  %v4386_v10 = vld [vmem:[#allocation5 + $0x908] sm:$0xf]  ;;  %2622 = vmatpush.bf16.msra.mxu3 %v3687_v63  ;;  %2584 = vmatpush.bf16.msra.mxu0 %v4419_v7  ;;  %v3271_v63 = vor.u32 %v4769_v55, %v3268_v56  ;;  %v4825_v7 = vld [vmem:[#allocation5 + $0x20c] sm:$0xf] }
  0xc0   :  { %v5053_v11 = vld [vmem:[#allocation5 + $0x924] sm:$0xf0]  ;;  %v4452_v33 = vld [vmem:[#allocation5 + $0x9a8] sm:$0xf0] }
  0xc1   :  { %v4642_v12 = vld [vmem:[#allocation5 + $0xb08] sm:$0xf]  ;;  %v4387_v19 = vor.u32 %v5053_v11, %v4386_v10  ;;  %2597 = vmatpush.bf16.msra.mxu1 %v4675_v8  ;;  %2610 = vmatpush.bf16.msra.mxu2 %v3399_v9  ;;  %v3492_v8 = vld [vmem:[#allocation5 + $0x228] sm:$0xf0] }
  0xc2   :  { %v5117_v14 = vld [vmem:[#allocation5 + $0xb24] sm:$0xf0]  ;;  %v4945_v9 = vld [vmem:[#allocation5 + $0x5cc] sm:$0xf] }
  0xc3   :  { %v4643_v22 = vor.u32 %v5117_v14, %v4642_v12  ;;  %v4354_v24 = vld [vmem:[#allocation5 + $0x8c8] sm:$0xf]  ;;  %2623 = vmatpush.bf16.msra.mxu3 %v3655_v13  ;;  %2585 = vmatpush.bf16.msra.mxu0 %v4387_v19  ;;  %v3972_v10 = vld [vmem:[#allocation5 + $0x5e8] sm:$0xf0] }
  0xc4   :  { %v5045_v25 = vld [vmem:[#allocation5 + $0x8e4] sm:$0xf0]  ;;  %v5009_v11 = vld [vmem:[#allocation5 + $0x7cc] sm:$0xf] }
  0xc5   :  { %v4610_v26 = vld [vmem:[#allocation5 + $0xac8] sm:$0xf]  ;;  %v4355_v34 = vor.u32 %v5045_v25, %v4354_v24  ;;  %2598 = vmatpush.bf16.msra.mxu1 %v4643_v22  ;;  %2611 = vmatpush.bf16.msra.mxu2 %v3367_v23  ;;  %v4228_v13 = vld [vmem:[#allocation5 + $0x7e8] sm:$0xf0]  ;;  %v3495_v22 = vor.u32 %v4825_v7, %v3492_v8  ;;  %v3975_v23 = vor.u32 %v4945_v9, %v3972_v10 }
  0xc6   :  { %v5109_v28 = vld [vmem:[#allocation5 + $0xae4] sm:$0xf0]  ;;  %v5073_v14 = vld [vmem:[#allocation5 + $0x9cc] sm:$0xf]  ;;  %v4231_v24 = vor.u32 %v5009_v11, %v4228_v13 }
  0xc7   :  { %v4611_v35 = vor.u32 %v5109_v28, %v4610_v26  ;;  %v4322_v38 = vld [vmem:[#allocation5 + $0x888] sm:$0xf]  ;;  %2624 = vmatpush.bf16.msra.mxu3 %v3623_v27  ;;  %2586 = vmatpush.bf16.msra.mxu0 %v4355_v34  ;;  %v4740_v19 = vld [vmem:[#allocation5 + $0xbe8] sm:$0xf0]  ;;  %v4487_v25 = vor.u32 %v5073_v14, %v4484_v15 }
  0xc8   :  { %v5037_v39 = vld [vmem:[#allocation5 + $0x8a4] sm:$0xf0]  ;;  %v4937_v26 = vld [vmem:[#allocation5 + $0x58c] sm:$0xf]  ;;  %v4743_v29 = vor.u32 %v5137_v18, %v4740_v19 }
  0xc9   :  { %v4578_v40 = vld [vmem:[#allocation5 + $0xa88] sm:$0xf]  ;;  %v4323_v47 = vor.u32 %v5037_v39, %v4322_v38  ;;  %2599 = vmatpush.bf16.msra.mxu1 %v4611_v35  ;;  %2612 = vmatpush.bf16.msra.mxu2 %v3335_v37  ;;  %v3940_v27 = vld [vmem:[#allocation5 + $0x5a8] sm:$0xf0]  ;;  %v4455_v39 = vor.u32 %v5065_v31, %v4452_v33 }
  0xca   :  { %v5101_v42 = vld [vmem:[#allocation5 + $0xaa4] sm:$0xf0]  ;;  %v5001_v28 = vld [vmem:[#allocation5 + $0x78c] sm:$0xf]  ;;  %v3943_v37 = vor.u32 %v4937_v26, %v3940_v27 }
  0xcb   :  { %v4579_v48 = vor.u32 %v5101_v42, %v4578_v40  ;;  %v4290_v50 = vld [vmem:[#allocation5 + $0x848] sm:$0xf]  ;;  %2625 = vmatpush.bf16.msra.mxu3 %v3591_v41  ;;  %2587 = vmatpush.bf16.msra.mxu0 %v4323_v47  ;;  %v5129_v34 = vld [vmem:[#allocation5 + $0xb8c] sm:$0xf]  ;;  %v4199_v38 = vor.u32 %v5001_v28, %v4196_v30 }
  0xcc   :  { %v5029_v51 = vld [vmem:[#allocation5 + $0x864] sm:$0xf0]  ;;  %v4708_v35 = vld [vmem:[#allocation5 + $0xba8] sm:$0xf0] }
  0xcd   :  { %v4546_v52 = vld [vmem:[#allocation5 + $0xa48] sm:$0xf]  ;;  %v4291_v59 = vor.u32 %v5029_v51, %v4290_v50  ;;  %2600 = vmatpush.bf16.msra.mxu1 %v4579_v48  ;;  %2613 = vmatpush.bf16.msra.mxu2 %v3303_v49  ;;  %v4929_v40 = vld [vmem:[#allocation5 + $0x54c] sm:$0xf]  ;;  %v4711_v43 = vor.u32 %v5129_v34, %v4708_v35 }
  0xce   :  { %v5093_v54 = vld [vmem:[#allocation5 + $0xa64] sm:$0xf0]  ;;  %v3908_v41 = vld [vmem:[#allocation5 + $0x568] sm:$0xf0] }
  0xcf   :  { %v4258_v60 = vld [vmem:[#allocation5 + $0x808] sm:$0xf]  ;;  %v4547_v62 = vor.u32 %v5093_v54, %v4546_v52  ;;  %2626 = vmatpush.bf16.msra.mxu3 %v3559_v53  ;;  %2588 = vmatpush.bf16.msra.mxu0 %v4291_v59  ;;  %v4993_v42 = vld [vmem:[#allocation5 + $0x74c] sm:$0xf]  ;;  %v3911_v49 = vor.u32 %v4929_v40, %v3908_v41 }
  0xd0   :  { %v5021_v61 = vld [vmem:[#allocation5 + $0x824] sm:$0xf0]  ;;  %v4164_v44 = vld [vmem:[#allocation5 + $0x768] sm:$0xf0] }
  0xd1   :  { %v4514_v0 = vld [vmem:[#allocation5 + $0xa08] sm:$0xf]  ;;  %v4259_v12 = vor.u32 %v5021_v61, %v4258_v60  ;;  %2601 = vmatpush.bf16.msra.mxu1 %v4547_v62  ;;  %2614 = vmatpush.bf16.msra.mxu2 %v3271_v63  ;;  %v5057_v45 = vld [vmem:[#allocation5 + $0x94c] sm:$0xf]  ;;  %v4167_v50 = vor.u32 %v4993_v42, %v4164_v44 }
  0xd2   :  { %v5085_v3 = vld [vmem:[#allocation5 + $0xa24] sm:$0xf0]  ;;  %v4420_v46 = vld [vmem:[#allocation5 + $0x968] sm:$0xf0] }
  0xd3   :  { %v4515_v16 = vor.u32 %v5085_v3, %v4514_v0  ;;  %2627 = vmatpush.bf16.msra.mxu3 %v3527_v5  ;;  %2589 = vmatpush.bf16.msra.mxu0 %v4259_v12  ;;  %v5121_v47 = vld [vmem:[#allocation5 + $0xb4c] sm:$0xf]  ;;  %v4423_v51 = vor.u32 %v5057_v45, %v4420_v46  ;;  %v5350_v5 = vpop.f32.mrf.mxu1  ;;  %v5352_v12 = vpop.f32.mrf.mxu0 }
  0xd4   :  { %v4676_v48 = vld [vmem:[#allocation5 + $0xb68] sm:$0xf0] }
  0xd5   :  { %2602 = vmatpush.bf16.msra.mxu1 %v4515_v16  ;;  %2615 = vmatpush.bf16.msra.mxu2 %v3239_v17  ;;  %v4921_v52 = vld [vmem:[#allocation5 + $0x50c] sm:$0xf]  ;;  %v4679_v55 = vor.u32 %v5121_v47, %v4676_v48 }
  0xd6   :  { %2590 = vmatmul.bf16.vlgmr.msra.gmra.mxu0 %v5330_v32  ;;  %v3876_v53 = vld [vmem:[#allocation5 + $0x528] sm:$0xf0] }
  0xd7   :  { %2628 = vmatpush.bf16.msra.mxu3 %v3495_v22  ;;  %2634 = vmatpush.bf16.msrb.mxu0 %v3975_v23  ;;  %v4985_v54 = vld [vmem:[#allocation5 + $0x70c] sm:$0xf]  ;;  %v3879_v61 = vor.u32 %v4921_v52, %v3876_v53 }
  0xd8   :  { %2603 = vmatmul.bf16.vlgmr.msra.gmra.mxu1 %v5332_v36  ;;  %2616 = vmatmul.bf16.vlgmr.msra.gmra.mxu2 %v5318_v1  ;;  %v4132_v56 = vld [vmem:[#allocation5 + $0x728] sm:$0xf0] }
  0xd9   :  { %2647 = vmatpush.bf16.msrb.mxu1 %v4231_v24  ;;  %2660 = vmatpush.bf16.msrb.mxu2 %v4487_v25  ;;  %v5049_v57 = vld [vmem:[#allocation5 + $0x90c] sm:$0xf]  ;;  %v4135_v62 = vor.u32 %v4985_v54, %v4132_v56  ;;  %v2422_v56 = vpop.f32.mrf.mxu3 }
  0xda   :  { %2629 = vmatmul.bf16.vlgmr.msra.gmra.mxu3 %v5320_v2  ;;  %v4388_v58 = vld [vmem:[#allocation5 + $0x928] sm:$0xf0] }
  0xdb   :  { %2673 = vmatpush.bf16.msrb.mxu3 %v4743_v29  ;;  %2635 = vmatpush.bf16.msrb.mxu0 %v3943_v37  ;;  %v5113_v59 = vld [vmem:[#allocation5 + $0xb0c] sm:$0xf]  ;;  %v4391_v63 = vor.u32 %v5049_v57, %v4388_v58  ;;  %v2398_v34 = vpop.f32.mrf.mxu1  ;;  %v2385_v42 = vpop.f32.mrf.mxu0  ;;  %v3466_v57 = vld [vmem:[#allocation5 + $0x1d0] sm:$0xf] }
  0xdc   :  { %v4644_v60 = vld [vmem:[#allocation5 + $0xb28] sm:$0xf0]  ;;  %v4822_v58 = vld [vmem:[#allocation5 + $0x1ec] sm:$0xf0] }
  0xdd   :  { %2648 = vmatpush.bf16.msrb.mxu1 %v4199_v38  ;;  %2661 = vmatpush.bf16.msrb.mxu2 %v4455_v39  ;;  %v4913_v0 = vld [vmem:[#allocation5 + $0x4cc] sm:$0xf]  ;;  %v4647_v6 = vor.u32 %v5113_v59, %v4644_v60  ;;  %v3722_v59 = vld [vmem:[#allocation5 + $0x3d0] sm:$0xf] }
  0xde   :  { %v3844_v3 = vld [vmem:[#allocation5 + $0x4e8] sm:$0xf0]  ;;  %v3914_v34 = vld [vmem:[#allocation5 + $0x550] sm:$0xf] }
  0xdf   :  { %2674 = vmatpush.bf16.msrb.mxu3 %v4711_v43  ;;  %2636 = vmatpush.bf16.msrb.mxu0 %v3911_v49  ;;  %v4977_v4 = vld [vmem:[#allocation5 + $0x6cc] sm:$0xf]  ;;  %v3847_v13 = vor.u32 %v4913_v0, %v3844_v3 }
  0xe0   :  { %v4100_v7 = vld [vmem:[#allocation5 + $0x6e8] sm:$0xf0] }
  0xe1   :  { %2649 = vmatpush.bf16.msrb.mxu1 %v4167_v50  ;;  %2662 = vmatpush.bf16.msrb.mxu2 %v4423_v51  ;;  %v5041_v8 = vld [vmem:[#allocation5 + $0x8cc] sm:$0xf]  ;;  %v4103_v14 = vor.u32 %v4977_v4, %v4100_v7  ;;  %v2409_v51 = vpop.f32.mrf.mxu2  ;;  %v4234_v4 = vld [vmem:[#allocation5 + $0x7d0] sm:$0xf]  ;;  %v2397_v7 = vadd.f32 %v5350_v5, %v5352_v12 }
  0xe2   :  { %v4356_v9 = vld [vmem:[#allocation5 + $0x8e8] sm:$0xf0] }
  0xe3   :  { %2675 = vmatpush.bf16.msrb.mxu3 %v4679_v55  ;;  %v5105_v10 = vld [vmem:[#allocation5 + $0xacc] sm:$0xf]  ;;  %2637 = vmatpush.bf16.msrb.mxu0 %v3879_v61  ;;  %v4359_v15 = vor.u32 %v5041_v8, %v4356_v9  ;;  %v4886_v61 = vld [vmem:[#allocation5 + $0x3ec] sm:$0xf0]  ;;  %v3467_v9 = vor.u32 %v4822_v58, %v3466_v57  ;;  %v2410_v12 = vadd.f32 %v2409_v51, %v2397_v7 }
  0xe4   :  { %v4612_v11 = vld [vmem:[#allocation5 + $0xae8] sm:$0xf0]  ;;  %v4138_v51 = vld [vmem:[#allocation5 + $0x710] sm:$0xf] }
  0xe5   :  { %2650 = vmatpush.bf16.msrb.mxu1 %v4135_v62  ;;  %2663 = vmatpush.bf16.msrb.mxu2 %v4391_v63  ;;  %v4905_v16 = vld [vmem:[#allocation5 + $0x48c] sm:$0xf]  ;;  %v4615_v19 = vor.u32 %v5105_v10, %v4612_v11  ;;  %v3978_v62 = vld [vmem:[#allocation5 + $0x5d0] sm:$0xf]  ;;  %v3723_v10 = vor.u32 %v4886_v61, %v3722_v59 }
  0xe6   :  { %v3812_v17 = vld [vmem:[#allocation5 + $0x4a8] sm:$0xf0]  ;;  %v4950_v63 = vld [vmem:[#allocation5 + $0x5ec] sm:$0xf0] }
  0xe7   :  { %v4969_v18 = vld [vmem:[#allocation5 + $0x68c] sm:$0xf]  ;;  %2676 = vmatpush.bf16.msrb.mxu3 %v4647_v6  ;;  %2638 = vmatpush.bf16.msrb.mxu0 %v3847_v13  ;;  %v3815_v27 = vor.u32 %v4905_v16, %v3812_v17  ;;  %v5014_v6 = vld [vmem:[#allocation5 + $0x7ec] sm:$0xf0]  ;;  %v3979_v11 = vor.u32 %v4950_v63, %v3978_v62 }
  0xe8   :  { %v4068_v22 = vld [vmem:[#allocation5 + $0x6a8] sm:$0xf0]  ;;  %v3434_v13 = vld [vmem:[#allocation5 + $0x190] sm:$0xf]  ;;  %v4235_v16 = vor.u32 %v5014_v6, %v4234_v4 }
  0xe9   :  { %v5033_v23 = vld [vmem:[#allocation5 + $0x88c] sm:$0xf]  ;;  %2651 = vmatpush.bf16.msrb.mxu1 %v4103_v14  ;;  %2664 = vmatpush.bf16.msrb.mxu2 %v4359_v15  ;;  %v4071_v28 = vor.u32 %v4969_v18, %v4068_v22  ;;  %v4814_v14 = vld [vmem:[#allocation5 + $0x1ac] sm:$0xf0] }
  0xea   :  { %v4324_v24 = vld [vmem:[#allocation5 + $0x8a8] sm:$0xf0]  ;;  %v3690_v15 = vld [vmem:[#allocation5 + $0x390] sm:$0xf]  ;;  %v3435_v5 = vor.u32 %v4814_v14, %v3434_v13 }
  0xeb   :  { %v5097_v25 = vld [vmem:[#allocation5 + $0xa8c] sm:$0xf]  ;;  %v4327_v29 = vor.u32 %v5033_v23, %v4324_v24  ;;  %2677 = vmatpush.bf16.msrb.mxu3 %v4615_v19  ;;  %2639 = vmatpush.bf16.msrb.mxu0 %v3815_v27  ;;  %v4878_v17 = vld [vmem:[#allocation5 + $0x3ac] sm:$0xf0]  ;;  %v2411_v24 = vpop.f32.mrf.mxu2 }
  0xec   :  { %v4580_v26 = vld [vmem:[#allocation5 + $0xaa8] sm:$0xf0]  ;;  %v3946_v18 = vld [vmem:[#allocation5 + $0x590] sm:$0xf] }
  0xed   :  { %v4897_v30 = vld [vmem:[#allocation5 + $0x44c] sm:$0xf]  ;;  %v4583_v35 = vor.u32 %v5097_v25, %v4580_v26  ;;  %2652 = vmatpush.bf16.msrb.mxu1 %v4071_v28  ;;  %2665 = vmatpush.bf16.msrb.mxu2 %v4327_v29  ;;  %v4942_v19 = vld [vmem:[#allocation5 + $0x5ac] sm:$0xf0]  ;;  %v2424_v25 = vpop.f32.mrf.mxu3  ;;  %v3691_v26 = vor.u32 %v4878_v17, %v3690_v15 }
  0xee   :  { %v3780_v31 = vld [vmem:[#allocation5 + $0x468] sm:$0xf0]  ;;  %v4202_v22 = vld [vmem:[#allocation5 + $0x790] sm:$0xf]  ;;  %v3947_v27 = vor.u32 %v4942_v19, %v3946_v18 }
  0xef   :  { %v4961_v33 = vld [vmem:[#allocation5 + $0x64c] sm:$0xf]  ;;  %v3783_v43 = vor.u32 %v4897_v30, %v3780_v31  ;;  %2678 = vmatpush.bf16.msrb.mxu3 %v4583_v35  ;;  %v5006_v23 = vld [vmem:[#allocation5 + $0x7ac] sm:$0xf0] }
  0xf0   :  { %v4036_v37 = vld [vmem:[#allocation5 + $0x668] sm:$0xf0]  ;;  %v3402_v28 = vld [vmem:[#allocation5 + $0x150] sm:$0xf]  ;;  %v4203_v31 = vor.u32 %v5006_v23, %v4202_v22 }
  0xf1   :  { %v5025_v38 = vld [vmem:[#allocation5 + $0x84c] sm:$0xf]  ;;  %v4039_v46 = vor.u32 %v4961_v33, %v4036_v37  ;;  %2640 = vmatpush.bf16.msrb.mxu0 %v3783_v43  ;;  %v4806_v29 = vld [vmem:[#allocation5 + $0x16c] sm:$0xf0] }
  0xf2   :  { %v4292_v39 = vld [vmem:[#allocation5 + $0x868] sm:$0xf0]  ;;  %v3658_v30 = vld [vmem:[#allocation5 + $0x350] sm:$0xf] }
  0xf3   :  { %v5089_v40 = vld [vmem:[#allocation5 + $0xa4c] sm:$0xf]  ;;  %v4295_v47 = vor.u32 %v5025_v38, %v4292_v39  ;;  %2653 = vmatpush.bf16.msrb.mxu1 %v4039_v46  ;;  %v4870_v33 = vld [vmem:[#allocation5 + $0x36c] sm:$0xf0]  ;;  %v3403_v39 = vor.u32 %v4806_v29, %v3402_v28  ;;  %v5363_v18 = vpop.f32.mrf.mxu2 }
  0xf4   :  { %v4548_v41 = vld [vmem:[#allocation5 + $0xa68] sm:$0xf0]  ;;  %v4934_v35 = vld [vmem:[#allocation5 + $0x56c] sm:$0xf0] }
  0xf5   :  { %v4889_v44 = vld [vmem:[#allocation5 + $0x40c] sm:$0xf]  ;;  %v4551_v52 = vor.u32 %v5089_v40, %v4548_v41  ;;  %2666 = vmatpush.bf16.msrb.mxu2 %v4295_v47  ;;  %v4170_v37 = vld [vmem:[#allocation5 + $0x750] sm:$0xf]  ;;  %v2423_v40 = vadd.f32 %v2422_v56, %v2410_v12  ;;  %v3659_v41 = vor.u32 %v4870_v33, %v3658_v30  ;;  %v3915_v42 = vor.u32 %v4934_v35, %v3914_v34  ;;  %v5365_v23 = vpop.f32.mrf.mxu3 }
  0xf6   :  { %v3748_v45 = vld [vmem:[#allocation5 + $0x428] sm:$0xf0]  ;;  %v4998_v38 = vld [vmem:[#allocation5 + $0x76c] sm:$0xf0] }
  0xf7   :  { %v4953_v48 = vld [vmem:[#allocation5 + $0x60c] sm:$0xf]  ;;  %v3751_v60 = vor.u32 %v4889_v44, %v3748_v45  ;;  %2679 = vmatpush.bf16.msrb.mxu3 %v4551_v52  ;;  %v3370_v43 = vld [vmem:[#allocation5 + $0x110] sm:$0xf]  ;;  %v4171_v46 = vor.u32 %v4998_v38, %v4170_v37 }
  0xf8   :  { %v4004_v49 = vld [vmem:[#allocation5 + $0x628] sm:$0xf0]  ;;  %v4798_v44 = vld [vmem:[#allocation5 + $0x12c] sm:$0xf0] }
  0xf9   :  { %v5017_v50 = vld [vmem:[#allocation5 + $0x80c] sm:$0xf]  ;;  %v4007_v0 = vor.u32 %v4953_v48, %v4004_v49  ;;  %2641 = vmatpush.bf16.msrb.mxu0 %v3751_v60  ;;  %v3626_v45 = vld [vmem:[#allocation5 + $0x310] sm:$0xf] }
  0xfa   :  { %v4260_v53 = vld [vmem:[#allocation5 + $0x828] sm:$0xf0]  ;;  %v4862_v47 = vld [vmem:[#allocation5 + $0x32c] sm:$0xf0] }
  0xfb   :  { %v5081_v54 = vld [vmem:[#allocation5 + $0xa0c] sm:$0xf]  ;;  %v4263_v3 = vor.u32 %v5017_v50, %v4260_v53  ;;  %2654 = vmatpush.bf16.msrb.mxu1 %v4007_v0  ;;  %v3882_v48 = vld [vmem:[#allocation5 + $0x510] sm:$0xf]  ;;  %v2435_v50 = vpop.f32.mrf.mxu0  ;;  %v3627_v56 = vor.u32 %v4862_v47, %v3626_v45 }
  0xfc   :  { %v4516_v55 = vld [vmem:[#allocation5 + $0xa28] sm:$0xf0]  ;;  %2642 = vmatmul.bf16.vlgmr.msrb.gmra.mxu0 %v5324_v20  ;;  %v4926_v49 = vld [vmem:[#allocation5 + $0x52c] sm:$0xf0]  ;;  %v2436_v53 = vadd.f32 %v2435_v50, %v2423_v40  ;;  %v2463_v50 = vpop.f32.mrf.mxu2 }
  0xfd   :  { %v4519_v8 = vor.u32 %v5081_v54, %v4516_v55  ;;  %2667 = vmatpush.bf16.msrb.mxu2 %v4263_v3  ;;  %2686 = vmatpush.bf16.msra.mxu0 %v3467_v9  ;;  %v4990_v52 = vld [vmem:[#allocation5 + $0x72c] sm:$0xf0]  ;;  %v3371_v54 = vor.u32 %v4798_v44, %v3370_v43  ;;  %v2448_v55 = vpop.f32.mrf.mxu1  ;;  %v3883_v57 = vor.u32 %v4926_v49, %v3882_v48 }
  0xfe   :  { %2655 = vmatmul.bf16.vlgmr.msrb.gmra.mxu1 %v5326_v21  ;;  %v3338_v58 = vld [vmem:[#allocation5 + $0xd0] sm:$0xf]  ;;  %v4139_v61 = vor.u32 %v4990_v52, %v4138_v51  ;;  %v5360_v62 = vadd.f32 %v2448_v55, %v2436_v53 }
  0xff   :  { %2680 = vmatpush.bf16.msrb.mxu3 %v4519_v8  ;;  %2699 = vmatpush.bf16.msra.mxu1 %v3723_v10  ;;  %v4790_v59 = vld [vmem:[#allocation5 + $0xec] sm:$0xf0] }
 0x100   :  { %2668 = vmatmul.bf16.vlgmr.msrb.gmra.mxu2 %v5330_v32  ;;  %v3594_v60 = vld [vmem:[#allocation5 + $0x2d0] sm:$0xf]  ;;  %2998 = vst [vmem:[#allocation7] sm:$0xff] %v5360_v62  ;;  %v3339_v7 = vor.u32 %v4790_v59, %v3338_v58  ;;  %v3468_v58 = vld [vmem:[#allocation5 + $0x1f0] sm:$0xf0] }
 0x101   :  { %2712 = vmatpush.bf16.msra.mxu2 %v3979_v11  ;;  %2687 = vmatpush.bf16.msra.mxu0 %v3435_v5  ;;  %v4854_v63 = vld [vmem:[#allocation5 + $0x2ec] sm:$0xf0] }
 0x102   :  { %2681 = vmatmul.bf16.vlgmr.msrb.gmra.mxu3 %v5332_v36  ;;  %v3850_v0 = vld [vmem:[#allocation5 + $0x4d0] sm:$0xf]  ;;  %v3595_v8 = vor.u32 %v4854_v63, %v3594_v60  ;;  %v3724_v63 = vld [vmem:[#allocation5 + $0x3f0] sm:$0xf0] }
 0x103   :  { %2725 = vmatpush.bf16.msra.mxu3 %v4235_v16  ;;  %2700 = vmatpush.bf16.msra.mxu1 %v3691_v26  ;;  %v4918_v3 = vld [vmem:[#allocation5 + $0x4ec] sm:$0xf0]  ;;  %v2437_v24 = vpop.f32.mrf.mxu0 }
 0x104   :  { %v4106_v4 = vld [vmem:[#allocation5 + $0x6d0] sm:$0xf]  ;;  %v3851_v9 = vor.u32 %v4918_v3, %v3850_v0 }
 0x105   :  { %2713 = vmatpush.bf16.msra.mxu2 %v3947_v27  ;;  %2688 = vmatpush.bf16.msra.mxu0 %v3403_v39  ;;  %v4982_v6 = vld [vmem:[#allocation5 + $0x6ec] sm:$0xf0]  ;;  %v2450_v12 = vpop.f32.mrf.mxu1 }
 0x106   :  { %v3306_v10 = vld [vmem:[#allocation5 + $0x90] sm:$0xf]  ;;  %v4107_v14 = vor.u32 %v4982_v6, %v4106_v4 }
 0x107   :  { %2726 = vmatpush.bf16.msra.mxu3 %v4203_v31  ;;  %2701 = vmatpush.bf16.msra.mxu1 %v3659_v41  ;;  %v4782_v11 = vld [vmem:[#allocation5 + $0xac] sm:$0xf0] }
 0x108   :  { %v3562_v13 = vld [vmem:[#allocation5 + $0x290] sm:$0xf]  ;;  %v3307_v5 = vor.u32 %v4782_v11, %v3306_v10 }
 0x109   :  { %2714 = vmatpush.bf16.msra.mxu2 %v3915_v42  ;;  %2689 = vmatpush.bf16.msra.mxu0 %v3371_v54  ;;  %v4846_v15 = vld [vmem:[#allocation5 + $0x2ac] sm:$0xf0]  ;;  %v2476_v54 = vpop.f32.mrf.mxu3 }
 0x10a   :  { %v3818_v16 = vld [vmem:[#allocation5 + $0x490] sm:$0xf]  ;;  %v3563_v25 = vor.u32 %v4846_v15, %v3562_v13  ;;  %v4810_v13 = vld [vmem:[#allocation5 + $0x194] sm:$0xf] }
 0x10b   :  { %2727 = vmatpush.bf16.msra.mxu3 %v4171_v46  ;;  %2702 = vmatpush.bf16.msra.mxu1 %v3627_v56  ;;  %v4910_v17 = vld [vmem:[#allocation5 + $0x4ac] sm:$0xf0]  ;;  %v4874_v15 = vld [vmem:[#allocation5 + $0x394] sm:$0xf] }
 0x10c   :  { %v4074_v19 = vld [vmem:[#allocation5 + $0x690] sm:$0xf]  ;;  %v3819_v26 = vor.u32 %v4910_v17, %v3818_v16  ;;  %v3692_v16 = vld [vmem:[#allocation5 + $0x3b0] sm:$0xf0] }
 0x10d   :  { %2715 = vmatpush.bf16.msra.mxu2 %v3883_v57  ;;  %v4974_v22 = vld [vmem:[#allocation5 + $0x6ac] sm:$0xf0]  ;;  %2690 = vmatpush.bf16.msra.mxu0 %v3339_v7  ;;  %v4818_v57 = vld [vmem:[#allocation5 + $0x1d4] sm:$0xf] }
 0x10e   :  { %v3274_v27 = vld [vmem:[#allocation5 + $0x50] sm:$0xf]  ;;  %v4075_v30 = vor.u32 %v4974_v22, %v4074_v19  ;;  %v3471_v6 = vor.u32 %v4818_v57, %v3468_v58  ;;  %v4786_v57 = vld [vmem:[#allocation5 + $0xd4] sm:$0xf] }
 0x10f   :  { %2728 = vmatpush.bf16.msra.mxu3 %v4139_v61  ;;  %2703 = vmatpush.bf16.msra.mxu1 %v3595_v8  ;;  %v4774_v28 = vld [vmem:[#allocation5 + $0x6c] sm:$0xf0]  ;;  %v4882_v61 = vld [vmem:[#allocation5 + $0x3d4] sm:$0xf] }
 0x110   :  { %v3530_v29 = vld [vmem:[#allocation5 + $0x250] sm:$0xf]  ;;  %v3275_v38 = vor.u32 %v4774_v28, %v3274_v27  ;;  %v3727_v10 = vor.u32 %v4882_v61, %v3724_v63  ;;  %v4802_v27 = vld [vmem:[#allocation5 + $0x154] sm:$0xf] }
 0x111   :  { %2716 = vmatpush.bf16.msra.mxu2 %v3851_v9  ;;  %v4838_v31 = vld [vmem:[#allocation5 + $0x26c] sm:$0xf0]  ;;  %2691 = vmatpush.bf16.msra.mxu0 %v3307_v5  ;;  %v3404_v28 = vld [vmem:[#allocation5 + $0x170] sm:$0xf0] }
 0x112   :  { %v3786_v33 = vld [vmem:[#allocation5 + $0x450] sm:$0xf]  ;;  %v3531_v41 = vor.u32 %v4838_v31, %v3530_v29  ;;  %v4866_v29 = vld [vmem:[#allocation5 + $0x354] sm:$0xf] }
 0x113   :  { %2729 = vmatpush.bf16.msra.mxu3 %v4107_v14  ;;  %v4902_v34 = vld [vmem:[#allocation5 + $0x46c] sm:$0xf0]  ;;  %2704 = vmatpush.bf16.msra.mxu1 %v3563_v25  ;;  %v3436_v14 = vld [vmem:[#allocation5 + $0x1b0] sm:$0xf0]  ;;  %v3695_v25 = vor.u32 %v4874_v15, %v3692_v16 }
 0x114   :  { %v4042_v35 = vld [vmem:[#allocation5 + $0x650] sm:$0xf]  ;;  %v3787_v42 = vor.u32 %v4902_v34, %v3786_v33  ;;  %v3439_v22 = vor.u32 %v4810_v13, %v3436_v14  ;;  %v2475_v33 = vadd.f32 %v5365_v23, %v5363_v18  ;;  %v2487_v23 = vpop.f32.mrf.mxu0  ;;  %v3340_v58 = vld [vmem:[#allocation5 + $0xf0] sm:$0xf0] }
 0x115   :  { %v4966_v37 = vld [vmem:[#allocation5 + $0x66c] sm:$0xf0]  ;;  %2717 = vmatpush.bf16.msra.mxu2 %v3819_v26  ;;  %2692 = vmatpush.bf16.msra.mxu0 %v3275_v38  ;;  %v3596_v61 = vld [vmem:[#allocation5 + $0x2f0] sm:$0xf0] }
 0x116   :  { %v3242_v39 = vld [vmem:[#allocation5 + $0x10] sm:$0xf]  ;;  %v4043_v46 = vor.u32 %v4966_v37, %v4042_v35  ;;  %v3407_v35 = vor.u32 %v4802_v27, %v3404_v28  ;;  %v2488_v50 = vadd.f32 %v2487_v23, %v2475_v33  ;;  %v4778_v16 = vld [vmem:[#allocation5 + $0x94] sm:$0xf] }
 0x117   :  { %v4766_v40 = vld [vmem:[#allocation5 + $0x2c] sm:$0xf0]  ;;  %2730 = vmatpush.bf16.msra.mxu3 %v4075_v30  ;;  %2705 = vmatpush.bf16.msra.mxu1 %v3531_v41  ;;  %v3660_v30 = vld [vmem:[#allocation5 + $0x370] sm:$0xf0] }
 0x118   :  { %v3498_v43 = vld [vmem:[#allocation5 + $0x210] sm:$0xf]  ;;  %v3243_v55 = vor.u32 %v4766_v40, %v3242_v39  ;;  %v3663_v40 = vor.u32 %v4866_v29, %v3660_v30  ;;  %v4770_v33 = vld [vmem:[#allocation5 + $0x54] sm:$0xf] }
 0x119   :  { %v4830_v44 = vld [vmem:[#allocation5 + $0x22c] sm:$0xf0]  ;;  %2718 = vmatpush.bf16.msra.mxu2 %v3787_v42  ;;  %v4794_v42 = vld [vmem:[#allocation5 + $0x114] sm:$0xf] }
 0x11a   :  { %v3754_v45 = vld [vmem:[#allocation5 + $0x410] sm:$0xf]  ;;  %v3499_v59 = vor.u32 %v4830_v44, %v3498_v43  ;;  %2693 = vmatpush.bf16.msra.mxu0 %v3243_v55  ;;  %v3372_v43 = vld [vmem:[#allocation5 + $0x130] sm:$0xf0] }
 0x11b   :  { %v4894_v47 = vld [vmem:[#allocation5 + $0x42c] sm:$0xf0]  ;;  %2731 = vmatpush.bf16.msra.mxu3 %v4043_v46  ;;  %v4858_v44 = vld [vmem:[#allocation5 + $0x314] sm:$0xf]  ;;  %v3013_v46 = vrot.slane %v5360_v62, 4 }
 0x11c   :  { %v4010_v48 = vld [vmem:[#allocation5 + $0x610] sm:$0xf]  ;;  %v3755_v60 = vor.u32 %v4894_v47, %v3754_v45  ;;  %2706 = vmatpush.bf16.msra.mxu1 %v3499_v59  ;;  %v3628_v45 = vld [vmem:[#allocation5 + $0x330] sm:$0xf0]  ;;  %v3094_v47 = vmul.f32 %v5360_v62, %v5360_v62  ;;  %v2489_v27 = vpop.f32.mrf.mxu0 }
 0x11d   :  { %v4958_v49 = vld [vmem:[#allocation5 + $0x62c] sm:$0xf0]  ;;  %2694 = vmatmul.bf16.vlgmr.msra.gmra.mxu0 %v5318_v1  ;;  %v3631_v55 = vor.u32 %v4858_v44, %v3628_v45  ;;  %v3014_v63 = vadd.f32 %v3013_v46, %v5360_v62  ;;  %v2526_v14 = vpop.f32.mrf.mxu3  ;;  %v3564_v62 = vld [vmem:[#allocation5 + $0x2b0] sm:$0xf0] }
 0x11e   :  { %v4490_v51 = vld [vmem:[#allocation5 + $0x9d0] sm:$0xf]  ;;  %v4011_v0 = vor.u32 %v4958_v49, %v4010_v48  ;;  %2719 = vmatpush.bf16.msra.mxu2 %v3755_v60  ;;  %v3375_v49 = vor.u32 %v4794_v42, %v3372_v43  ;;  %v4850_v60 = vld [vmem:[#allocation5 + $0x2d4] sm:$0xf] }
 0x11f   :  { %v5078_v52 = vld [vmem:[#allocation5 + $0x9ec] sm:$0xf0]  ;;  %2707 = vmatmul.bf16.vlgmr.msra.gmra.mxu1 %v5320_v2 }
 0x120   :  { %v4746_v53 = vld [vmem:[#allocation5 + $0xbd0] sm:$0xf]  ;;  %v4491_v3 = vor.u32 %v5078_v52, %v4490_v51  ;;  %2732 = vmatpush.bf16.msra.mxu3 %v4011_v0  ;;  %v2500_v51 = vpop.f32.mrf.mxu1  ;;  %v3102_v0 = vrot.slane %v3094_v47, 4 }
 0x121   :  { %v5142_v56 = vld [vmem:[#allocation5 + $0xbec] sm:$0xf0]  ;;  %2720 = vmatmul.bf16.vlgmr.msra.gmra.mxu2 %v5324_v20  ;;  %v2501_v59 = vadd.f32 %v2500_v51, %v2488_v50  ;;  %v4762_v51 = vld [vmem:[#allocation5 + $0x14] sm:$0xf] }
 0x122   :  { %v4747_v4 = vor.u32 %v5142_v56, %v4746_v53  ;;  %v4458_v7 = vld [vmem:[#allocation5 + $0x990] sm:$0xf]  ;;  %2738 = vmatpush.bf16.msrb.mxu0 %v4491_v3  ;;  %2764 = vmatpush.bf16.msrb.mxu2 %v3471_v6  ;;  %v3343_v6 = vor.u32 %v4786_v57, %v3340_v58  ;;  %v3500_v58 = vld [vmem:[#allocation5 + $0x230] sm:$0xf0] }
 0x123   :  { %v5070_v8 = vld [vmem:[#allocation5 + $0x9ac] sm:$0xf0]  ;;  %2733 = vmatmul.bf16.vlgmr.msra.gmra.mxu3 %v5326_v21 }
 0x124   :  { %v4714_v9 = vld [vmem:[#allocation5 + $0xb90] sm:$0xf]  ;;  %v4459_v17 = vor.u32 %v5070_v8, %v4458_v7  ;;  %2751 = vmatpush.bf16.msrb.mxu1 %v4747_v4  ;;  %2777 = vmatpush.bf16.msrb.mxu3 %v3727_v10  ;;  %v2513_v7 = vpop.f32.mrf.mxu2 }
 0x125   :  { %v5134_v11 = vld [vmem:[#allocation5 + $0xbac] sm:$0xf0]  ;;  %v2514_v13 = vadd.f32 %v2513_v7, %v2501_v59  ;;  %v4946_v59 = vld [vmem:[#allocation5 + $0x5d4] sm:$0xf] }
 0x126   :  { %v4715_v19 = vor.u32 %v5134_v11, %v4714_v9  ;;  %v4426_v24 = vld [vmem:[#allocation5 + $0x950] sm:$0xf]  ;;  %2739 = vmatpush.bf16.msrb.mxu0 %v4459_v17  ;;  %2765 = vmatpush.bf16.msrb.mxu2 %v3439_v22  ;;  %v3599_v11 = vor.u32 %v4850_v60, %v3596_v61  ;;  %v3308_v17 = vld [vmem:[#allocation5 + $0xb0] sm:$0xf0]  ;;  %v3015_v22 = vrot.slane %v3014_v63, 2  ;;  %v2528_v60 = vpop.f32.mrf.mxu3 }
 0x127   :  { %v5062_v5 = vld [vmem:[#allocation5 + $0x96c] sm:$0xf0]  ;;  %v3311_v29 = vor.u32 %v4778_v16, %v3308_v17  ;;  %v3980_v61 = vld [vmem:[#allocation5 + $0x5f0] sm:$0xf0] }
 0x128   :  { %v4682_v12 = vld [vmem:[#allocation5 + $0xb50] sm:$0xf]  ;;  %v4427_v31 = vor.u32 %v5062_v5, %v4426_v24  ;;  %2752 = vmatpush.bf16.msrb.mxu1 %v4715_v19  ;;  %2778 = vmatpush.bf16.msrb.mxu3 %v3695_v25  ;;  %v4842_v19 = vld [vmem:[#allocation5 + $0x294] sm:$0xf]  ;;  %v3103_v24 = vadd.f32 %v3102_v0, %v3094_v47  ;;  %v2527_v5 = vadd.f32 %v2526_v14, %v2514_v13 }
 0x129   :  { %v5126_v26 = vld [vmem:[#allocation5 + $0xb6c] sm:$0xf0]  ;;  %v5010_v0 = vld [vmem:[#allocation5 + $0x7d4] sm:$0xf] }
 0x12a   :  { %v4683_v34 = vor.u32 %v5126_v26, %v4682_v12  ;;  %v4394_v37 = vld [vmem:[#allocation5 + $0x910] sm:$0xf]  ;;  %2740 = vmatpush.bf16.msrb.mxu0 %v4427_v31  ;;  %2766 = vmatpush.bf16.msrb.mxu2 %v3407_v35  ;;  %2999 = vst [vmem:[#allocation7 + $0x8] sm:$0xff] %v2527_v5  ;;  %v3019_v35 = vrot.slane %v2527_v5, 4  ;;  %v3104_v44 = vrot.slane %v3103_v24, 2 }
 0x12b   :  { %v5054_v38 = vld [vmem:[#allocation5 + $0x92c] sm:$0xf0]  ;;  %v5138_v14 = vld [vmem:[#allocation5 + $0xbd4] sm:$0xf] }
 0x12c   :  { %v4650_v39 = vld [vmem:[#allocation5 + $0xb10] sm:$0xf]  ;;  %v4395_v18 = vor.u32 %v5054_v38, %v4394_v37  ;;  %2753 = vmatpush.bf16.msrb.mxu1 %v4683_v34  ;;  %2779 = vmatpush.bf16.msrb.mxu3 %v3663_v40  ;;  %v2502_v34 = vpop.f32.mrf.mxu1  ;;  %v3095_v37 = vmul.f32 %v2527_v5, %v2527_v5  ;;  %v3567_v38 = vor.u32 %v4842_v19, %v3564_v62  ;;  %v4834_v40 = vld [vmem:[#allocation5 + $0x254] sm:$0xf] }
 0x12d   :  { %v5118_v41 = vld [vmem:[#allocation5 + $0xb2c] sm:$0xf0]  ;;  %v3020_v45 = vadd.f32 %v3019_v35, %v2527_v5  ;;  %v3983_v62 = vor.u32 %v4946_v59, %v3980_v61  ;;  %v5130_v34 = vld [vmem:[#allocation5 + $0xb94] sm:$0xf] }
 0x12e   :  { %v4651_v48 = vor.u32 %v5118_v41, %v4650_v39  ;;  %v4362_v52 = vld [vmem:[#allocation5 + $0x8d0] sm:$0xf]  ;;  %2741 = vmatpush.bf16.msrb.mxu0 %v4395_v18  ;;  %2767 = vmatpush.bf16.msrb.mxu2 %v3375_v49  ;;  %v3276_v39 = vld [vmem:[#allocation5 + $0x70] sm:$0xf0]  ;;  %v3108_v46 = vrot.slane %v3095_v37, 4 }
 0x12f   :  { %v5046_v53 = vld [vmem:[#allocation5 + $0x8ec] sm:$0xf0]  ;;  %v3532_v41 = vld [vmem:[#allocation5 + $0x270] sm:$0xf0]  ;;  %v3279_v50 = vor.u32 %v4770_v33, %v3276_v39 }
 0x130   :  { %v4618_v54 = vld [vmem:[#allocation5 + $0xad0] sm:$0xf]  ;;  %v4363_v3 = vor.u32 %v5046_v53, %v4362_v52  ;;  %2754 = vmatpush.bf16.msrb.mxu1 %v4651_v48  ;;  %2780 = vmatpush.bf16.msrb.mxu3 %v3631_v55  ;;  %v3016_v48 = vadd.f32 %v3015_v22, %v3014_v63  ;;  %v3244_v52 = vld [vmem:[#allocation5 + $0x30] sm:$0xf0]  ;;  %v3021_v55 = vrot.slane %v3020_v45, 2  ;;  %v3535_v57 = vor.u32 %v4834_v40, %v3532_v41 }
 0x131   :  { %v5110_v56 = vld [vmem:[#allocation5 + $0xaec] sm:$0xf0]  ;;  %v4826_v53 = vld [vmem:[#allocation5 + $0x214] sm:$0xf]  ;;  %v3247_v13 = vor.u32 %v4762_v51, %v3244_v52 }
 0x132   :  { %v4619_v4 = vor.u32 %v5110_v56, %v4618_v54  ;;  %v4330_v8 = vld [vmem:[#allocation5 + $0x890] sm:$0xf]  ;;  %2742 = vmatpush.bf16.msrb.mxu0 %v4363_v3  ;;  %2768 = vmatpush.bf16.msrb.mxu2 %v3343_v6  ;;  %v2515_v54 = vpop.f32.mrf.mxu2  ;;  %v3109_v56 = vadd.f32 %v3108_v46, %v3095_v37  ;;  %v4236_v3 = vld [vmem:[#allocation5 + $0x7f0] sm:$0xf0]  ;;  %v3022_v63 = vadd.f32 %v3021_v55, %v3020_v45 }
 0x133   :  { %v5038_v9 = vld [vmem:[#allocation5 + $0x8ac] sm:$0xf0]  ;;  %v3503_v19 = vor.u32 %v4826_v53, %v3500_v58  ;;  %v4938_v22 = vld [vmem:[#allocation5 + $0x594] sm:$0xf] }
 0x134   :  { %v4586_v10 = vld [vmem:[#allocation5 + $0xa90] sm:$0xf]  ;;  %v4331_v12 = vor.u32 %v5038_v9, %v4330_v8  ;;  %2755 = vmatpush.bf16.msrb.mxu1 %v4619_v4  ;;  %2781 = vmatpush.bf16.msrb.mxu3 %v3599_v11  ;;  %v3105_v4 = vadd.f32 %v3104_v44, %v3103_v24  ;;  %v3110_v6 = vrot.slane %v3109_v56, 2  ;;  %v5074_v8 = vld [vmem:[#allocation5 + $0x9d4] sm:$0xf]  ;;  %v3023_v16 = vrot.slane %v3022_v63, 1 }
 0x135   :  { %v5102_v15 = vld [vmem:[#allocation5 + $0xaac] sm:$0xf0]  ;;  %v4492_v9 = vld [vmem:[#allocation5 + $0x9f0] sm:$0xf0]  ;;  %v4239_v24 = vor.u32 %v5010_v0, %v4236_v3 }
 0x136   :  { %v4298_v25 = vld [vmem:[#allocation5 + $0x850] sm:$0xf]  ;;  %v4587_v28 = vor.u32 %v5102_v15, %v4586_v10  ;;  %2743 = vmatpush.bf16.msrb.mxu0 %v4331_v12  ;;  %2769 = vmatpush.bf16.msrb.mxu2 %v3311_v29  ;;  %v3017_v10 = vrot.slane %v3016_v48, 1  ;;  %v4748_v15 = vld [vmem:[#allocation5 + $0xbf0] sm:$0xf0]  ;;  %v3111_v17 = vadd.f32 %v3110_v6, %v3109_v56  ;;  %v4495_v5 = vor.u32 %v5074_v8, %v4492_v9  ;;  %v5387_v6 = vpop.f32.mrf.mxu0  ;;  %v5389_v8 = vpop.f32.mrf.mxu1 }
 0x137   :  { %v5030_v26 = vld [vmem:[#allocation5 + $0x86c] sm:$0xf0]  ;;  %v3948_v12 = vld [vmem:[#allocation5 + $0x5b0] sm:$0xf0]  ;;  %v3106_v27 = vrot.slane %v3105_v4, 1 }
 0x138   :  { %v4554_v30 = vld [vmem:[#allocation5 + $0xa50] sm:$0xf]  ;;  %v4299_v47 = vor.u32 %v5030_v26, %v4298_v25  ;;  %2756 = vmatpush.bf16.msrb.mxu1 %v4587_v28  ;;  %2782 = vmatpush.bf16.msrb.mxu3 %v3567_v38  ;;  %v5002_v25 = vld [vmem:[#allocation5 + $0x794] sm:$0xf]  ;;  %v3024_v28 = vadd.f32 %v3023_v16, %v3022_v63  ;;  %v3112_v29 = vrot.slane %v3111_v17, 1  ;;  %v3018_v37 = vadd.f32 %v3017_v10, %v3016_v48 }
 0x139   :  { %v5094_v31 = vld [vmem:[#allocation5 + $0xa6c] sm:$0xf0]  ;;  %v4204_v26 = vld [vmem:[#allocation5 + $0x7b0] sm:$0xf0]  ;;  %v3951_v40 = vor.u32 %v4938_v22, %v3948_v12 }
 0x13a   :  { %v4266_v42 = vld [vmem:[#allocation5 + $0x810] sm:$0xf]  ;;  %v4555_v49 = vor.u32 %v5094_v31, %v4554_v30  ;;  %2744 = vmatpush.bf16.msrb.mxu0 %v4299_v47  ;;  %2770 = vmatpush.bf16.msrb.mxu2 %v3279_v50  ;;  %v4751_v30 = vor.u32 %v5138_v14, %v4748_v15  ;;  %v5066_v31 = vld [vmem:[#allocation5 + $0x994] sm:$0xf]  ;;  %v3069_v38 = vrot.slane %v3024_v28, 7  ;;  %v3113_v39 = vadd.f32 %v3112_v29, %v3111_v17 }
 0x13b   :  { %v5022_v43 = vld [vmem:[#allocation5 + $0x82c] sm:$0xf0]  ;;  %v4460_v33 = vld [vmem:[#allocation5 + $0x9b0] sm:$0xf0]  ;;  %v3107_v47 = vadd.f32 %v3106_v27, %v3105_v4 }
 0x13c   :  { %v4522_v18 = vld [vmem:[#allocation5 + $0xa10] sm:$0xf]  ;;  %v4267_v7 = vor.u32 %v5022_v43, %v4266_v42  ;;  %2757 = vmatpush.bf16.msrb.mxu1 %v4555_v49  ;;  %2783 = vmatpush.bf16.msrb.mxu3 %v3535_v57  ;;  %v4716_v35 = vld [vmem:[#allocation5 + $0xbb0] sm:$0xf0]  ;;  %v4207_v42 = vor.u32 %v5002_v25, %v4204_v26  ;;  %v4463_v43 = vor.u32 %v5066_v31, %v4460_v33  ;;  %v5391_v33 = vpop.f32.mrf.mxu2 }
 0x13d   :  { %v5086_v23 = vld [vmem:[#allocation5 + $0xa2c] sm:$0xf0]  ;;  %v4930_v41 = vld [vmem:[#allocation5 + $0x554] sm:$0xf]  ;;  %v5379_v50 = vsel %vm3076_vm0, %v3018_v37, %v3069_v38  ;;  %v5393_v38 = vpop.f32.mrf.mxu3 }
 0x13e   :  { %v4523_v11 = vor.u32 %v5086_v23, %v4522_v18  ;;  %2745 = vmatpush.bf16.msrb.mxu0 %v4267_v7  ;;  %2771 = vmatpush.bf16.msrb.mxu2 %v3247_v13  ;;  %v3916_v44 = vld [vmem:[#allocation5 + $0x570] sm:$0xf0]  ;;  %v3158_v18 = vrot.slane %v3113_v39, 7  ;;  %v4719_v23 = vor.u32 %v5130_v34, %v4716_v35  ;;  %v2541_v37 = vpop.f32.mrf.mxu0 }
 0x13f   :  { %v4994_v45 = vld [vmem:[#allocation5 + $0x754] sm:$0xf]  ;;  %v3919_v53 = vor.u32 %v4930_v41, %v3916_v44  ;;  %v5007_v37 = vld [vmem:[#allocation5 + $0x7b4] sm:$0xf0] }
 0x140   :  { %2758 = vmatpush.bf16.msrb.mxu1 %v4523_v11  ;;  %2784 = vmatpush.bf16.msrb.mxu3 %v3503_v19  ;;  %v4172_v46 = vld [vmem:[#allocation5 + $0x770] sm:$0xf0]  ;;  %v5385_v54 = vsel %vm3076_vm0, %v3107_v47, %v3158_v18 }
 0x141   :  { %2746 = vmatmul.bf16.vlgmr.msrb.gmra.mxu0 %v5330_v32  ;;  %v5058_v48 = vld [vmem:[#allocation5 + $0x954] sm:$0xf]  ;;  %2772 = vmatmul.bf16.vlgmr.msrb.gmra.mxu2 %v5318_v1  ;;  %v4175_v55 = vor.u32 %v4994_v45, %v4172_v46 }
 0x142   :  { %2790 = vmatpush.bf16.msra.mxu0 %v3983_v62  ;;  %2816 = vmatpush.bf16.msra.mxu2 %v4495_v5  ;;  %v4428_v49 = vld [vmem:[#allocation5 + $0x970] sm:$0xf0] }
 0x143   :  { %2759 = vmatmul.bf16.vlgmr.msrb.gmra.mxu1 %v5332_v36  ;;  %v5122_v51 = vld [vmem:[#allocation5 + $0xb54] sm:$0xf]  ;;  %2785 = vmatmul.bf16.vlgmr.msrb.gmra.mxu3 %v5320_v2  ;;  %v4431_v56 = vor.u32 %v5058_v48, %v4428_v49 }
 0x144   :  { %2803 = vmatpush.bf16.msra.mxu1 %v4239_v24  ;;  %2829 = vmatpush.bf16.msra.mxu3 %v4751_v30  ;;  %v4684_v52 = vld [vmem:[#allocation5 + $0xb70] sm:$0xf0] }
 0x145   :  { %v4922_v57 = vld [vmem:[#allocation5 + $0x514] sm:$0xf]  ;;  %v4687_v60 = vor.u32 %v5122_v51, %v4684_v52 }
 0x146   :  { %2791 = vmatpush.bf16.msra.mxu0 %v3951_v40  ;;  %2817 = vmatpush.bf16.msra.mxu2 %v4463_v43  ;;  %v3884_v58 = vld [vmem:[#allocation5 + $0x530] sm:$0xf0]  ;;  %v2554_v40 = vpop.f32.mrf.mxu1 }
 0x147   :  { %v4986_v59 = vld [vmem:[#allocation5 + $0x714] sm:$0xf]  ;;  %v3887_v7 = vor.u32 %v4922_v57, %v3884_v58 }
 0x148   :  { %2804 = vmatpush.bf16.msra.mxu1 %v4207_v42  ;;  %2830 = vmatpush.bf16.msra.mxu3 %v4719_v23  ;;  %v4140_v61 = vld [vmem:[#allocation5 + $0x730] sm:$0xf0] }
 0x149   :  { %v5050_v0 = vld [vmem:[#allocation5 + $0x914] sm:$0xf]  ;;  %v4143_v9 = vor.u32 %v4986_v59, %v4140_v61 }
 0x14a   :  { %v4396_v3 = vld [vmem:[#allocation5 + $0x930] sm:$0xf0]  ;;  %2792 = vmatpush.bf16.msra.mxu0 %v3919_v53  ;;  %2818 = vmatpush.bf16.msra.mxu2 %v4431_v56 }
 0x14b   :  { %v5114_v4 = vld [vmem:[#allocation5 + $0xb14] sm:$0xf]  ;;  %v4399_v10 = vor.u32 %v5050_v0, %v4396_v3 }
 0x14c   :  { %v4652_v63 = vld [vmem:[#allocation5 + $0xb30] sm:$0xf0]  ;;  %2805 = vmatpush.bf16.msra.mxu1 %v4175_v55  ;;  %2831 = vmatpush.bf16.msra.mxu3 %v4687_v60 }
 0x14d   :  { %v4914_v11 = vld [vmem:[#allocation5 + $0x4d4] sm:$0xf]  ;;  %v4655_v15 = vor.u32 %v5114_v4, %v4652_v63  ;;  %v2567_v4 = vpop.f32.mrf.mxu2  ;;  %v3474_v63 = vld [vmem:[#allocation5 + $0x1d8] sm:$0xf] }
 0x14e   :  { %v3852_v13 = vld [vmem:[#allocation5 + $0x4f0] sm:$0xf0]  ;;  %2793 = vmatpush.bf16.msra.mxu0 %v3887_v7  ;;  %2819 = vmatpush.bf16.msra.mxu2 %v4399_v10  ;;  %v4823_v7 = vld [vmem:[#allocation5 + $0x1f4] sm:$0xf0]  ;;  %v2580_v10 = vpop.f32.mrf.mxu3 }
 0x14f   :  { %v4978_v14 = vld [vmem:[#allocation5 + $0x6d4] sm:$0xf]  ;;  %v3855_v24 = vor.u32 %v4914_v11, %v3852_v13  ;;  %v4887_v13 = vld [vmem:[#allocation5 + $0x3f4] sm:$0xf0] }
 0x150   :  { %v4108_v16 = vld [vmem:[#allocation5 + $0x6f0] sm:$0xf0]  ;;  %2806 = vmatpush.bf16.msra.mxu1 %v4143_v9  ;;  %2832 = vmatpush.bf16.msra.mxu3 %v4655_v15  ;;  %v3730_v9 = vld [vmem:[#allocation5 + $0x3d8] sm:$0xf] }
 0x151   :  { %v5042_v17 = vld [vmem:[#allocation5 + $0x8d4] sm:$0xf]  ;;  %v4111_v5 = vor.u32 %v4978_v14, %v4108_v16  ;;  %v3986_v14 = vld [vmem:[#allocation5 + $0x5d8] sm:$0xf] }
 0x152   :  { %v4364_v19 = vld [vmem:[#allocation5 + $0x8f0] sm:$0xf0]  ;;  %2794 = vmatpush.bf16.msra.mxu0 %v3855_v24  ;;  %v4951_v15 = vld [vmem:[#allocation5 + $0x5f4] sm:$0xf0] }
 0x153   :  { %v5106_v62 = vld [vmem:[#allocation5 + $0xad4] sm:$0xf]  ;;  %v4367_v12 = vor.u32 %v5042_v17, %v4364_v19  ;;  %v4242_v19 = vld [vmem:[#allocation5 + $0x7d8] sm:$0xf] }
 0x154   :  { %v4620_v22 = vld [vmem:[#allocation5 + $0xaf0] sm:$0xf0]  ;;  %2807 = vmatpush.bf16.msra.mxu1 %v4111_v5  ;;  %v3475_v5 = vor.u32 %v4823_v7, %v3474_v63  ;;  %v4791_v10 = vld [vmem:[#allocation5 + $0xf4] sm:$0xf0] }
 0x155   :  { %v4906_v25 = vld [vmem:[#allocation5 + $0x494] sm:$0xf]  ;;  %v4623_v28 = vor.u32 %v5106_v62, %v4620_v22  ;;  %2820 = vmatpush.bf16.msra.mxu2 %v4367_v12  ;;  %v5015_v62 = vld [vmem:[#allocation5 + $0x7f4] sm:$0xf0]  ;;  %v2553_v22 = vadd.f32 %v5389_v8, %v5387_v6  ;;  %v3731_v12 = vor.u32 %v4887_v13, %v3730_v9  ;;  %v2604_v63 = vpop.f32.mrf.mxu1 }
 0x156   :  { %v3820_v26 = vld [vmem:[#allocation5 + $0x4b0] sm:$0xf0]  ;;  %v3346_v9 = vld [vmem:[#allocation5 + $0xd8] sm:$0xf] }
 0x157   :  { %v4970_v27 = vld [vmem:[#allocation5 + $0x694] sm:$0xf]  ;;  %v3823_v39 = vor.u32 %v4906_v25, %v3820_v26  ;;  %2833 = vmatpush.bf16.msra.mxu3 %v4623_v28  ;;  %v3987_v25 = vor.u32 %v4951_v15, %v3986_v14  ;;  %v3442_v26 = vld [vmem:[#allocation5 + $0x198] sm:$0xf]  ;;  %v2566_v6 = vadd.f32 %v5391_v33, %v2553_v22  ;;  %v3347_v22 = vor.u32 %v4791_v10, %v3346_v9  ;;  %v4819_v10 = vld [vmem:[#allocation5 + $0x1dc] sm:$0xf] }
 0x158   :  { %v4076_v29 = vld [vmem:[#allocation5 + $0x6b0] sm:$0xf0]  ;;  %v3698_v28 = vld [vmem:[#allocation5 + $0x398] sm:$0xf] }
 0x159   :  { %v5034_v30 = vld [vmem:[#allocation5 + $0x894] sm:$0xf]  ;;  %v4079_v41 = vor.u32 %v4970_v27, %v4076_v29  ;;  %2795 = vmatpush.bf16.msra.mxu0 %v3823_v39  ;;  %v4815_v27 = vld [vmem:[#allocation5 + $0x1b4] sm:$0xf0]  ;;  %v4243_v29 = vor.u32 %v5015_v62, %v4242_v19 }
 0x15a   :  { %v4332_v31 = vld [vmem:[#allocation5 + $0x8b0] sm:$0xf0]  ;;  %v3443_v39 = vor.u32 %v4815_v27, %v3442_v26  ;;  %v4999_v33 = vld [vmem:[#allocation5 + $0x774] sm:$0xf0] }
 0x15b   :  { %v5098_v34 = vld [vmem:[#allocation5 + $0xa94] sm:$0xf]  ;;  %v4335_v42 = vor.u32 %v5034_v30, %v4332_v31  ;;  %2808 = vmatpush.bf16.msra.mxu1 %v4079_v41  ;;  %v4879_v30 = vld [vmem:[#allocation5 + $0x3b4] sm:$0xf0] }
 0x15c   :  { %v4588_v35 = vld [vmem:[#allocation5 + $0xab0] sm:$0xf0]  ;;  %v3954_v31 = vld [vmem:[#allocation5 + $0x598] sm:$0xf]  ;;  %v3699_v8 = vor.u32 %v4879_v30, %v3698_v28 }
 0x15d   :  { %v4898_v43 = vld [vmem:[#allocation5 + $0x454] sm:$0xf]  ;;  %v4591_v46 = vor.u32 %v5098_v34, %v4588_v35  ;;  %2821 = vmatpush.bf16.msra.mxu2 %v4335_v42  ;;  %v4943_v34 = vld [vmem:[#allocation5 + $0x5b4] sm:$0xf0] }
 0x15e   :  { %v3788_v44 = vld [vmem:[#allocation5 + $0x470] sm:$0xf0]  ;;  %v4210_v35 = vld [vmem:[#allocation5 + $0x798] sm:$0xf]  ;;  %v3955_v40 = vor.u32 %v4943_v34, %v3954_v31  ;;  %v5406_v31 = vpop.f32.mrf.mxu2 }
 0x15f   :  { %v4962_v45 = vld [vmem:[#allocation5 + $0x654] sm:$0xf]  ;;  %v3791_v51 = vor.u32 %v4898_v43, %v3788_v44  ;;  %2834 = vmatpush.bf16.msra.mxu3 %v4591_v46  ;;  %v3410_v41 = vld [vmem:[#allocation5 + $0x158] sm:$0xf]  ;;  %v4211_v44 = vor.u32 %v5007_v37, %v4210_v35  ;;  %v5408_v37 = vpop.f32.mrf.mxu3 }
 0x160   :  { %v4044_v47 = vld [vmem:[#allocation5 + $0x670] sm:$0xf0]  ;;  %v4807_v42 = vld [vmem:[#allocation5 + $0x174] sm:$0xf0] }
 0x161   :  { %v5026_v18 = vld [vmem:[#allocation5 + $0x854] sm:$0xf]  ;;  %v4047_v55 = vor.u32 %v4962_v45, %v4044_v47  ;;  %2796 = vmatpush.bf16.msra.mxu0 %v3791_v51  ;;  %v3666_v43 = vld [vmem:[#allocation5 + $0x358] sm:$0xf] }
 0x162   :  { %v4300_v23 = vld [vmem:[#allocation5 + $0x870] sm:$0xf0]  ;;  %v4871_v45 = vld [vmem:[#allocation5 + $0x374] sm:$0xf0] }
 0x163   :  { %v5090_v48 = vld [vmem:[#allocation5 + $0xa54] sm:$0xf]  ;;  %v4303_v56 = vor.u32 %v5026_v18, %v4300_v23  ;;  %2809 = vmatpush.bf16.msra.mxu1 %v4047_v55  ;;  %v3922_v46 = vld [vmem:[#allocation5 + $0x558] sm:$0xf]  ;;  %v3411_v23 = vor.u32 %v4807_v42, %v3410_v41 }
 0x164   :  { %v4556_v49 = vld [vmem:[#allocation5 + $0xa70] sm:$0xf0]  ;;  %v4935_v47 = vld [vmem:[#allocation5 + $0x574] sm:$0xf0] }
 0x165   :  { %v4890_v52 = vld [vmem:[#allocation5 + $0x414] sm:$0xf]  ;;  %v4559_v60 = vor.u32 %v5090_v48, %v4556_v49  ;;  %2822 = vmatpush.bf16.msra.mxu2 %v4303_v56  ;;  %v4178_v18 = vld [vmem:[#allocation5 + $0x758] sm:$0xf]  ;;  %v2579_v48 = vadd.f32 %v5393_v38, %v2566_v6  ;;  %v3667_v49 = vor.u32 %v4871_v45, %v3666_v43  ;;  %v3923_v51 = vor.u32 %v4935_v47, %v3922_v46 }
 0x166   :  { %v3756_v53 = vld [vmem:[#allocation5 + $0x430] sm:$0xf0]  ;;  %v3634_v55 = vld [vmem:[#allocation5 + $0x318] sm:$0xf]  ;;  %v4179_v56 = vor.u32 %v4999_v33, %v4178_v18 }
 0x167   :  { %v4954_v57 = vld [vmem:[#allocation5 + $0x614] sm:$0xf]  ;;  %v3759_v11 = vor.u32 %v4890_v52, %v3756_v53  ;;  %2835 = vmatpush.bf16.msra.mxu3 %v4559_v60  ;;  %v3378_v52 = vld [vmem:[#allocation5 + $0x118] sm:$0xf]  ;;  %v2591_v60 = vpop.f32.mrf.mxu0 }
 0x168   :  { %v4012_v58 = vld [vmem:[#allocation5 + $0x630] sm:$0xf0]  ;;  %v4799_v53 = vld [vmem:[#allocation5 + $0x134] sm:$0xf0] }
 0x169   :  { %v5018_v59 = vld [vmem:[#allocation5 + $0x814] sm:$0xf]  ;;  %v4015_v16 = vor.u32 %v4954_v57, %v4012_v58  ;;  %2797 = vmatpush.bf16.msra.mxu0 %v3759_v11  ;;  %v4863_v57 = vld [vmem:[#allocation5 + $0x334] sm:$0xf0]  ;;  %v3379_v4 = vor.u32 %v4799_v53, %v3378_v52 }
 0x16a   :  { %v4268_v61 = vld [vmem:[#allocation5 + $0x830] sm:$0xf0]  ;;  %v3890_v58 = vld [vmem:[#allocation5 + $0x518] sm:$0xf]  ;;  %v3635_v38 = vor.u32 %v4863_v57, %v3634_v55 }
 0x16b   :  { %v5082_v0 = vld [vmem:[#allocation5 + $0xa14] sm:$0xf]  ;;  %v4271_v17 = vor.u32 %v5018_v59, %v4268_v61  ;;  %2810 = vmatpush.bf16.msra.mxu1 %v4015_v16  ;;  %v4927_v59 = vld [vmem:[#allocation5 + $0x534] sm:$0xf0] }
 0x16c   :  { %v4524_v3 = vld [vmem:[#allocation5 + $0xa30] sm:$0xf0]  ;;  %2798 = vmatmul.bf16.vlgmr.msra.gmra.mxu0 %v5324_v20  ;;  %v4146_v61 = vld [vmem:[#allocation5 + $0x718] sm:$0xf]  ;;  %v3891_v7 = vor.u32 %v4927_v59, %v3890_v58 }
 0x16d   :  { %v4527_v24 = vor.u32 %v5082_v0, %v4524_v3  ;;  %2823 = vmatpush.bf16.msra.mxu2 %v4271_v17  ;;  %2842 = vmatpush.bf16.msrb.mxu0 %v3475_v5  ;;  %v4991_v0 = vld [vmem:[#allocation5 + $0x734] sm:$0xf0]  ;;  %v2592_v3 = vadd.f32 %v2591_v60, %v2579_v48 }
 0x16e   :  { %2811 = vmatmul.bf16.vlgmr.msra.gmra.mxu1 %v5326_v21  ;;  %v3602_v11 = vld [vmem:[#allocation5 + $0x2d8] sm:$0xf]  ;;  %v4147_v13 = vor.u32 %v4991_v0, %v4146_v61  ;;  %v2619_v0 = vpop.f32.mrf.mxu2 }
 0x16f   :  { %2836 = vmatpush.bf16.msra.mxu3 %v4527_v24  ;;  %2855 = vmatpush.bf16.msrb.mxu1 %v3731_v12  ;;  %v5403_v14 = vadd.f32 %v2604_v63, %v2592_v3  ;;  %v4855_v15 = vld [vmem:[#allocation5 + $0x2f4] sm:$0xf0] }
 0x170   :  { %2824 = vmatmul.bf16.vlgmr.msra.gmra.mxu2 %v5330_v32  ;;  %v3858_v16 = vld [vmem:[#allocation5 + $0x4d8] sm:$0xf]  ;;  %v3603_v24 = vor.u32 %v4855_v15, %v3602_v11  ;;  %v3476_v11 = vld [vmem:[#allocation5 + $0x1f8] sm:$0xf0] }
 0x171   :  { %2868 = vmatpush.bf16.msrb.mxu2 %v3987_v25  ;;  %2843 = vmatpush.bf16.msrb.mxu0 %v3443_v39  ;;  %v4919_v17 = vld [vmem:[#allocation5 + $0x4f4] sm:$0xf0]  ;;  %3000 = vst [vmem:[#allocation7 + $0x10] sm:$0xff] %v5403_v14  ;;  %v2593_v39 = vpop.f32.mrf.mxu0 }
 0x172   :  { %2837 = vmatmul.bf16.vlgmr.msra.gmra.mxu3 %v5332_v36  ;;  %v4114_v19 = vld [vmem:[#allocation5 + $0x6d8] sm:$0xf]  ;;  %v3859_v5 = vor.u32 %v4919_v17, %v3858_v16  ;;  %v4883_v16 = vld [vmem:[#allocation5 + $0x3dc] sm:$0xf] }
 0x173   :  { %2881 = vmatpush.bf16.msrb.mxu3 %v4243_v29  ;;  %2856 = vmatpush.bf16.msrb.mxu1 %v3699_v8  ;;  %v4983_v62 = vld [vmem:[#allocation5 + $0x6f4] sm:$0xf0]  ;;  %v2606_v8 = vpop.f32.mrf.mxu1  ;;  %v3732_v17 = vld [vmem:[#allocation5 + $0x3f8] sm:$0xf0] }
 0x174   :  { %v3314_v12 = vld [vmem:[#allocation5 + $0x98] sm:$0xf]  ;;  %v4115_v27 = vor.u32 %v4983_v62, %v4114_v19 }
 0x175   :  { %2869 = vmatpush.bf16.msrb.mxu2 %v3955_v40  ;;  %2844 = vmatpush.bf16.msrb.mxu0 %v3411_v23  ;;  %v4783_v25 = vld [vmem:[#allocation5 + $0xb4] sm:$0xf0] }
 0x176   :  { %v3570_v26 = vld [vmem:[#allocation5 + $0x298] sm:$0xf]  ;;  %v3315_v6 = vor.u32 %v4783_v25, %v3314_v12 }
 0x177   :  { %2882 = vmatpush.bf16.msrb.mxu3 %v4211_v44  ;;  %2857 = vmatpush.bf16.msrb.mxu1 %v3667_v49  ;;  %v4847_v28 = vld [vmem:[#allocation5 + $0x2b4] sm:$0xf0] }
 0x178   :  { %v3826_v29 = vld [vmem:[#allocation5 + $0x498] sm:$0xf]  ;;  %v3571_v40 = vor.u32 %v4847_v28, %v3570_v26  ;;  %v3735_v26 = vor.u32 %v4883_v16, %v3732_v17  ;;  %v4811_v28 = vld [vmem:[#allocation5 + $0x19c] sm:$0xf] }
 0x179   :  { %2870 = vmatpush.bf16.msrb.mxu2 %v3923_v51  ;;  %2845 = vmatpush.bf16.msrb.mxu0 %v3379_v4  ;;  %v4911_v30 = vld [vmem:[#allocation5 + $0x4b4] sm:$0xf0]  ;;  %v4787_v16 = vld [vmem:[#allocation5 + $0xdc] sm:$0xf] }
 0x17a   :  { %v4082_v34 = vld [vmem:[#allocation5 + $0x698] sm:$0xf]  ;;  %v3827_v41 = vor.u32 %v4911_v30, %v3826_v29  ;;  %v3444_v29 = vld [vmem:[#allocation5 + $0x1b8] sm:$0xf0] }
 0x17b   :  { %2883 = vmatpush.bf16.msrb.mxu3 %v4179_v56  ;;  %2858 = vmatpush.bf16.msrb.mxu1 %v3635_v38  ;;  %v4975_v35 = vld [vmem:[#allocation5 + $0x6b4] sm:$0xf0]  ;;  %v2632_v38 = vpop.f32.mrf.mxu3  ;;  %v4875_v30 = vld [vmem:[#allocation5 + $0x39c] sm:$0xf]  ;;  %v3447_v8 = vor.u32 %v4811_v28, %v3444_v29 }
 0x17c   :  { %v3282_v42 = vld [vmem:[#allocation5 + $0x58] sm:$0xf]  ;;  %v4083_v45 = vor.u32 %v4975_v35, %v4082_v34  ;;  %v3700_v34 = vld [vmem:[#allocation5 + $0x3b8] sm:$0xf0]  ;;  %v3025_v35 = vrot.slane %v5403_v14, 4 }
 0x17d   :  { %2871 = vmatpush.bf16.msrb.mxu2 %v3891_v7  ;;  %2846 = vmatpush.bf16.msrb.mxu0 %v3347_v22  ;;  %v4775_v43 = vld [vmem:[#allocation5 + $0x74] sm:$0xf0]  ;;  %v3348_v17 = vld [vmem:[#allocation5 + $0xf8] sm:$0xf0] }
 0x17e   :  { %v3538_v44 = vld [vmem:[#allocation5 + $0x258] sm:$0xf]  ;;  %v3283_v48 = vor.u32 %v4775_v43, %v3282_v42  ;;  %v3703_v43 = vor.u32 %v4875_v30, %v3700_v34 }
 0x17f   :  { %2884 = vmatpush.bf16.msrb.mxu3 %v4147_v13  ;;  %2859 = vmatpush.bf16.msrb.mxu1 %v3603_v24  ;;  %v4839_v46 = vld [vmem:[#allocation5 + $0x274] sm:$0xf0]  ;;  %v3479_v24 = vor.u32 %v4819_v10, %v3476_v11 }
 0x180   :  { %v3794_v47 = vld [vmem:[#allocation5 + $0x458] sm:$0xf]  ;;  %v3539_v52 = vor.u32 %v4839_v46, %v3538_v44  ;;  %v3412_v46 = vld [vmem:[#allocation5 + $0x178] sm:$0xf0] }
 0x181   :  { %2872 = vmatpush.bf16.msrb.mxu2 %v3859_v5  ;;  %v4903_v18 = vld [vmem:[#allocation5 + $0x474] sm:$0xf0]  ;;  %2847 = vmatpush.bf16.msrb.mxu0 %v3315_v6 }
 0x182   :  { %v4050_v33 = vld [vmem:[#allocation5 + $0x658] sm:$0xf]  ;;  %v3795_v53 = vor.u32 %v4903_v18, %v3794_v47  ;;  %v4867_v47 = vld [vmem:[#allocation5 + $0x35c] sm:$0xf] }
 0x183   :  { %2885 = vmatpush.bf16.msrb.mxu3 %v4115_v27  ;;  %v4967_v23 = vld [vmem:[#allocation5 + $0x674] sm:$0xf0]  ;;  %2860 = vmatpush.bf16.msrb.mxu1 %v3571_v40  ;;  %v3668_v18 = vld [vmem:[#allocation5 + $0x378] sm:$0xf0] }
 0x184   :  { %v3250_v49 = vld [vmem:[#allocation5 + $0x18] sm:$0xf]  ;;  %v4051_v58 = vor.u32 %v4967_v23, %v4050_v33  ;;  %v3026_v33 = vadd.f32 %v3025_v35, %v5403_v14  ;;  %v3096_v23 = vmul.f32 %v5403_v14, %v5403_v14  ;;  %v4859_v14 = vld [vmem:[#allocation5 + $0x31c] sm:$0xf] }
 0x185   :  { %v4767_v51 = vld [vmem:[#allocation5 + $0x34] sm:$0xf0]  ;;  %2873 = vmatpush.bf16.msrb.mxu2 %v3827_v41  ;;  %2848 = vmatpush.bf16.msrb.mxu0 %v3283_v48 }
 0x186   :  { %v3506_v55 = vld [vmem:[#allocation5 + $0x218] sm:$0xf]  ;;  %v3251_v7 = vor.u32 %v4767_v51, %v3250_v49  ;;  %v2631_v49 = vadd.f32 %v5408_v37, %v5406_v31  ;;  %v3027_v0 = vrot.slane %v3026_v33, 2 }
 0x187   :  { %v4831_v56 = vld [vmem:[#allocation5 + $0x234] sm:$0xf0]  ;;  %2886 = vmatpush.bf16.msrb.mxu3 %v4083_v45  ;;  %2861 = vmatpush.bf16.msrb.mxu1 %v3539_v52  ;;  %v4803_v45 = vld [vmem:[#allocation5 + $0x15c] sm:$0xf] }
 0x188   :  { %v3762_v57 = vld [vmem:[#allocation5 + $0x418] sm:$0xf]  ;;  %v3507_v13 = vor.u32 %v4831_v56, %v3506_v55  ;;  %v3415_v52 = vor.u32 %v4803_v45, %v3412_v46 }
 0x189   :  { %v4895_v59 = vld [vmem:[#allocation5 + $0x434] sm:$0xf0]  ;;  %2874 = vmatpush.bf16.msrb.mxu2 %v3795_v53  ;;  %2849 = vmatpush.bf16.msrb.mxu0 %v3251_v7  ;;  %v2656_v7 = vpop.f32.mrf.mxu1 }
 0x18a   :  { %v4018_v60 = vld [vmem:[#allocation5 + $0x618] sm:$0xf]  ;;  %v3763_v15 = vor.u32 %v4895_v59, %v3762_v57  ;;  %v3671_v57 = vor.u32 %v4867_v47, %v3668_v18  ;;  %v4795_v59 = vld [vmem:[#allocation5 + $0x11c] sm:$0xf] }
 0x18b   :  { %v4959_v61 = vld [vmem:[#allocation5 + $0x634] sm:$0xf0]  ;;  %2887 = vmatpush.bf16.msrb.mxu3 %v4051_v58  ;;  %2862 = vmatpush.bf16.msrb.mxu1 %v3507_v13 }
 0x18c   :  { %v4498_v3 = vld [vmem:[#allocation5 + $0x9d8] sm:$0xf]  ;;  %v4019_v19 = vor.u32 %v4959_v61, %v4018_v60  ;;  %2850 = vmatmul.bf16.vlgmr.msrb.gmra.mxu0 %v5318_v1  ;;  %v3380_v60 = vld [vmem:[#allocation5 + $0x138] sm:$0xf0] }
 0x18d   :  { %v5079_v4 = vld [vmem:[#allocation5 + $0x9f4] sm:$0xf0]  ;;  %2875 = vmatpush.bf16.msrb.mxu2 %v3763_v15  ;;  %v3636_v61 = vld [vmem:[#allocation5 + $0x338] sm:$0xf0]  ;;  %v3383_v37 = vor.u32 %v4795_v59, %v3380_v60 }
 0x18e   :  { %v4754_v63 = vld [vmem:[#allocation5 + $0xbd8] sm:$0xf]  ;;  %v4499_v62 = vor.u32 %v5079_v4, %v4498_v3  ;;  %2863 = vmatmul.bf16.vlgmr.msrb.gmra.mxu1 %v5320_v2  ;;  %v3114_v3 = vrot.slane %v3096_v23, 4  ;;  %v3639_v13 = vor.u32 %v4859_v14, %v3636_v61  ;;  %v4835_v59 = vld [vmem:[#allocation5 + $0x25c] sm:$0xf] }
 0x18f   :  { %v5143_v9 = vld [vmem:[#allocation5 + $0xbf4] sm:$0xf0]  ;;  %2888 = vmatpush.bf16.msrb.mxu3 %v4019_v19  ;;  %v3540_v60 = vld [vmem:[#allocation5 + $0x278] sm:$0xf0] }
 0x190   :  { %v4755_v22 = vor.u32 %v5143_v9, %v4754_v63  ;;  %v4466_v5 = vld [vmem:[#allocation5 + $0x998] sm:$0xf]  ;;  %2894 = vmatpush.bf16.msra.mxu0 %v4499_v62  ;;  %2876 = vmatmul.bf16.vlgmr.msrb.gmra.mxu2 %v5324_v20  ;;  %v2643_v63 = vpop.f32.mrf.mxu0  ;;  %v4851_v62 = vld [vmem:[#allocation5 + $0x2dc] sm:$0xf] }
 0x191   :  { %v5071_v12 = vld [vmem:[#allocation5 + $0x9b4] sm:$0xf0]  ;;  %2920 = vmatpush.bf16.msra.mxu2 %v3479_v24  ;;  %v2644_v38 = vadd.f32 %v2643_v63, %v2631_v49  ;;  %v5420_v24 = vadd.f32 %v3027_v0, %v3026_v33 }
 0x192   :  { %v4722_v25 = vld [vmem:[#allocation5 + $0xb98] sm:$0xf]  ;;  %v4467_v39 = vor.u32 %v5071_v12, %v4466_v5  ;;  %2907 = vmatpush.bf16.msra.mxu1 %v4755_v22  ;;  %2889 = vmatmul.bf16.vlgmr.msrb.gmra.mxu3 %v5326_v21  ;;  %v3604_v22 = vld [vmem:[#allocation5 + $0x2f8] sm:$0xf0]  ;;  %v3115_v5 = vadd.f32 %v3114_v3, %v3096_v23 }
 0x193   :  { %v5135_v27 = vld [vmem:[#allocation5 + $0xbb4] sm:$0xf0]  ;;  %2933 = vmatpush.bf16.msra.mxu3 %v3735_v26  ;;  %v2657_v19 = vadd.f32 %v2656_v7, %v2644_v38  ;;  %v3351_v26 = vor.u32 %v4787_v16, %v3348_v17  ;;  %v3607_v34 = vor.u32 %v4851_v62, %v3604_v22  ;;  %v3543_v17 = vor.u32 %v4835_v59, %v3540_v60  ;;  %v4947_v62 = vld [vmem:[#allocation5 + $0x5dc] sm:$0xf] }
 0x194   :  { %v4723_v6 = vor.u32 %v5135_v27, %v4722_v25  ;;  %v4434_v40 = vld [vmem:[#allocation5 + $0x958] sm:$0xf]  ;;  %2895 = vmatpush.bf16.msra.mxu0 %v4467_v39  ;;  %v2669_v27 = vpop.f32.mrf.mxu2  ;;  %v2682_v39 = vpop.f32.mrf.mxu3 }
 0x195   :  { %v5063_v41 = vld [vmem:[#allocation5 + $0x974] sm:$0xf0]  ;;  %2921 = vmatpush.bf16.msra.mxu2 %v3447_v8  ;;  %v2670_v35 = vadd.f32 %v2669_v27, %v2657_v19  ;;  %v4779_v8 = vld [vmem:[#allocation5 + $0x9c] sm:$0xf] }
 0x196   :  { %v4690_v42 = vld [vmem:[#allocation5 + $0xb58] sm:$0xf]  ;;  %v4435_v48 = vor.u32 %v5063_v41, %v4434_v40  ;;  %2908 = vmatpush.bf16.msra.mxu1 %v4723_v6  ;;  %v3316_v40 = vld [vmem:[#allocation5 + $0xb8] sm:$0xf0] }
 0x197   :  { %v5127_v44 = vld [vmem:[#allocation5 + $0xb74] sm:$0xf0]  ;;  %2934 = vmatpush.bf16.msra.mxu3 %v3703_v43  ;;  %v4843_v41 = vld [vmem:[#allocation5 + $0x29c] sm:$0xf]  ;;  %v3029_v43 = vrot.slane %v5420_v24, 1  ;;  %v2683_v45 = vadd.f32 %v2682_v39, %v2670_v35 }
 0x198   :  { %v4691_v51 = vor.u32 %v5127_v44, %v4690_v42  ;;  %v4402_v53 = vld [vmem:[#allocation5 + $0x918] sm:$0xf]  ;;  %2896 = vmatpush.bf16.msra.mxu0 %v4435_v48  ;;  %v3572_v42 = vld [vmem:[#allocation5 + $0x2b8] sm:$0xf0]  ;;  %v3116_v44 = vrot.slane %v3115_v5, 2  ;;  %v2645_v33 = vpop.f32.mrf.mxu0  ;;  %v3319_v48 = vor.u32 %v4779_v8, %v3316_v40 }
 0x199   :  { %v5055_v55 = vld [vmem:[#allocation5 + $0x934] sm:$0xf0]  ;;  %2922 = vmatpush.bf16.msra.mxu2 %v3415_v52  ;;  %v4771_v52 = vld [vmem:[#allocation5 + $0x5c] sm:$0xf]  ;;  %3001 = vst [vmem:[#allocation7 + $0x18] sm:$0xff] %v2683_v45  ;;  %v3030_v35 = vadd.f32 %v3029_v43, %v5420_v24 }
 0x19a   :  { %v4658_v56 = vld [vmem:[#allocation5 + $0xb18] sm:$0xf]  ;;  %v4403_v4 = vor.u32 %v5055_v55, %v4402_v53  ;;  %2909 = vmatpush.bf16.msra.mxu1 %v4691_v51  ;;  %v2658_v53 = vpop.f32.mrf.mxu1  ;;  %v3031_v55 = vrot.slane %v2683_v45, 4  ;;  %v3117_v0 = vadd.f32 %v3116_v44, %v3115_v5  ;;  %v3508_v19 = vld [vmem:[#allocation5 + $0x238] sm:$0xf0] }
 0x19b   :  { %v5119_v58 = vld [vmem:[#allocation5 + $0xb34] sm:$0xf0]  ;;  %2935 = vmatpush.bf16.msra.mxu3 %v3671_v57  ;;  %v3575_v57 = vor.u32 %v4843_v41, %v3572_v42  ;;  %v3988_v5 = vld [vmem:[#allocation5 + $0x5f8] sm:$0xf0] }
 0x19c   :  { %v4659_v31 = vor.u32 %v5119_v58, %v4658_v56  ;;  %v4370_v9 = vld [vmem:[#allocation5 + $0x8d8] sm:$0xf]  ;;  %2897 = vmatpush.bf16.msra.mxu0 %v4403_v4  ;;  %v3097_v56 = vmul.f32 %v2683_v45, %v2683_v45  ;;  %v3284_v58 = vld [vmem:[#allocation5 + $0x78] sm:$0xf0]  ;;  %v3032_v3 = vadd.f32 %v3031_v55, %v2683_v45  ;;  %v2684_v22 = vpop.f32.mrf.mxu3  ;;  %v3991_v45 = vor.u32 %v4947_v62, %v3988_v5 }
 0x19d   :  { %v5047_v10 = vld [vmem:[#allocation5 + $0x8f4] sm:$0xf0]  ;;  %2923 = vmatpush.bf16.msra.mxu2 %v3383_v37  ;;  %v3287_v7 = vor.u32 %v4771_v52, %v3284_v58  ;;  %v5139_v8 = vld [vmem:[#allocation5 + $0xbdc] sm:$0xf]  ;;  %v3070_v55 = vrot.slane %v3030_v35, 6 }
 0x19e   :  { %v4626_v11 = vld [vmem:[#allocation5 + $0xad8] sm:$0xf]  ;;  %v4371_v12 = vor.u32 %v5047_v10, %v4370_v9  ;;  %2910 = vmatpush.bf16.msra.mxu1 %v4659_v31  ;;  %v3120_v4 = vrot.slane %v3097_v56, 4  ;;  %v4763_v9 = vld [vmem:[#allocation5 + $0x1c] sm:$0xf] }
 0x19f   :  { %v5111_v15 = vld [vmem:[#allocation5 + $0xaf4] sm:$0xf0]  ;;  %2936 = vmatpush.bf16.msra.mxu3 %v3639_v13  ;;  %v3252_v10 = vld [vmem:[#allocation5 + $0x38] sm:$0xf0]  ;;  %v2671_v13 = vpop.f32.mrf.mxu2 }
 0x1a0   :  { %v4627_v25 = vor.u32 %v5111_v15, %v4626_v11  ;;  %v4338_v28 = vld [vmem:[#allocation5 + $0x898] sm:$0xf]  ;;  %2898 = vmatpush.bf16.msra.mxu0 %v4371_v12  ;;  %v4827_v11 = vld [vmem:[#allocation5 + $0x21c] sm:$0xf]  ;;  %v3033_v15 = vrot.slane %v3032_v3, 2  ;;  %v3121_v16 = vadd.f32 %v3120_v4, %v3097_v56 }
 0x1a1   :  { %v5039_v29 = vld [vmem:[#allocation5 + $0x8b4] sm:$0xf0]  ;;  %2924 = vmatpush.bf16.msra.mxu2 %v3351_v26  ;;  %v5011_v12 = vld [vmem:[#allocation5 + $0x7dc] sm:$0xf]  ;;  %v3118_v26 = vrot.slane %v3117_v0, 1  ;;  %v3511_v44 = vor.u32 %v4827_v11, %v3508_v19 }
 0x1a2   :  { %v4594_v30 = vld [vmem:[#allocation5 + $0xa98] sm:$0xf]  ;;  %v4339_v46 = vor.u32 %v5039_v29, %v4338_v28  ;;  %2911 = vmatpush.bf16.msra.mxu1 %v4627_v25  ;;  %v4244_v25 = vld [vmem:[#allocation5 + $0x7f8] sm:$0xf0]  ;;  %v3034_v27 = vadd.f32 %v3033_v15, %v3032_v3  ;;  %v3122_v28 = vrot.slane %v3121_v16, 2 }
 0x1a3   :  { %v5103_v6 = vld [vmem:[#allocation5 + $0xab4] sm:$0xf0]  ;;  %2937 = vmatpush.bf16.msra.mxu3 %v3607_v34  ;;  %v4500_v34 = vld [vmem:[#allocation5 + $0x9f8] sm:$0xf0] }
 0x1a4   :  { %v4306_v47 = vld [vmem:[#allocation5 + $0x858] sm:$0xf]  ;;  %v4595_v23 = vor.u32 %v5103_v6, %v4594_v30  ;;  %2899 = vmatpush.bf16.msra.mxu0 %v4339_v46  ;;  %v5075_v30 = vld [vmem:[#allocation5 + $0x9dc] sm:$0xf]  ;;  %v3255_v6 = vor.u32 %v4763_v9, %v3252_v10  ;;  %v3035_v41 = vrot.slane %v3034_v27, 1  ;;  %v3123_v42 = vadd.f32 %v3122_v28, %v3121_v16 }
 0x1a5   :  { %v5031_v18 = vld [vmem:[#allocation5 + $0x874] sm:$0xf0]  ;;  %2925 = vmatpush.bf16.msra.mxu2 %v3319_v48  ;;  %v4756_v40 = vld [vmem:[#allocation5 + $0xbf8] sm:$0xf0] }
 0x1a6   :  { %v4562_v49 = vld [vmem:[#allocation5 + $0xa58] sm:$0xf]  ;;  %v4307_v63 = vor.u32 %v5031_v18, %v4306_v47  ;;  %2912 = vmatpush.bf16.msra.mxu1 %v4595_v23  ;;  %v4939_v46 = vld [vmem:[#allocation5 + $0x59c] sm:$0xf]  ;;  %v4247_v47 = vor.u32 %v5011_v12, %v4244_v25  ;;  %v4503_v18 = vor.u32 %v5075_v30, %v4500_v34  ;;  %v3124_v24 = vrot.slane %v3123_v42, 1  ;;  %v5440_v34 = vpop.f32.mrf.mxu1 }
 0x1a7   :  { %v5095_v51 = vld [vmem:[#allocation5 + $0xa74] sm:$0xf0]  ;;  %2938 = vmatpush.bf16.msra.mxu3 %v3575_v57  ;;  %v3956_v33 = vld [vmem:[#allocation5 + $0x5b8] sm:$0xf0]  ;;  %v4759_v43 = vor.u32 %v5139_v8, %v4756_v40 }
 0x1a8   :  { %v4274_v14 = vld [vmem:[#allocation5 + $0x818] sm:$0xf]  ;;  %v4563_v38 = vor.u32 %v5095_v51, %v4562_v49  ;;  %2900 = vmatpush.bf16.msra.mxu0 %v4307_v63  ;;  %v5003_v23 = vld [vmem:[#allocation5 + $0x79c] sm:$0xf]  ;;  %v3119_v49 = vadd.f32 %v3118_v26, %v3117_v0  ;;  %v3036_v51 = vadd.f32 %v3035_v41, %v3034_v27  ;;  %v3125_v59 = vadd.f32 %v3124_v24, %v3123_v42 }
 0x1a9   :  { %v5023_v61 = vld [vmem:[#allocation5 + $0x834] sm:$0xf0]  ;;  %2926 = vmatpush.bf16.msra.mxu2 %v3287_v7  ;;  %v4212_v48 = vld [vmem:[#allocation5 + $0x7b8] sm:$0xf0]  ;;  %v3959_v60 = vor.u32 %v4939_v46, %v3956_v33 }
 0x1aa   :  { %v4530_v31 = vld [vmem:[#allocation5 + $0xa18] sm:$0xf]  ;;  %v4275_v29 = vor.u32 %v5023_v61, %v4274_v14  ;;  %2913 = vmatpush.bf16.msra.mxu1 %v4563_v38  ;;  %v5067_v52 = vld [vmem:[#allocation5 + $0x99c] sm:$0xf]  ;;  %v3071_v58 = vrot.slane %v3036_v51, 5  ;;  %v4215_v61 = vor.u32 %v5003_v23, %v4212_v48 }
 0x1ab   :  { %v5087_v37 = vld [vmem:[#allocation5 + $0xa34] sm:$0xf0]  ;;  %2939 = vmatpush.bf16.msra.mxu3 %v3543_v17  ;;  %v4468_v53 = vld [vmem:[#allocation5 + $0x9b8] sm:$0xf0] }
 0x1ac   :  { %v4531_v39 = vor.u32 %v5087_v37, %v4530_v31  ;;  %2901 = vmatpush.bf16.msra.mxu0 %v4275_v29  ;;  %v5131_v56 = vld [vmem:[#allocation5 + $0xb9c] sm:$0xf]  ;;  %v4471_v0 = vor.u32 %v5067_v52, %v4468_v53  ;;  %v3159_v31 = vrot.slane %v3119_v49, 6  ;;  %v3160_v37 = vrot.slane %v3125_v59, 5  ;;  %v5438_v29 = vpop.f32.mrf.mxu0  ;;  %v2721_v53 = vpop.f32.mrf.mxu2 }
 0x1ad   :  { %2927 = vmatpush.bf16.msra.mxu2 %v3255_v6  ;;  %v4724_v57 = vld [vmem:[#allocation5 + $0xbb8] sm:$0xf0]  ;;  %v3079_v10 = vsel %vm3078_vm1, %v3070_v55, %v3071_v58  ;;  %v2734_v58 = vpop.f32.mrf.mxu3 }
 0x1ae   :  { %2914 = vmatpush.bf16.msra.mxu1 %v4531_v39  ;;  %v4931_v14 = vld [vmem:[#allocation5 + $0x55c] sm:$0xf]  ;;  %v4727_v38 = vor.u32 %v5131_v56, %v4724_v57  ;;  %v5430_v15 = vsel %vm3080_vm2, %v5379_v50, %v3079_v10  ;;  %v3166_v17 = vsel %vm3078_vm1, %v3159_v31, %v3160_v37 }
 0x1af   :  { %2940 = vmatpush.bf16.msra.mxu3 %v3511_v44  ;;  %v3924_v3 = vld [vmem:[#allocation5 + $0x578] sm:$0xf0]  ;;  %2902 = vmatmul.bf16.vlgmr.msra.gmra.mxu0 %v5330_v32 }
 0x1b0   :  { %2946 = vmatpush.bf16.msrb.mxu0 %v3991_v45  ;;  %v4995_v4 = vld [vmem:[#allocation5 + $0x75c] sm:$0xf]  ;;  %2928 = vmatmul.bf16.vlgmr.msra.gmra.mxu2 %v5318_v1  ;;  %v3927_v16 = vor.u32 %v4931_v14, %v3924_v3  ;;  %v5436_v1 = vsel %vm3080_vm2, %v5385_v54, %v3166_v17 }
 0x1b1   :  { %2972 = vmatpush.bf16.msrb.mxu2 %v4503_v18  ;;  %v4180_v63 = vld [vmem:[#allocation5 + $0x778] sm:$0xf0]  ;;  %2915 = vmatmul.bf16.vlgmr.msra.gmra.mxu1 %v5332_v36 }
 0x1b2   :  { %2959 = vmatpush.bf16.msrb.mxu1 %v4247_v47  ;;  %v5059_v7 = vld [vmem:[#allocation5 + $0x95c] sm:$0xf]  ;;  %2941 = vmatmul.bf16.vlgmr.msra.gmra.mxu3 %v5320_v2  ;;  %v4183_v19 = vor.u32 %v4995_v4, %v4180_v63 }
 0x1b3   :  { %2985 = vmatpush.bf16.msrb.mxu3 %v4759_v43  ;;  %v4436_v9 = vld [vmem:[#allocation5 + $0x978] sm:$0xf0] }
 0x1b4   :  { %v5123_v11 = vld [vmem:[#allocation5 + $0xb5c] sm:$0xf]  ;;  %2947 = vmatpush.bf16.msrb.mxu0 %v3959_v60  ;;  %v4439_v62 = vor.u32 %v5059_v7, %v4436_v9  ;;  %v2697_v57 = vpop.f32.mrf.mxu0  ;;  %v2710_v60 = vpop.f32.mrf.mxu1 }
 0x1b5   :  { %v4692_v13 = vld [vmem:[#allocation5 + $0xb78] sm:$0xf0]  ;;  %2973 = vmatpush.bf16.msrb.mxu2 %v4471_v0 }
 0x1b6   :  { %2960 = vmatpush.bf16.msrb.mxu1 %v4215_v61  ;;  %v4923_v22 = vld [vmem:[#allocation5 + $0x51c] sm:$0xf]  ;;  %v4695_v50 = vor.u32 %v5123_v11, %v4692_v13 }
 0x1b7   :  { %v3892_v5 = vld [vmem:[#allocation5 + $0x538] sm:$0xf0]  ;;  %2986 = vmatpush.bf16.msrb.mxu3 %v4727_v38 }
 0x1b8   :  { %v4987_v12 = vld [vmem:[#allocation5 + $0x71c] sm:$0xf]  ;;  %2948 = vmatpush.bf16.msrb.mxu0 %v3927_v16  ;;  %v3895_v30 = vor.u32 %v4923_v22, %v3892_v5 }
 0x1b9   :  { %v4148_v25 = vld [vmem:[#allocation5 + $0x738] sm:$0xf0]  ;;  %2974 = vmatpush.bf16.msrb.mxu2 %v4439_v62 }
 0x1ba   :  { %v5051_v26 = vld [vmem:[#allocation5 + $0x91c] sm:$0xf]  ;;  %2961 = vmatpush.bf16.msrb.mxu1 %v4183_v19  ;;  %v4151_v35 = vor.u32 %v4987_v12, %v4148_v25 }
 0x1bb   :  { %v4404_v27 = vld [vmem:[#allocation5 + $0x938] sm:$0xf0]  ;;  %2987 = vmatpush.bf16.msrb.mxu3 %v4695_v50  ;;  %v2723_v50 = vpop.f32.mrf.mxu2 }
 0x1bc   :  { %v5115_v28 = vld [vmem:[#allocation5 + $0xb1c] sm:$0xf]  ;;  %v4407_v39 = vor.u32 %v5051_v26, %v4404_v27  ;;  %2949 = vmatpush.bf16.msrb.mxu0 %v3895_v30  ;;  %v2736_v27 = vpop.f32.mrf.mxu3 }
 0x1bd   :  { %v4660_v2 = vld [vmem:[#allocation5 + $0xb38] sm:$0xf0] }
 0x1be   :  { %v4915_v6 = vld [vmem:[#allocation5 + $0x4dc] sm:$0xf]  ;;  %v4663_v40 = vor.u32 %v5115_v28, %v4660_v2  ;;  %2962 = vmatpush.bf16.msrb.mxu1 %v4151_v35  ;;  %2975 = vmatpush.bf16.msrb.mxu2 %v4407_v39  ;;  %v2709_v35 = vadd.f32 %v5440_v34, %v5438_v29 }
 0x1bf   :  { %v3860_v54 = vld [vmem:[#allocation5 + $0x4f8] sm:$0xf0] }
 0x1c0   :  { %v4979_v8 = vld [vmem:[#allocation5 + $0x6dc] sm:$0xf]  ;;  %v3863_v47 = vor.u32 %v4915_v6, %v3860_v54  ;;  %2988 = vmatpush.bf16.msrb.mxu3 %v4663_v40  ;;  %v2722_v6 = vadd.f32 %v2721_v53, %v2709_v35 }
 0x1c1   :  { %v4116_v41 = vld [vmem:[#allocation5 + $0x6f8] sm:$0xf0] }
 0x1c2   :  { %v5043_v42 = vld [vmem:[#allocation5 + $0x8dc] sm:$0xf]  ;;  %v4119_v18 = vor.u32 %v4979_v8, %v4116_v41  ;;  %2950 = vmatpush.bf16.msrb.mxu0 %v3863_v47  ;;  %v2735_v54 = vadd.f32 %v2734_v58, %v2722_v6  ;;  %v2747_v8 = vpop.f32.mrf.mxu0  ;;  %v2760_v41 = vpop.f32.mrf.mxu1 }
 0x1c3   :  { %v4372_v44 = vld [vmem:[#allocation5 + $0x8f8] sm:$0xf0] }
 0x1c4   :  { %v5107_v45 = vld [vmem:[#allocation5 + $0xadc] sm:$0xf]  ;;  %v4375_v33 = vor.u32 %v5043_v42, %v4372_v44  ;;  %2963 = vmatpush.bf16.msrb.mxu1 %v4119_v18  ;;  %v2748_v40 = vadd.f32 %v2747_v8, %v2735_v54  ;;  %v2773_v29 = vpop.f32.mrf.mxu2 }
 0x1c5   :  { %v4628_v46 = vld [vmem:[#allocation5 + $0xaf8] sm:$0xf0] }
 0x1c6   :  { %v4907_v23 = vld [vmem:[#allocation5 + $0x49c] sm:$0xf]  ;;  %v4631_v51 = vor.u32 %v5107_v45, %v4628_v46  ;;  %2976 = vmatpush.bf16.msrb.mxu2 %v4375_v33  ;;  %v2761_v42 = vadd.f32 %v2760_v41, %v2748_v40  ;;  %v2786_v34 = vpop.f32.mrf.mxu3 }
 0x1c7   :  { %v3828_v48 = vld [vmem:[#allocation5 + $0x4b8] sm:$0xf0] }
 0x1c8   :  { %v4971_v49 = vld [vmem:[#allocation5 + $0x69c] sm:$0xf]  ;;  %v3831_v59 = vor.u32 %v4907_v23, %v3828_v48  ;;  %2989 = vmatpush.bf16.msrb.mxu3 %v4631_v51  ;;  %3002 = vst [vmem:[#allocation7 + $0x20] sm:$0xff] %v2761_v42  ;;  %v3098_v18 = vmul.f32 %v2761_v42, %v2761_v42  ;;  %v3037_v33 = vrot.slane %v2761_v42, 4 }
 0x1c9   :  { %v4084_v24 = vld [vmem:[#allocation5 + $0x6b8] sm:$0xf0] }
 0x1ca   :  { %v5035_v43 = vld [vmem:[#allocation5 + $0x89c] sm:$0xf]  ;;  %v4087_v14 = vor.u32 %v4971_v49, %v4084_v24  ;;  %2951 = vmatpush.bf16.msrb.mxu0 %v3831_v59  ;;  %v2749_v44 = vpop.f32.mrf.mxu0  ;;  %v2762_v45 = vpop.f32.mrf.mxu1 }
 0x1cb   :  { %v4340_v52 = vld [vmem:[#allocation5 + $0x8b8] sm:$0xf0] }
 0x1cc   :  { %v5099_v55 = vld [vmem:[#allocation5 + $0xa9c] sm:$0xf]  ;;  %v4343_v61 = vor.u32 %v5035_v43, %v4340_v52  ;;  %2964 = vmatpush.bf16.msrb.mxu1 %v4087_v14  ;;  %v2775_v46 = vpop.f32.mrf.mxu2 }
 0x1cd   :  { %v4596_v56 = vld [vmem:[#allocation5 + $0xab8] sm:$0xf0] }
 0x1ce   :  { %v4899_v0 = vld [vmem:[#allocation5 + $0x45c] sm:$0xf]  ;;  %v4599_v63 = vor.u32 %v5099_v55, %v4596_v56  ;;  %2977 = vmatpush.bf16.msrb.mxu2 %v4343_v61  ;;  %v2788_v47 = vpop.f32.mrf.mxu3 }
 0x1cf   :  { %v3796_v3 = vld [vmem:[#allocation5 + $0x478] sm:$0xf0] }
 0x1d0   :  { %v4963_v4 = vld [vmem:[#allocation5 + $0x65c] sm:$0xf]  ;;  %v3799_v10 = vor.u32 %v4899_v0, %v3796_v3  ;;  %2990 = vmatpush.bf16.msrb.mxu3 %v4599_v63 }
 0x1d1   :  { %v4052_v31 = vld [vmem:[#allocation5 + $0x678] sm:$0xf0] }
 0x1d2   :  { %v5027_v37 = vld [vmem:[#allocation5 + $0x85c] sm:$0xf]  ;;  %v4055_v11 = vor.u32 %v4963_v4, %v4052_v31  ;;  %2952 = vmatpush.bf16.msrb.mxu0 %v3799_v10 }
 0x1d3   :  { %v4308_v38 = vld [vmem:[#allocation5 + $0x878] sm:$0xf0] }
 0x1d4   :  { %v5091_v7 = vld [vmem:[#allocation5 + $0xa5c] sm:$0xf]  ;;  %v4311_v13 = vor.u32 %v5027_v37, %v4308_v38  ;;  %2965 = vmatpush.bf16.msrb.mxu1 %v4055_v11 }
 0x1d5   :  { %v4564_v9 = vld [vmem:[#allocation5 + $0xa78] sm:$0xf0] }
 0x1d6   :  { %v4891_v16 = vld [vmem:[#allocation5 + $0x41c] sm:$0xf]  ;;  %v4567_v62 = vor.u32 %v5091_v7, %v4564_v9  ;;  %2978 = vmatpush.bf16.msrb.mxu2 %v4311_v13 }
 0x1d7   :  { %v3764_v17 = vld [vmem:[#allocation5 + $0x438] sm:$0xf0] }
 0x1d8   :  { %v4955_v19 = vld [vmem:[#allocation5 + $0x61c] sm:$0xf]  ;;  %v3767_v28 = vor.u32 %v4891_v16, %v3764_v17  ;;  %2991 = vmatpush.bf16.msrb.mxu3 %v4567_v62 }
 0x1d9   :  { %v4020_v22 = vld [vmem:[#allocation5 + $0x638] sm:$0xf0] }
 0x1da   :  { %v5019_v5 = vld [vmem:[#allocation5 + $0x81c] sm:$0xf]  ;;  %v4023_v2 = vor.u32 %v4955_v19, %v4020_v22  ;;  %2953 = vmatpush.bf16.msrb.mxu0 %v3767_v28 }
 0x1db   :  { %v4276_v12 = vld [vmem:[#allocation5 + $0x838] sm:$0xf0] }
 0x1dc   :  { %v5083_v25 = vld [vmem:[#allocation5 + $0xa1c] sm:$0xf]  ;;  %v4279_v30 = vor.u32 %v5019_v5, %v4276_v12  ;;  %2966 = vmatpush.bf16.msrb.mxu1 %v4023_v2 }
 0x1dd   :  { %v4532_v26 = vld [vmem:[#allocation5 + $0xa38] sm:$0xf0]  ;;  %2954 = vmatmul.bf16.vlgmr.msrb.gmra.mxu0 %v5324_v20  ;;  %v2787_v20 = vadd.f32 %v2786_v34, %v2773_v29 }
 0x1de   :  { %v4535_v39 = vor.u32 %v5083_v25, %v4532_v26  ;;  %2979 = vmatpush.bf16.msrb.mxu2 %v4279_v30 }
 0x1df   :  { %2967 = vmatmul.bf16.vlgmr.msrb.gmra.mxu1 %v5326_v21  ;;  %v3126_v21 = vrot.slane %v3098_v18, 4 }
 0x1e0   :  { %2992 = vmatpush.bf16.msrb.mxu3 %v4535_v39 }
 0x1e1   :  { %2980 = vmatmul.bf16.vlgmr.msrb.gmra.mxu2 %v5330_v32  ;;  %v3127_v51 = vadd.f32 %v3126_v21, %v3098_v18 }
 0x1e3   :  { %2993 = vmatmul.bf16.vlgmr.msrb.gmra.mxu3 %v5332_v36  ;;  %v3038_v36 = vadd.f32 %v3037_v33, %v2761_v42  ;;  %v3128_v55 = vrot.slane %v3127_v51, 2 }
 0x1e5   :  { %v3039_v43 = vrot.slane %v3038_v36, 2  ;;  %v3129_v61 = vadd.f32 %v3128_v55, %v3127_v51 }
 0x1e7   :  { %v3040_v59 = vadd.f32 %v3039_v43, %v3038_v36  ;;  %v3130_v7 = vrot.slane %v3129_v61, 1 }
 0x1e9   :  { %v2799_v23 = vpop.f32.mrf.mxu0  ;;  %v3041_v63 = vrot.slane %v3040_v59, 1  ;;  %v3131_v17 = vadd.f32 %v3130_v7, %v3129_v61 }
 0x1ea   :  { %v2800_v32 = vadd.f32 %v2799_v23, %v2787_v20 }
 0x1eb   :  { %v2812_v48 = vpop.f32.mrf.mxu1  ;;  %v3042_v11 = vadd.f32 %v3041_v63, %v3040_v59  ;;  %v3161_v50 = vrot.slane %v3131_v17, 4 }
 0x1ec   :  { %v2813_v49 = vadd.f32 %v2812_v48, %v2800_v32 }
 0x1ed   :  { %v3072_v22 = vrot.slane %v3042_v11, 4 }
 0x1f1   :  { %v2801_v57 = vpop.f32.mrf.mxu0 }
 0x1f3   :  { %v2825_v24 = vpop.f32.mrf.mxu2  ;;  %v2814_v58 = vpop.f32.mrf.mxu1 }
 0x1f4   :  { %v2826_v52 = vadd.f32 %v2825_v24, %v2813_v49 }
 0x1f5   :  { %v2838_v53 = vpop.f32.mrf.mxu3 }
 0x1f6   :  { %v2839_v56 = vadd.f32 %v2838_v53, %v2826_v52 }
 0x1f8   :  { %3003 = vst [vmem:[#allocation7 + $0x28] sm:$0xff] %v2839_v56  ;;  %v3043_v60 = vrot.slane %v2839_v56, 4  ;;  %v3099_v14 = vmul.f32 %v2839_v56, %v2839_v56 }
 0x1fa   :  { %v3044_v0 = vadd.f32 %v3043_v60, %v2839_v56  ;;  %v3132_v3 = vrot.slane %v3099_v14, 4 }
 0x1fb   :  { %v2827_v4 = vpop.f32.mrf.mxu2 }
 0x1fc   :  { %v3045_v31 = vrot.slane %v3044_v0, 2  ;;  %v3133_v37 = vadd.f32 %v3132_v3, %v3099_v14 }
 0x1fd   :  { %v2840_v38 = vpop.f32.mrf.mxu3 }
 0x1fe   :  { %v3046_v9 = vadd.f32 %v3045_v31, %v3044_v0  ;;  %v3134_v10 = vrot.slane %v3133_v37, 2 }
 0x200   :  { %v3047_v13 = vrot.slane %v3046_v9, 1  ;;  %v3135_v16 = vadd.f32 %v3134_v10, %v3133_v37 }
 0x202   :  { %v3048_v19 = vadd.f32 %v3047_v13, %v3046_v9  ;;  %v3136_v62 = vrot.slane %v3135_v16, 1 }
 0x204   :  { %v3073_v5 = vrot.slane %v3048_v19, 3  ;;  %v3137_v12 = vadd.f32 %v3136_v62, %v3135_v16 }
 0x206   :  { %v3162_v25 = vrot.slane %v3137_v12, 3  ;;  %v5448_v26 = vsel %vm3082_vm3, %v3072_v22, %v3073_v5 }
 0x208   :  { %v5450_v27 = vsel %vm3082_vm3, %v3161_v50, %v3162_v25 }
 0x209   :  { %v2851_v28 = vpop.f32.mrf.mxu0 }
 0x20b   :  { %v2864_v2 = vpop.f32.mrf.mxu1 }
 0x20c   :  { %v2865_v40 = vadd.f32 %v2864_v2, %v2851_v28 }
 0x211   :  { %v2853_v35 = vpop.f32.mrf.mxu0 }
 0x213   :  { %v2877_v30 = vpop.f32.mrf.mxu2  ;;  %v2866_v6 = vpop.f32.mrf.mxu1 }
 0x214   :  { %v2878_v41 = vadd.f32 %v2877_v30, %v2865_v40 }
 0x215   :  { %v2890_v39 = vpop.f32.mrf.mxu3 }
 0x216   :  { %v2891_v42 = vadd.f32 %v2890_v39, %v2878_v41 }
 0x21b   :  { %v2879_v54 = vpop.f32.mrf.mxu2 }
 0x21d   :  { %v2892_v8 = vpop.f32.mrf.mxu3 }
 0x22c   :  { %v2903_v29 = vpop.f32.mrf.mxu0 }
 0x22d   :  { %v2904_v34 = vadd.f32 %v2903_v29, %v2891_v42 }
 0x22e   :  { %v2916_v44 = vpop.f32.mrf.mxu1 }
 0x22f   :  { %v2917_v45 = vadd.f32 %v2916_v44, %v2904_v34 }
 0x231   :  { %3004 = vst [vmem:[#allocation7 + $0x30] sm:$0xff] %v2917_v45  ;;  %v3100_v23 = vmul.f32 %v2917_v45, %v2917_v45  ;;  %v3049_v32 = vrot.slane %v2917_v45, 4 }
 0x233   :  { %v2929_v46 = vpop.f32.mrf.mxu2  ;;  %v3138_v51 = vrot.slane %v3100_v23, 4  ;;  %v3050_v43 = vadd.f32 %v3049_v32, %v2917_v45 }
 0x234   :  { %v2905_v18 = vpop.f32.mrf.mxu0 }
 0x235   :  { %v2942_v47 = vpop.f32.mrf.mxu3  ;;  %v3139_v52 = vadd.f32 %v3138_v51, %v3100_v23  ;;  %v3051_v56 = vrot.slane %v3050_v43, 2 }
 0x236   :  { %v2918_v20 = vpop.f32.mrf.mxu1  ;;  %v2943_v48 = vadd.f32 %v2942_v47, %v2929_v46 }
 0x237   :  { %v3140_v14 = vrot.slane %v3139_v52, 2  ;;  %v3052_v0 = vadd.f32 %v3051_v56, %v3050_v43 }
 0x239   :  { %v3141_v63 = vadd.f32 %v3140_v14, %v3139_v52  ;;  %v3053_v7 = vrot.slane %v3052_v0, 1 }
 0x23b   :  { %v2931_v33 = vpop.f32.mrf.mxu2  ;;  %v3142_v13 = vrot.slane %v3141_v63, 1  ;;  %v3054_v19 = vadd.f32 %v3053_v7, %v3052_v0 }
 0x23d   :  { %v2944_v21 = vpop.f32.mrf.mxu3  ;;  %v3143_v5 = vadd.f32 %v3142_v13, %v3141_v63  ;;  %v3074_v25 = vrot.slane %v3054_v19, 2 }
 0x23f   :  { %v3163_v30 = vrot.slane %v3143_v5, 2 }
 0x25a   :  { %v2955_v36 = vpop.f32.mrf.mxu0 }
 0x25b   :  { %v2956_v24 = vadd.f32 %v2955_v36, %v2943_v48 }
 0x25c   :  { %v2968_v49 = vpop.f32.mrf.mxu1 }
 0x25d   :  { %v2969_v53 = vadd.f32 %v2968_v49, %v2956_v24 }
 0x262   :  { %v2957_v59 = vpop.f32.mrf.mxu0 }
 0x264   :  { %v2981_v55 = vpop.f32.mrf.mxu2  ;;  %v2970_v60 = vpop.f32.mrf.mxu1 }
 0x265   :  { %v2982_v57 = vadd.f32 %v2981_v55, %v2969_v53 }
 0x266   :  { %v2994_v58 = vpop.f32.mrf.mxu3 }
 0x267   :  { %v2995_v61 = vadd.f32 %v2994_v58, %v2982_v57 }
 0x269   :  { %3005 = vst [vmem:[#allocation7 + $0x38] sm:$0xff] %v2995_v61  ;;  %v3055_v3 = vrot.slane %v2995_v61, 4  ;;  %v3101_v4 = vmul.f32 %v2995_v61, %v2995_v61 }
 0x26a   :  { %3185 = dma.vmem_to_hbm [thread:$0]  %s3181_s1, 1024, %s3183_s29, [#allocation4]  }
 0x26b   :  { %v3056_v31 = vadd.f32 %v3055_v3, %v2995_v61  ;;  %v3144_v37 = vrot.slane %v3101_v4, 4 }
 0x26c   :  { %v2983_v38 = vpop.f32.mrf.mxu2 }
 0x26d   :  { %v3057_v9 = vrot.slane %v3056_v31, 2  ;;  %v3145_v10 = vadd.f32 %v3144_v37, %v3101_v4 }
 0x26e   :  { %v2996_v11 = vpop.f32.mrf.mxu3 }
 0x26f   :  { %v3058_v16 = vadd.f32 %v3057_v9, %v3056_v31  ;;  %v3146_v17 = vrot.slane %v3145_v10, 2 }
 0x271   :  { %v3059_v62 = vrot.slane %v3058_v16, 1  ;;  %v3147_v22 = vadd.f32 %v3146_v17, %v3145_v10 }
 0x273   :  { %v3060_v12 = vadd.f32 %v3059_v62, %v3058_v16  ;;  %v3148_v50 = vrot.slane %v3147_v22, 1 }
 0x275   :  { %v3075_v28 = vrot.slane %v3060_v12, 1  ;;  %v3149_v2 = vadd.f32 %v3148_v50, %v3147_v22 }
 0x277   :  { %v3164_v35 = vrot.slane %v3149_v2, 1  ;;  %v3085_v39 = vsel %vm3084_vm4, %v3074_v25, %v3075_v28 }
 0x278   :  { %v3087_v6 = vsel %vm3086_vm5, %v5448_v26, %v3085_v39 }
 0x279   :  { %v3089_v54 = vsel %vm3088_vm6, %v5430_v15, %v3087_v6  ;;  %v3169_v8 = vsel %vm3084_vm4, %v3163_v30, %v3164_v35 }
 0x27a   :  { %v3170_v40 = vsel %vm3086_vm5, %v5450_v27, %v3169_v8  ;;  %3092 = vst [vmem:[#allocation8] sm:$0xff] %v3089_v54 }
 0x27b   :  { %v3171_v41 = vsel %vm3088_vm6, %v5436_v1, %v3170_v40  ;;  %3196 = dma.vmem_to_hbm [thread:$0]  %s3192_s30, 128, %s3194_s7, [#allocation9]  }
 0x27c   :  { %3174 = vst [vmem:[#allocation10] sm:$0xff] %v3171_v41 }
 0x27d   :  { %3207 = dma.vmem_to_hbm [thread:$0]  %s3203_s9, 128, %s3205_s12, [#allocation9]  }
 0x27e   :  { %5276 = dma.done.wait [#allocation4], 1024  }
 0x27f   :  { %5277 = vsyncadd [#allocation4], 4294966272 }
 0x280   :  { %5278 = dma.done.wait [#allocation9], 256  }
 0x281   :  { %5279 = vsyncadd [#allocation9], 4294967040 }
 0x282   :  { %3220 = vsyncpa [#allocation3], 1 }
 0x283   :  { %3221 = vsyncpa [#allocation6], 1 }
 0x284   :  { %3222 = vsyncpa [#allocation4], 1 }
 0x285   :  { %3223 = vsyncpa [#allocation9], 1 }

</bundles_post_ra>
